<compile_context>
chip_gen: v5e
topology: v5e:2x2
jax: 0.10.0
libtpu: 0.0.40
codegen_flags: <defaults>
</compile_context>

<pallas_src>
import math
from functools import partial

import jax
import jax.numpy as jnp
from jax.experimental import pallas as pl
from jax.experimental.pallas import tpu as pltpu

# ---------------------------------------------------------------------------
# Synthetic "gv" config (small, deterministic).  dropout=0 -> nn.Dropout is id.
# BatchNorm layers declared in SeqExtractor.__init__ are never called in the
# shown forward(), so they are omitted.
# ---------------------------------------------------------------------------
GV = dict(
    spotfea=0,
    min15hiddensize=32,
    min5seqlen=64,
    hidpool=1,
    min15corrsize=32,
    posembedsize=16,
    posembed=1.0,
    dropout=0.0,
    reserved=1,
    seqlayer3=False,      # keep T small (avoids mseqlen**3 stride)
    eps=1e-5,
)
MSEQLEN = 8
CROSSSIZE = 32            # == min15hiddensize (implicit assumption of the module)
CORRSIZE = GV["min15corrsize"]
PE = GV["posembedsize"]
PAD = 128                 # lane-dense output width for all 32-wide projections


# --------------------------- Pallas kernels --------------------------------
def _linear_relu_kernel(x_ref, w_ref, b_ref, o_ref):
    # Single-block (M, K) @ (K, 128) + b, ReLU.  Output is 128-lane dense.
    y = jnp.dot(x_ref[...], w_ref[...], preferred_element_type=jnp.float32)
    o_ref[...] = jnp.maximum(y + b_ref[...], 0.0)


def css_model_pallas(x3d, w, b):
    """CssModel stand-in: Linear + ReLU, fused in one single-block kernel.

    Output feature dim (32) is zero-padded to 128 lanes inside the kernel and
    sliced back in the wrapper.
    """
    # TODO(synk): CssModel source not provided; deterministic stand-in = Linear + ReLU.
    T, N, F = x3d.shape
    C = w.shape[1]
    w_pad = jnp.pad(w, ((0, 0), (0, PAD - C)))
    b_pad = jnp.pad(b, (0, PAD - C)).reshape(1, PAD)
    M = T * N
    y = pl.pallas_call(
        _linear_relu_kernel,
        out_shape=jax.ShapeDtypeStruct((M, PAD), jnp.float32),
        grid_spec=pltpu.PrefetchScalarGridSpec(
            num_scalar_prefetch=0,
            grid=(1,),
            in_specs=[
                pl.BlockSpec((M, F), lambda i: (0, 0)),
                pl.BlockSpec((F, PAD), lambda i: (0, 0)),
                pl.BlockSpec((1, PAD), lambda i: (0, 0)),
            ],
            out_specs=pl.BlockSpec((M, PAD), lambda i: (0, 0)),
        ),
        compiler_params=pltpu.CompilerParams(dimension_semantics=("arbitrary",)),
    )(x3d.reshape(M, F), w_pad, b_pad)
    return y[:, :C].reshape(T, N, C)


def _seq_fused_kernel(x_ref, hid_ref, pebias_ref,
                      w_avg_ref, w_std_ref, w_max_ref, w_min_ref,
                      wc_ref, w_corr_ref, w_hid_ref, o_ref, *, s):
    """Fused SeqExtractor step for one stride-group:

    pools (avg / unbiased std / max / min over stride), SeqCorr stand-in,
    and csm1 (Linear + ReLU) with w_csm split into K-blocks -- the 688-wide
    inputx is never formed; its matmul is computed as a sum of partial dots.
    """
    x = x_ref[...]                                   # (S, N, F)
    inv_s = 1.0 / s
    sum_x = jnp.sum(x, axis=0)                       # (N, F)
    mean = sum_x * inv_s                             # 'avg'
    sum_x2 = jnp.sum(x * x, axis=0)
    # single-pass unbiased variance == torch.std(dim=0) (default unbiased)
    var = (sum_x2 - sum_x * mean) * (1.0 / (s - 1))
    std = jnp.sqrt(jnp.maximum(var, 0.0))            # 'std'
    mx = jnp.max(x, axis=0)                          # 'maxv'
    mn = jnp.min(x, axis=0)                          # 'minv'

    # TODO(synk): SeqCorr source not provided; stand-in = linear projection of
    # the stride-mean features to corrsize (shape-correct, deterministic).
    corr = jnp.dot(mean, wc_ref[...], preferred_element_type=jnp.float32)   # (N, 32)

    acc = pebias_ref[...]                            # (1, 128): posembed@W_pe + bias
    acc = acc + jnp.dot(mean, w_avg_ref[...], preferred_element_type=jnp.float32)
    acc = acc + jnp.dot(std, w_std_ref[...], preferred_element_type=jnp.float32)
    acc = acc + jnp.dot(mx, w_max_ref[...], preferred_element_type=jnp.float32)
    acc = acc + jnp.dot(mn, w_min_ref[...], preferred_element_type=jnp.float32)
    acc = acc + jnp.dot(corr, w_corr_ref[...], preferred_element_type=jnp.float32)
    acc = acc + jnp.dot(hid_ref[...], w_hid_ref[...], preferred_element_type=jnp.float32)
    # CssModel stand-in: Linear + ReLU (see css_model_pallas TODO).
    o_ref[...] = jnp.maximum(acc, 0.0)               # (N, 128) lane-dense store


def seq_extractor_fused(x, hidden, p, xstride, hiddenstride):
    """SeqExtractor.forward with pools + corr + pos-embed + csm1 fused into one
    pallas_call (grid iterates stride-groups)."""
    T, N, F = x.shape
    G = T // xstride
    xg = x.reshape(G, xstride, N, F)                               # (G, S, N, F)

    Th, Nh, H = hidden.shape
    Gh = Th // hiddenstride
    assert G == Gh and N == Nh
    hid = hidden.reshape(Gh, hiddenstride, Nh, H)
    # (Gh,s,N,H) -> (Gh,N,H,s) -> (Gh,N,H*s)  (same as the PyTorch permutes+reshape)
    hid = jnp.transpose(hid, (0, 2, 3, 1)).reshape(Gh, Nh, H * hiddenstride)

    # ---- split w_csm into K row-blocks matching the torch concat order
    #      [avg(F), std(F), max(F), min(F), corr(32), hidden(H*s), posembed(PE)]
    W = p["w_csm"]                                                 # (inputxlen, 32)
    C = p["b_csm"].shape[0]
    k0 = 0
    w_avg = W[k0:k0 + F]; k0 += F
    w_std = W[k0:k0 + F]; k0 += F
    w_max = W[k0:k0 + F]; k0 += F
    w_min = W[k0:k0 + F]; k0 += F
    w_corr = W[k0:k0 + CORRSIZE]; k0 += CORRSIZE
    w_hid = W[k0:k0 + H * hiddenstride]; k0 += H * hiddenstride
    w_pe = W[k0:k0 + PE]; k0 += PE
    assert k0 == W.shape[0]

    def pad_out(w):                                                # pad 32 -> 128 lanes
        return jnp.pad(w, ((0, 0), (0, PAD - C)))

    w_avg, w_std, w_max, w_min, w_corr, w_hid = map(
        pad_out, (w_avg, w_std, w_max, w_min, w_corr, w_hid))
    b_pad = jnp.pad(p["b_csm"], (0, PAD - C))

    # pos-embed contribution is identical for all names in a group -> fold it
    # (plus the bias) into one precomputed (G, 1, 128) row per group.
    pe = p["posembed"][:Gh] * GV["posembed"]                       # (G, PE)
    pe_bias = (pe @ pad_out(w_pe) + b_pad).reshape(Gh, 1, PAD)

    S = xstride
    HS = H * hiddenstride
    out = pl.pallas_call(
        partial(_seq_fused_kernel, s=S),
        out_shape=jax.ShapeDtypeStruct((G, N, PAD), jnp.float32),
        grid_spec=pltpu.PrefetchScalarGridSpec(
            num_scalar_prefetch=0,
            grid=(G,),
            in_specs=[
                pl.BlockSpec((pl.Squeezed(), S, N, F), lambda g: (g, 0, 0, 0)),
                pl.BlockSpec((pl.Squeezed(), N, HS), lambda g: (g, 0, 0)),
                pl.BlockSpec((pl.Squeezed(), 1, PAD), lambda g: (g, 0, 0)),
                pl.BlockSpec((F, PAD), lambda g: (0, 0)),
                pl.BlockSpec((F, PAD), lambda g: (0, 0)),
                pl.BlockSpec((F, PAD), lambda g: (0, 0)),
                pl.BlockSpec((F, PAD), lambda g: (0, 0)),
                pl.BlockSpec((F, CORRSIZE), lambda g: (0, 0)),
                pl.BlockSpec((CORRSIZE, PAD), lambda g: (0, 0)),
                pl.BlockSpec((HS, PAD), lambda g: (0, 0)),
            ],
            out_specs=pl.BlockSpec((pl.Squeezed(), N, PAD), lambda g: (g, 0, 0)),
        ),
        compiler_params=pltpu.CompilerParams(dimension_semantics=("arbitrary",)),
    )(xg, hid, pe_bias, w_avg, w_std, w_max, w_min, p["wc"], w_corr, w_hid)
    return out[..., :C]                                            # (G, N, 32)


# --------------------------- full forward -----------------------------------
def min5_forward(dcv_raw, valid, params):
    dcv = jnp.where(jnp.isfinite(dcv_raw), dcv_raw, 0.0).astype(jnp.float32)
    dcv = dcv[:, valid, :]                              # select valid cross-section
    dx = css_model_pallas(dcv, params["dcss1"]["w"], params["dcss1"]["b"])
    if GV["hidpool"]:
        dcv = jnp.concatenate([dcv, dx], axis=-1)       # (T, N, 96)

    outs = []
    dx = seq_extractor_fused(dcv, dx, params["seq1"],
                             xstride=MSEQLEN, hiddenstride=MSEQLEN)
    outs.append(dx[-GV["reserved"]:])
    dx = seq_extractor_fused(dcv, dx, params["seq2"],
                             xstride=MSEQLEN * MSEQLEN, hiddenstride=MSEQLEN)
    outs.append(dx[-GV["reserved"]:])
    # TODO(synk): gv['seqlayer3'] branch (stride mseqlen**3) disabled in this config.

    flat = []
    for o in outs:                                      # permute(1,0,2).reshape(N, -1)
        flat.append(jnp.transpose(o, (1, 0, 2)).reshape(o.shape[1], -1))
    return flat


# --------------------------- deterministic params ---------------------------
def init_params(key):
    cvnum = 64 * (1 + GV["spotfea"])
    hid = GV["min15hiddensize"]
    cvnumnew = cvnum + hid * GV["hidpool"]
    corrsize = GV["min15corrsize"]
    pe = GV["posembedsize"]
    npool = 4  # ['avg','std','maxv','minv']
    inputxlen = cvnumnew * npool + corrsize + hid * MSEQLEN + pe

    ks = jax.random.split(key, 8)

    def lin(k, fin, fout):
        return jax.random.normal(k, (fin, fout), jnp.float32) / math.sqrt(fin)

    return {
        "dcss1": {"w": lin(ks[0], cvnum, hid),
                  "b": jnp.zeros((hid,), jnp.float32)},
        "seq1": {"wc": lin(ks[1], cvnumnew, corrsize),
                 "posembed": jax.random.normal(ks[2], (10240, pe), jnp.float32) * 0.02,
                 "w_csm": lin(ks[3], inputxlen, CROSSSIZE),
                 "b_csm": jnp.zeros((CROSSSIZE,), jnp.float32)},
        "seq2": {"wc": lin(ks[4], cvnumnew, corrsize),
                 "posembed": jax.random.normal(ks[5], (10240, pe), jnp.float32) * 0.02,
                 "w_csm": lin(ks[6], inputxlen, CROSSSIZE),
                 "b_csm": jnp.zeros((CROSSSIZE,), jnp.float32)},
    }


if __name__ == "__main__":
    key = jax.random.PRNGKey(0)
    kd, kp = jax.random.split(key)

    T = GV["min5seqlen"]                # 64 time steps
    N0 = 10                             # raw cross-section before `valid`
    cvnum = 64 * (1 + GV["spotfea"])    # 64 features

    # TODO(synk): d2i.getmin5seq is an external data loader; synthetic dcv used.
    dcv = jax.random.normal(kd, (T, N0, cvnum), jnp.float32)
    dcv = dcv.at[0, 0, 0].set(jnp.nan).at[1, 1, 1].set(jnp.inf)   # exercise isfinite->0
    valid = jnp.array([0, 1, 2, 3, 4, 6, 7, 9], dtype=jnp.int32)  # 8 valid names

    params = init_params(kp)
    outs = jax.jit(partial(min5_forward, params=params))(dcv, valid)
    for o in outs:
        jax.block_until_ready(o)
    assert outs[0].shape == (8, GV["reserved"] * CROSSSIZE)
    assert outs[1].shape == (8, GV["reserved"] * CROSSSIZE)
    print("KERNEL_OK")
</pallas_src>

<mosaic_0001>
module attributes {stable_mosaic.version = 11 : i64} {
  func.func @_linear_relu_kernel(%arg0: i32, %arg1: memref<512x64xf32, #tpu.memory_space<vmem>>, %arg2: memref<64x128xf32, #tpu.memory_space<vmem>>, %arg3: memref<1x128xf32, #tpu.memory_space<vmem>>, %arg4: memref<512x128xf32, #tpu.memory_space<vmem>>) attributes {dimension_semantics = [#tpu.dimension_semantics<arbitrary>], iteration_bounds = array<i64: 1>, scalar_prefetch = 0 : i64, scratch_operands = 0 : i64, tpu.core_type = #tpu.core_type<tc>, window_params = [{pipeline_mode = #tpu.pipeline_mode<synchronous>, transform_indices = @transform_0, window_bounds = array<i64: 512, 64>}, {pipeline_mode = #tpu.pipeline_mode<synchronous>, transform_indices = @transform_1, window_bounds = array<i64: 64, 128>}, {pipeline_mode = #tpu.pipeline_mode<synchronous>, transform_indices = @transform_2, window_bounds = array<i64: 1, 128>}, {pipeline_mode = #tpu.pipeline_mode<synchronous>, transform_indices = @transform_3, window_bounds = array<i64: 512, 128>}]} {
    %c0 = arith.constant 0 : index
    %c0_0 = arith.constant 0 : index
    %0 = vector.load %arg1[%c0, %c0_0] : memref<512x64xf32, #tpu.memory_space<vmem>>, vector<512x64xf32>
    %c0_1 = arith.constant 0 : index
    %c0_2 = arith.constant 0 : index
    %1 = vector.load %arg2[%c0_1, %c0_2] : memref<64x128xf32, #tpu.memory_space<vmem>>, vector<64x128xf32>
    %cst = arith.constant dense<0.000000e+00> : vector<512x128xf32>
    %2 = tpu.matmul %0, %1, %cst {dimension_numbers = #tpu.dot_dimension_numbers<[1], [0], [0], [1], [0, 0, 1, 1], [], []>} : vector<512x64xf32>, vector<64x128xf32>, vector<512x128xf32> -> vector<512x128xf32>
    %c0_3 = arith.constant 0 : index
    %c0_4 = arith.constant 0 : index
    %3 = vector.load %arg3[%c0_3, %c0_4] : memref<1x128xf32, #tpu.memory_space<vmem>>, vector<1x128xf32>
    %4 = vector.broadcast %3 : vector<1x128xf32> to vector<512x128xf32>
    %5 = arith.addf %2, %4 : vector<512x128xf32>
    %cst_5 = arith.constant 0.000000e+00 : f32
    %6 = vector.broadcast %cst_5 : f32 to vector<512x128xf32>
    %7 = arith.maximumf %5, %6 : vector<512x128xf32>
    %c0_6 = arith.constant 0 : index
    %c0_7 = arith.constant 0 : index
    %8 = vector.load %arg4[%c0_6, %c0_7] : memref<512x128xf32, #tpu.memory_space<vmem>>, vector<512x128xf32>
    tpu.vector_store %arg4[%c0_6, %c0_7], %7 {strides = array<i32>} : memref<512x128xf32, #tpu.memory_space<vmem>>, vector<512x128xf32>,
    return
  }
  func.func @transform_0(%arg0: i32) -> (i32, i32) {
    %c0_i32 = arith.constant 0 : i32
    %c0_i32_0 = arith.constant 0 : i32
    %c0_i32_1 = arith.constant 0 : i32
    return %c0_i32, %c0_i32_0 : i32, i32
  }
  func.func @transform_1(%arg0: i32) -> (i32, i32) {
    %c0_i32 = arith.constant 0 : i32
    %c0_i32_0 = arith.constant 0 : i32
    %c0_i32_1 = arith.constant 0 : i32
    return %c0_i32, %c0_i32_0 : i32, i32
  }
  func.func @transform_2(%arg0: i32) -> (i32, i32) {
    %c0_i32 = arith.constant 0 : i32
    %c0_i32_0 = arith.constant 0 : i32
    %c0_i32_1 = arith.constant 0 : i32
    return %c0_i32, %c0_i32_0 : i32, i32
  }
  func.func @transform_3(%arg0: i32) -> (i32, i32) {
    %c0_i32 = arith.constant 0 : i32
    %c0_i32_0 = arith.constant 0 : i32
    %c0_i32_1 = arith.constant 0 : i32
    return %c0_i32, %c0_i32_0 : i32, i32
  }
}

module attributes {stable_mosaic.version = 11 : i64} {
  func.func @_seq_fused_kernel(%arg0: i32, %arg1: memref<1x8x8x96xf32, #tpu.memory_space<vmem>>, %arg2: memref<1x8x256xf32, #tpu.memory_space<vmem>>, %arg3: memref<1x1x128xf32, #tpu.memory_space<vmem>>, %arg4: memref<96x128xf32, #tpu.memory_space<vmem>>, %arg5: memref<96x128xf32, #tpu.memory_space<vmem>>, %arg6: memref<96x128xf32, #tpu.memory_space<vmem>>, %arg7: memref<96x128xf32, #tpu.memory_space<vmem>>, %arg8: memref<96x32xf32, #tpu.memory_space<vmem>>, %arg9: memref<32x128xf32, #tpu.memory_space<vmem>>, %arg10: memref<256x128xf32, #tpu.memory_space<vmem>>, %arg11: memref<1x8x128xf32, #tpu.memory_space<vmem>>) attributes {dimension_semantics = [#tpu.dimension_semantics<arbitrary>], iteration_bounds = array<i64: 8>, scalar_prefetch = 0 : i64, scratch_operands = 0 : i64, tpu.core_type = #tpu.core_type<tc>, window_params = [{transform_indices = @transform_0, window_bounds = array<i64: 1, 8, 8, 96>}, {transform_indices = @transform_1, window_bounds = array<i64: 1, 8, 256>}, {transform_indices = @transform_2, window_bounds = array<i64: 1, 1, 128>}, {pipeline_mode = #tpu.pipeline_mode<synchronous>, transform_indices = @transform_3, window_bounds = array<i64: 96, 128>}, {pipeline_mode = #tpu.pipeline_mode<synchronous>, transform_indices = @transform_4, window_bounds = array<i64: 96, 128>}, {pipeline_mode = #tpu.pipeline_mode<synchronous>, transform_indices = @transform_5, window_bounds = array<i64: 96, 128>}, {pipeline_mode = #tpu.pipeline_mode<synchronous>, transform_indices = @transform_6, window_bounds = array<i64: 96, 128>}, {pipeline_mode = #tpu.pipeline_mode<synchronous>, transform_indices = @transform_7, window_bounds = array<i64: 96, 32>}, {pipeline_mode = #tpu.pipeline_mode<synchronous>, transform_indices = @transform_8, window_bounds = array<i64: 32, 128>}, {pipeline_mode = #tpu.pipeline_mode<synchronous>, transform_indices = @transform_9, window_bounds = array<i64: 256, 128>}, {transform_indices = @transform_10, window_bounds = array<i64: 1, 8, 128>}]} {
    %c0 = arith.constant 0 : index
    %c0_0 = arith.constant 0 : index
    %c0_1 = arith.constant 0 : index
    %c0_2 = arith.constant 0 : index
    %0 = vector.load %arg1[%c0, %c0_0, %c0_1, %c0_2] : memref<1x8x8x96xf32, #tpu.memory_space<vmem>>, vector<1x8x8x96xf32>
    %1 = vector.shape_cast %0 : vector<1x8x8x96xf32> to vector<8x8x96xf32>
    %cst = arith.constant dense<0.000000e+00> : vector<8x96xf32>
    %2 = vector.multi_reduction <add>, %1, %cst [0] : vector<8x8x96xf32> to vector<8x96xf32>
    %cst_3 = arith.constant 1.250000e-01 : f32
    %3 = vector.broadcast %cst_3 : f32 to vector<8x96xf32>
    %4 = arith.mulf %2, %3 : vector<8x96xf32>
    %5 = arith.mulf %1, %1 : vector<8x8x96xf32>
    %cst_4 = arith.constant dense<0.000000e+00> : vector<8x96xf32>
    %6 = vector.multi_reduction <add>, %5, %cst_4 [0] : vector<8x8x96xf32> to vector<8x96xf32>
    %7 = arith.mulf %2, %4 : vector<8x96xf32>
    %8 = arith.subf %6, %7 : vector<8x96xf32>
    %cst_5 = arith.constant 0.142857149 : f32
    %9 = vector.broadcast %cst_5 : f32 to vector<8x96xf32>
    %10 = arith.mulf %8, %9 : vector<8x96xf32>
    %cst_6 = arith.constant 0.000000e+00 : f32
    %11 = vector.broadcast %cst_6 : f32 to vector<8x96xf32>
    %12 = arith.maximumf %10, %11 : vector<8x96xf32>
    %13 = math.sqrt %12 : vector<8x96xf32>
    %cst_7 = arith.constant dense<0xFF800000> : vector<8x96xf32>
    %14 = vector.multi_reduction <maximumf>, %1, %cst_7 [0] : vector<8x8x96xf32> to vector<8x96xf32>
    %cst_8 = arith.constant dense<0x7F800000> : vector<8x96xf32>
    %15 = vector.multi_reduction <minimumf>, %1, %cst_8 [0] : vector<8x8x96xf32> to vector<8x96xf32>
    %c0_9 = arith.constant 0 : index
    %c0_10 = arith.constant 0 : index
    %16 = vector.load %arg8[%c0_9, %c0_10] : memref<96x32xf32, #tpu.memory_space<vmem>>, vector<96x32xf32>
    %cst_11 = arith.constant dense<0.000000e+00> : vector<8x32xf32>
    %17 = tpu.matmul %4, %16, %cst_11 {dimension_numbers = #tpu.dot_dimension_numbers<[1], [0], [0], [1], [0, 0, 1, 1], [], []>} : vector<8x96xf32>, vector<96x32xf32>, vector<8x32xf32> -> vector<8x32xf32>
    %c0_12 = arith.constant 0 : index
    %c0_13 = arith.constant 0 : index
    %c0_14 = arith.constant 0 : index
    %18 = vector.load %arg3[%c0_12, %c0_13, %c0_14] : memref<1x1x128xf32, #tpu.memory_space<vmem>>, vector<1x1x128xf32>
    %19 = vector.shape_cast %18 : vector<1x1x128xf32> to vector<1x128xf32>
    %c0_15 = arith.constant 0 : index
    %c0_16 = arith.constant 0 : index
    %20 = vector.load %arg4[%c0_15, %c0_16] : memref<96x128xf32, #tpu.memory_space<vmem>>, vector<96x128xf32>
    %cst_17 = arith.constant dense<0.000000e+00> : vector<8x128xf32>
    %21 = tpu.matmul %4, %20, %cst_17 {dimension_numbers = #tpu.dot_dimension_numbers<[1], [0], [0], [1], [0, 0, 1, 1], [], []>} : vector<8x96xf32>, vector<96x128xf32>, vector<8x128xf32> -> vector<8x128xf32>
    %22 = vector.broadcast %19 : vector<1x128xf32> to vector<8x128xf32>
    %23 = arith.addf %22, %21 : vector<8x128xf32>
    %c0_18 = arith.constant 0 : index
    %c0_19 = arith.constant 0 : index
    %24 = vector.load %arg5[%c0_18, %c0_19] : memref<96x128xf32, #tpu.memory_space<vmem>>, vector<96x128xf32>
    %cst_20 = arith.constant dense<0.000000e+00> : vector<8x128xf32>
    %25 = tpu.matmul %13, %24, %cst_20 {dimension_numbers = #tpu.dot_dimension_numbers<[1], [0], [0], [1], [0, 0, 1, 1], [], []>} : vector<8x96xf32>, vector<96x128xf32>, vector<8x128xf32> -> vector<8x128xf32>
    %26 = arith.addf %23, %25 : vector<8x128xf32>
    %c0_21 = arith.constant 0 : index
    %c0_22 = arith.constant 0 : index
    %27 = vector.load %arg6[%c0_21, %c0_22] : memref<96x128xf32, #tpu.memory_space<vmem>>, vector<96x128xf32>
    %cst_23 = arith.constant dense<0.000000e+00> : vector<8x128xf32>
    %28 = tpu.matmul %14, %27, %cst_23 {dimension_numbers = #tpu.dot_dimension_numbers<[1], [0], [0], [1], [0, 0, 1, 1], [], []>} : vector<8x96xf32>, vector<96x128xf32>, vector<8x128xf32> -> vector<8x128xf32>
    %29 = arith.addf %26, %28 : vector<8x128xf32>
    %c0_24 = arith.constant 0 : index
    %c0_25 = arith.constant 0 : index
    %30 = vector.load %arg7[%c0_24, %c0_25] : memref<96x128xf32, #tpu.memory_space<vmem>>, vector<96x128xf32>
    %cst_26 = arith.constant dense<0.000000e+00> : vector<8x128xf32>
    %31 = tpu.matmul %15, %30, %cst_26 {dimension_numbers = #tpu.dot_dimension_numbers<[1], [0], [0], [1], [0, 0, 1, 1], [], []>} : vector<8x96xf32>, vector<96x128xf32>, vector<8x128xf32> -> vector<8x128xf32>
    %32 = arith.addf %29, %31 : vector<8x128xf32>
    %c0_27 = arith.constant 0 : index
    %c0_28 = arith.constant 0 : index
    %33 = vector.load %arg9[%c0_27, %c0_28] : memref<32x128xf32, #tpu.memory_space<vmem>>, vector<32x128xf32>
    %cst_29 = arith.constant dense<0.000000e+00> : vector<8x128xf32>
    %34 = tpu.matmul %17, %33, %cst_29 {dimension_numbers = #tpu.dot_dimension_numbers<[1], [0], [0], [1], [0, 0, 1, 1], [], []>} : vector<8x32xf32>, vector<32x128xf32>, vector<8x128xf32> -> vector<8x128xf32>
    %35 = arith.addf %32, %34 : vector<8x128xf32>
    %c0_30 = arith.constant 0 : index
    %c0_31 = arith.constant 0 : index
    %c0_32 = arith.constant 0 : index
    %36 = vector.load %arg2[%c0_30, %c0_31, %c0_32] : memref<1x8x256xf32, #tpu.memory_space<vmem>>, vector<1x8x256xf32>
    %37 = vector.shape_cast %36 : vector<1x8x256xf32> to vector<8x256xf32>
    %c0_33 = arith.constant 0 : index
    %c0_34 = arith.constant 0 : index
    %38 = vector.load %arg10[%c0_33, %c0_34] : memref<256x128xf32, #tpu.memory_space<vmem>>, vector<256x128xf32>
    %cst_35 = arith.constant dense<0.000000e+00> : vector<8x128xf32>
    %39 = tpu.matmul %37, %38, %cst_35 {dimension_numbers = #tpu.dot_dimension_numbers<[1], [0], [0], [1], [0, 0, 1, 1], [], []>} : vector<8x256xf32>, vector<256x128xf32>, vector<8x128xf32> -> vector<8x128xf32>
    %40 = arith.addf %35, %39 : vector<8x128xf32>
    %cst_36 = arith.constant 0.000000e+00 : f32
    %41 = vector.broadcast %cst_36 : f32 to vector<8x128xf32>
    %42 = arith.maximumf %40, %41 : vector<8x128xf32>
    %c0_37 = arith.constant 0 : index
    %c0_38 = arith.constant 0 : index
    %c0_39 = arith.constant 0 : index
    %43 = vector.load %arg11[%c0_37, %c0_38, %c0_39] : memref<1x8x128xf32, #tpu.memory_space<vmem>>, vector<1x8x128xf32>
    %44 = vector.shape_cast %43 : vector<1x8x128xf32> to vector<8x128xf32>
    %45 = vector.shape_cast %42 : vector<8x128xf32> to vector<1x8x128xf32>
    tpu.vector_store %arg11[%c0_37, %c0_38, %c0_39], %45 {strides = array<i32>} : memref<1x8x128xf32, #tpu.memory_space<vmem>>, vector<1x8x128xf32>,
    return
  }
  func.func @transform_0(%arg0: i32) -> (i32, i32, i32, i32) {
    %c0_i32 = arith.constant 0 : i32
    %c0_i32_0 = arith.constant 0 : i32
    %c0_i32_1 = arith.constant 0 : i32
    %c0_i32_2 = arith.constant 0 : i32
    return %arg0, %c0_i32, %c0_i32_0, %c0_i32_1 : i32, i32, i32, i32
  }
  func.func @transform_1(%arg0: i32) -> (i32, i32, i32) {
    %c0_i32 = arith.constant 0 : i32
    %c0_i32_0 = arith.constant 0 : i32
    %c0_i32_1 = arith.constant 0 : i32
    return %arg0, %c0_i32, %c0_i32_0 : i32, i32, i32
  }
  func.func @transform_2(%arg0: i32) -> (i32, i32, i32) {
    %c0_i32 = arith.constant 0 : i32
    %c0_i32_0 = arith.constant 0 : i32
    %c0_i32_1 = arith.constant 0 : i32
    return %arg0, %c0_i32, %c0_i32_0 : i32, i32, i32
  }
  func.func @transform_3(%arg0: i32) -> (i32, i32) {
    %c0_i32 = arith.constant 0 : i32
    %c0_i32_0 = arith.constant 0 : i32
    %c0_i32_1 = arith.constant 0 : i32
    return %c0_i32, %c0_i32_0 : i32, i32
  }
  func.func @transform_4(%arg0: i32) -> (i32, i32) {
    %c0_i32 = arith.constant 0 : i32
    %c0_i32_0 = arith.constant 0 : i32
    %c0_i32_1 = arith.constant 0 : i32
    return %c0_i32, %c0_i32_0 : i32, i32
  }
  func.func @transform_5(%arg0: i32) -> (i32, i32) {
    %c0_i32 = arith.constant 0 : i32
    %c0_i32_0 = arith.constant 0 : i32
    %c0_i32_1 = arith.constant 0 : i32
    return %c0_i32, %c0_i32_0 : i32, i32
  }
  func.func @transform_6(%arg0: i32) -> (i32, i32) {
    %c0_i32 = arith.constant 0 : i32
    %c0_i32_0 = arith.constant 0 : i32
    %c0_i32_1 = arith.constant 0 : i32
    return %c0_i32, %c0_i32_0 : i32, i32
  }
  func.func @transform_7(%arg0: i32) -> (i32, i32) {
    %c0_i32 = arith.constant 0 : i32
    %c0_i32_0 = arith.constant 0 : i32
    %c0_i32_1 = arith.constant 0 : i32
    return %c0_i32, %c0_i32_0 : i32, i32
  }
  func.func @transform_8(%arg0: i32) -> (i32, i32) {
    %c0_i32 = arith.constant 0 : i32
    %c0_i32_0 = arith.constant 0 : i32
    %c0_i32_1 = arith.constant 0 : i32
    return %c0_i32, %c0_i32_0 : i32, i32
  }
  func.func @transform_9(%arg0: i32) -> (i32, i32) {
    %c0_i32 = arith.constant 0 : i32
    %c0_i32_0 = arith.constant 0 : i32
    %c0_i32_1 = arith.constant 0 : i32
    return %c0_i32, %c0_i32_0 : i32, i32
  }
  func.func @transform_10(%arg0: i32) -> (i32, i32, i32) {
    %c0_i32 = arith.constant 0 : i32
    %c0_i32_0 = arith.constant 0 : i32
    %c0_i32_1 = arith.constant 0 : i32
    return %arg0, %c0_i32, %c0_i32_0 : i32, i32, i32
  }
}

module attributes {stable_mosaic.version = 11 : i64} {
  func.func @_seq_fused_kernel(%arg0: i32, %arg1: memref<1x64x8x96xf32, #tpu.memory_space<vmem>>, %arg2: memref<1x8x256xf32, #tpu.memory_space<vmem>>, %arg3: memref<1x1x128xf32, #tpu.memory_space<vmem>>, %arg4: memref<96x128xf32, #tpu.memory_space<vmem>>, %arg5: memref<96x128xf32, #tpu.memory_space<vmem>>, %arg6: memref<96x128xf32, #tpu.memory_space<vmem>>, %arg7: memref<96x128xf32, #tpu.memory_space<vmem>>, %arg8: memref<96x32xf32, #tpu.memory_space<vmem>>, %arg9: memref<32x128xf32, #tpu.memory_space<vmem>>, %arg10: memref<256x128xf32, #tpu.memory_space<vmem>>, %arg11: memref<1x8x128xf32, #tpu.memory_space<vmem>>) attributes {dimension_semantics = [#tpu.dimension_semantics<arbitrary>], iteration_bounds = array<i64: 1>, scalar_prefetch = 0 : i64, scratch_operands = 0 : i64, tpu.core_type = #tpu.core_type<tc>, window_params = [{transform_indices = @transform_0, window_bounds = array<i64: 1, 64, 8, 96>}, {transform_indices = @transform_1, window_bounds = array<i64: 1, 8, 256>}, {transform_indices = @transform_2, window_bounds = array<i64: 1, 1, 128>}, {pipeline_mode = #tpu.pipeline_mode<synchronous>, transform_indices = @transform_3, window_bounds = array<i64: 96, 128>}, {pipeline_mode = #tpu.pipeline_mode<synchronous>, transform_indices = @transform_4, window_bounds = array<i64: 96, 128>}, {pipeline_mode = #tpu.pipeline_mode<synchronous>, transform_indices = @transform_5, window_bounds = array<i64: 96, 128>}, {pipeline_mode = #tpu.pipeline_mode<synchronous>, transform_indices = @transform_6, window_bounds = array<i64: 96, 128>}, {pipeline_mode = #tpu.pipeline_mode<synchronous>, transform_indices = @transform_7, window_bounds = array<i64: 96, 32>}, {pipeline_mode = #tpu.pipeline_mode<synchronous>, transform_indices = @transform_8, window_bounds = array<i64: 32, 128>}, {pipeline_mode = #tpu.pipeline_mode<synchronous>, transform_indices = @transform_9, window_bounds = array<i64: 256, 128>}, {transform_indices = @transform_10, window_bounds = array<i64: 1, 8, 128>}]} {
    %c0 = arith.constant 0 : index
    %c0_0 = arith.constant 0 : index
    %c0_1 = arith.constant 0 : index
    %c0_2 = arith.constant 0 : index
    %0 = vector.load %arg1[%c0, %c0_0, %c0_1, %c0_2] : memref<1x64x8x96xf32, #tpu.memory_space<vmem>>, vector<1x64x8x96xf32>
    %1 = vector.shape_cast %0 : vector<1x64x8x96xf32> to vector<64x8x96xf32>
    %cst = arith.constant dense<0.000000e+00> : vector<8x96xf32>
    %2 = vector.multi_reduction <add>, %1, %cst [0] : vector<64x8x96xf32> to vector<8x96xf32>
    %cst_3 = arith.constant 1.562500e-02 : f32
    %3 = vector.broadcast %cst_3 : f32 to vector<8x96xf32>
    %4 = arith.mulf %2, %3 : vector<8x96xf32>
    %5 = arith.mulf %1, %1 : vector<64x8x96xf32>
    %cst_4 = arith.constant dense<0.000000e+00> : vector<8x96xf32>
    %6 = vector.multi_reduction <add>, %5, %cst_4 [0] : vector<64x8x96xf32> to vector<8x96xf32>
    %7 = arith.mulf %2, %4 : vector<8x96xf32>
    %8 = arith.subf %6, %7 : vector<8x96xf32>
    %cst_5 = arith.constant 0.0158730168 : f32
    %9 = vector.broadcast %cst_5 : f32 to vector<8x96xf32>
    %10 = arith.mulf %8, %9 : vector<8x96xf32>
    %cst_6 = arith.constant 0.000000e+00 : f32
    %11 = vector.broadcast %cst_6 : f32 to vector<8x96xf32>
    %12 = arith.maximumf %10, %11 : vector<8x96xf32>
    %13 = math.sqrt %12 : vector<8x96xf32>
    %cst_7 = arith.constant dense<0xFF800000> : vector<8x96xf32>
    %14 = vector.multi_reduction <maximumf>, %1, %cst_7 [0] : vector<64x8x96xf32> to vector<8x96xf32>
    %cst_8 = arith.constant dense<0x7F800000> : vector<8x96xf32>
    %15 = vector.multi_reduction <minimumf>, %1, %cst_8 [0] : vector<64x8x96xf32> to vector<8x96xf32>
    %c0_9 = arith.constant 0 : index
    %c0_10 = arith.constant 0 : index
    %16 = vector.load %arg8[%c0_9, %c0_10] : memref<96x32xf32, #tpu.memory_space<vmem>>, vector<96x32xf32>
    %cst_11 = arith.constant dense<0.000000e+00> : vector<8x32xf32>
    %17 = tpu.matmul %4, %16, %cst_11 {dimension_numbers = #tpu.dot_dimension_numbers<[1], [0], [0], [1], [0, 0, 1, 1], [], []>} : vector<8x96xf32>, vector<96x32xf32>, vector<8x32xf32> -> vector<8x32xf32>
    %c0_12 = arith.constant 0 : index
    %c0_13 = arith.constant 0 : index
    %c0_14 = arith.constant 0 : index
    %18 = vector.load %arg3[%c0_12, %c0_13, %c0_14] : memref<1x1x128xf32, #tpu.memory_space<vmem>>, vector<1x1x128xf32>
    %19 = vector.shape_cast %18 : vector<1x1x128xf32> to vector<1x128xf32>
    %c0_15 = arith.constant 0 : index
    %c0_16 = arith.constant 0 : index
    %20 = vector.load %arg4[%c0_15, %c0_16] : memref<96x128xf32, #tpu.memory_space<vmem>>, vector<96x128xf32>
    %cst_17 = arith.constant dense<0.000000e+00> : vector<8x128xf32>
    %21 = tpu.matmul %4, %20, %cst_17 {dimension_numbers = #tpu.dot_dimension_numbers<[1], [0], [0], [1], [0, 0, 1, 1], [], []>} : vector<8x96xf32>, vector<96x128xf32>, vector<8x128xf32> -> vector<8x128xf32>
    %22 = vector.broadcast %19 : vector<1x128xf32> to vector<8x128xf32>
    %23 = arith.addf %22, %21 : vector<8x128xf32>
    %c0_18 = arith.constant 0 : index
    %c0_19 = arith.constant 0 : index
    %24 = vector.load %arg5[%c0_18, %c0_19] : memref<96x128xf32, #tpu.memory_space<vmem>>, vector<96x128xf32>
    %cst_20 = arith.constant dense<0.000000e+00> : vector<8x128xf32>
    %25 = tpu.matmul %13, %24, %cst_20 {dimension_numbers = #tpu.dot_dimension_numbers<[1], [0], [0], [1], [0, 0, 1, 1], [], []>} : vector<8x96xf32>, vector<96x128xf32>, vector<8x128xf32> -> vector<8x128xf32>
    %26 = arith.addf %23, %25 : vector<8x128xf32>
    %c0_21 = arith.constant 0 : index
    %c0_22 = arith.constant 0 : index
    %27 = vector.load %arg6[%c0_21, %c0_22] : memref<96x128xf32, #tpu.memory_space<vmem>>, vector<96x128xf32>
    %cst_23 = arith.constant dense<0.000000e+00> : vector<8x128xf32>
    %28 = tpu.matmul %14, %27, %cst_23 {dimension_numbers = #tpu.dot_dimension_numbers<[1], [0], [0], [1], [0, 0, 1, 1], [], []>} : vector<8x96xf32>, vector<96x128xf32>, vector<8x128xf32> -> vector<8x128xf32>
    %29 = arith.addf %26, %28 : vector<8x128xf32>
    %c0_24 = arith.constant 0 : index
    %c0_25 = arith.constant 0 : index
    %30 = vector.load %arg7[%c0_24, %c0_25] : memref<96x128xf32, #tpu.memory_space<vmem>>, vector<96x128xf32>
    %cst_26 = arith.constant dense<0.000000e+00> : vector<8x128xf32>
    %31 = tpu.matmul %15, %30, %cst_26 {dimension_numbers = #tpu.dot_dimension_numbers<[1], [0], [0], [1], [0, 0, 1, 1], [], []>} : vector<8x96xf32>, vector<96x128xf32>, vector<8x128xf32> -> vector<8x128xf32>
    %32 = arith.addf %29, %31 : vector<8x128xf32>
    %c0_27 = arith.constant 0 : index
    %c0_28 = arith.constant 0 : index
    %33 = vector.load %arg9[%c0_27, %c0_28] : memref<32x128xf32, #tpu.memory_space<vmem>>, vector<32x128xf32>
    %cst_29 = arith.constant dense<0.000000e+00> : vector<8x128xf32>
    %34 = tpu.matmul %17, %33, %cst_29 {dimension_numbers = #tpu.dot_dimension_numbers<[1], [0], [0], [1], [0, 0, 1, 1], [], []>} : vector<8x32xf32>, vector<32x128xf32>, vector<8x128xf32> -> vector<8x128xf32>
    %35 = arith.addf %32, %34 : vector<8x128xf32>
    %c0_30 = arith.constant 0 : index
    %c0_31 = arith.constant 0 : index
    %c0_32 = arith.constant 0 : index
    %36 = vector.load %arg2[%c0_30, %c0_31, %c0_32] : memref<1x8x256xf32, #tpu.memory_space<vmem>>, vector<1x8x256xf32>
    %37 = vector.shape_cast %36 : vector<1x8x256xf32> to vector<8x256xf32>
    %c0_33 = arith.constant 0 : index
    %c0_34 = arith.constant 0 : index
    %38 = vector.load %arg10[%c0_33, %c0_34] : memref<256x128xf32, #tpu.memory_space<vmem>>, vector<256x128xf32>
    %cst_35 = arith.constant dense<0.000000e+00> : vector<8x128xf32>
    %39 = tpu.matmul %37, %38, %cst_35 {dimension_numbers = #tpu.dot_dimension_numbers<[1], [0], [0], [1], [0, 0, 1, 1], [], []>} : vector<8x256xf32>, vector<256x128xf32>, vector<8x128xf32> -> vector<8x128xf32>
    %40 = arith.addf %35, %39 : vector<8x128xf32>
    %cst_36 = arith.constant 0.000000e+00 : f32
    %41 = vector.broadcast %cst_36 : f32 to vector<8x128xf32>
    %42 = arith.maximumf %40, %41 : vector<8x128xf32>
    %c0_37 = arith.constant 0 : index
    %c0_38 = arith.constant 0 : index
    %c0_39 = arith.constant 0 : index
    %43 = vector.load %arg11[%c0_37, %c0_38, %c0_39] : memref<1x8x128xf32, #tpu.memory_space<vmem>>, vector<1x8x128xf32>
    %44 = vector.shape_cast %43 : vector<1x8x128xf32> to vector<8x128xf32>
    %45 = vector.shape_cast %42 : vector<8x128xf32> to vector<1x8x128xf32>
    tpu.vector_store %arg11[%c0_37, %c0_38, %c0_39], %45 {strides = array<i32>} : memref<1x8x128xf32, #tpu.memory_space<vmem>>, vector<1x8x128xf32>,
    return
  }
  func.func @transform_0(%arg0: i32) -> (i32, i32, i32, i32) {
    %c0_i32 = arith.constant 0 : i32
    %c0_i32_0 = arith.constant 0 : i32
    %c0_i32_1 = arith.constant 0 : i32
    %c0_i32_2 = arith.constant 0 : i32
    return %arg0, %c0_i32, %c0_i32_0, %c0_i32_1 : i32, i32, i32, i32
  }
  func.func @transform_1(%arg0: i32) -> (i32, i32, i32) {
    %c0_i32 = arith.constant 0 : i32
    %c0_i32_0 = arith.constant 0 : i32
    %c0_i32_1 = arith.constant 0 : i32
    return %arg0, %c0_i32, %c0_i32_0 : i32, i32, i32
  }
  func.func @transform_2(%arg0: i32) -> (i32, i32, i32) {
    %c0_i32 = arith.constant 0 : i32
    %c0_i32_0 = arith.constant 0 : i32
    %c0_i32_1 = arith.constant 0 : i32
    return %arg0, %c0_i32, %c0_i32_0 : i32, i32, i32
  }
  func.func @transform_3(%arg0: i32) -> (i32, i32) {
    %c0_i32 = arith.constant 0 : i32
    %c0_i32_0 = arith.constant 0 : i32
    %c0_i32_1 = arith.constant 0 : i32
    return %c0_i32, %c0_i32_0 : i32, i32
  }
  func.func @transform_4(%arg0: i32) -> (i32, i32) {
    %c0_i32 = arith.constant 0 : i32
    %c0_i32_0 = arith.constant 0 : i32
    %c0_i32_1 = arith.constant 0 : i32
    return %c0_i32, %c0_i32_0 : i32, i32
  }
  func.func @transform_5(%arg0: i32) -> (i32, i32) {
    %c0_i32 = arith.constant 0 : i32
    %c0_i32_0 = arith.constant 0 : i32
    %c0_i32_1 = arith.constant 0 : i32
    return %c0_i32, %c0_i32_0 : i32, i32
  }
  func.func @transform_6(%arg0: i32) -> (i32, i32) {
    %c0_i32 = arith.constant 0 : i32
    %c0_i32_0 = arith.constant 0 : i32
    %c0_i32_1 = arith.constant 0 : i32
    return %c0_i32, %c0_i32_0 : i32, i32
  }
  func.func @transform_7(%arg0: i32) -> (i32, i32) {
    %c0_i32 = arith.constant 0 : i32
    %c0_i32_0 = arith.constant 0 : i32
    %c0_i32_1 = arith.constant 0 : i32
    return %c0_i32, %c0_i32_0 : i32, i32
  }
  func.func @transform_8(%arg0: i32) -> (i32, i32) {
    %c0_i32 = arith.constant 0 : i32
    %c0_i32_0 = arith.constant 0 : i32
    %c0_i32_1 = arith.constant 0 : i32
    return %c0_i32, %c0_i32_0 : i32, i32
  }
  func.func @transform_9(%arg0: i32) -> (i32, i32) {
    %c0_i32 = arith.constant 0 : i32
    %c0_i32_0 = arith.constant 0 : i32
    %c0_i32_1 = arith.constant 0 : i32
    return %c0_i32, %c0_i32_0 : i32, i32
  }
  func.func @transform_10(%arg0: i32) -> (i32, i32, i32) {
    %c0_i32 = arith.constant 0 : i32
    %c0_i32_0 = arith.constant 0 : i32
    %c0_i32_1 = arith.constant 0 : i32
    return %arg0, %c0_i32, %c0_i32_0 : i32, i32, i32
  }
}

</mosaic_0001>

<bundles_post_ra>
// kernel: min5_forward.3
= control target key start
LH: loop header
LB: loop body
LE: loop exit
PB: predicated region body
PF: predicated region fallthrough
CT: control target
= control target key end

     0   :  { %vm90_vm0 = vcmask 523264   ;;  %s1274_s1 = inlined_call_operand.vmem [shape: f32[64,128], index: 1, kind: input, shape index: {}]   ;;  %s1275_s0 = inlined_call_operand.vmem [shape: f32[512,64], index: 0, kind: input, shape index: {}]   ;;  %s1276_s2 = inlined_call_operand.vmem [shape: f32[1,128], index: 2, kind: input, shape index: {}]   ;;  %s1277_s3 = inlined_call_operand.vmem [shape: f32[512,128], index: 3, kind: output, shape index: {}]  }
   0x1   :  { %v85_v0 = vld [vmem:[%s1274_s1 + $0x38] sm:$0xff]  ;;  %v84_v1 = vld [vmem:[%s1274_s1 + $0x30] sm:$0xff]  ;;  %v83_v2 = vld [vmem:[%s1274_s1 + $0x28] sm:$0xff] }
   0x2   :  { %689 = vmatpush.msra.mxu2 %v85_v0  ;;  %690 = vmatpush.msra.mxu3 %v85_v0  ;;  %v82_v3 = vld [vmem:[%s1274_s1 + $0x20] sm:$0xff]  ;;  %v81_v4 = vld [vmem:[%s1274_s1 + $0x18] sm:$0xff]  ;;  %v80_v5 = vld [vmem:[%s1274_s1 + $0x10] sm:$0xff] }
   0x3   :  { %291 = vmatpush.msra.mxu0 %v85_v0  ;;  %688 = vmatpush.msra.mxu1 %v85_v0  ;;  %v79_v6 = vld [vmem:[%s1274_s1 + $0x8] sm:$0xff]  ;;  %v78_v7 = vld [vmem:[%s1274_s1] sm:$0xff]  ;;  %v48_v16 = vld [vmem:[%s1275_s0 + $0x110] sm:$0xff] }
   0x4   :  { %692 = vmatpush.msra.mxu2 %v84_v1  ;;  %693 = vmatpush.msra.mxu3 %v84_v1  ;;  %v46_v8 = vld [vmem:[%s1275_s0 + $0x100] sm:$0xff]  ;;  %v47_v12 = vld [vmem:[%s1275_s0 + $0x108] sm:$0xff]  ;;  %v64_v17 = vld [vmem:[%s1275_s0 + $0x190] sm:$0xff] }
   0x5   :  { %292 = vmatpush.msra.mxu0 %v84_v1  ;;  %691 = vmatpush.msra.mxu1 %v84_v1  ;;  %v62_v9 = vld [vmem:[%s1275_s0 + $0x180] sm:$0xff]  ;;  %v63_v13 = vld [vmem:[%s1275_s0 + $0x188] sm:$0xff]  ;;  %v16_v18 = vld [vmem:[%s1275_s0 + $0x10] sm:$0xff] }
   0x6   :  { %695 = vmatpush.msra.mxu2 %v83_v2  ;;  %696 = vmatpush.msra.mxu3 %v83_v2  ;;  %v14_v10 = vld [vmem:[%s1275_s0] sm:$0xff]  ;;  %v15_v14 = vld [vmem:[%s1275_s0 + $0x8] sm:$0xff]  ;;  %v32_v19 = vld [vmem:[%s1275_s0 + $0x90] sm:$0xff] }
   0x7   :  { %293 = vmatpush.msra.mxu0 %v83_v2  ;;  %694 = vmatpush.msra.mxu1 %v83_v2  ;;  %v30_v11 = vld [vmem:[%s1275_s0 + $0x80] sm:$0xff]  ;;  %v31_v15 = vld [vmem:[%s1275_s0 + $0x88] sm:$0xff]  ;;  %v49_v20 = vld [vmem:[%s1275_s0 + $0x118] sm:$0xff] }
   0x8   :  { %698 = vmatpush.msra.mxu2 %v82_v3  ;;  %699 = vmatpush.msra.mxu3 %v82_v3  ;;  %v65_v21 = vld [vmem:[%s1275_s0 + $0x198] sm:$0xff]  ;;  %v50_v24 = vld [vmem:[%s1275_s0 + $0x120] sm:$0xff]  ;;  %v51_v28 = vld [vmem:[%s1275_s0 + $0x128] sm:$0xff] }
   0x9   :  { %294 = vmatpush.msra.mxu0 %v82_v3  ;;  %697 = vmatpush.msra.mxu1 %v82_v3  ;;  %v17_v22 = vld [vmem:[%s1275_s0 + $0x18] sm:$0xff]  ;;  %v66_v25 = vld [vmem:[%s1275_s0 + $0x1a0] sm:$0xff]  ;;  %v67_v29 = vld [vmem:[%s1275_s0 + $0x1a8] sm:$0xff] }
   0xa   :  { %701 = vmatpush.msra.mxu2 %v81_v4  ;;  %702 = vmatpush.msra.mxu3 %v81_v4  ;;  %v33_v23 = vld [vmem:[%s1275_s0 + $0x98] sm:$0xff]  ;;  %v18_v26 = vld [vmem:[%s1275_s0 + $0x20] sm:$0xff]  ;;  %v19_v30 = vld [vmem:[%s1275_s0 + $0x28] sm:$0xff] }
   0xb   :  { %295 = vmatpush.msra.mxu0 %v81_v4  ;;  %700 = vmatpush.msra.mxu1 %v81_v4  ;;  %v34_v27 = vld [vmem:[%s1275_s0 + $0xa0] sm:$0xff]  ;;  %v35_v31 = vld [vmem:[%s1275_s0 + $0xa8] sm:$0xff]  ;;  %v52_v32 = vld [vmem:[%s1275_s0 + $0x130] sm:$0xff] }
   0xc   :  { %704 = vmatpush.msra.mxu2 %v80_v5  ;;  %705 = vmatpush.msra.mxu3 %v80_v5  ;;  %v68_v33 = vld [vmem:[%s1275_s0 + $0x1b0] sm:$0xff]  ;;  %v53_v36 = vld [vmem:[%s1275_s0 + $0x138] sm:$0xff]  ;;  %v54_v40 = vld [vmem:[%s1275_s0 + $0x140] sm:$0xff] }
   0xd   :  { %296 = vmatpush.msra.mxu0 %v80_v5  ;;  %703 = vmatpush.msra.mxu1 %v80_v5  ;;  %v20_v34 = vld [vmem:[%s1275_s0 + $0x30] sm:$0xff]  ;;  %v69_v37 = vld [vmem:[%s1275_s0 + $0x1b8] sm:$0xff]  ;;  %v70_v41 = vld [vmem:[%s1275_s0 + $0x1c0] sm:$0xff] }
   0xe   :  { %707 = vmatpush.msra.mxu2 %v79_v6  ;;  %708 = vmatpush.msra.mxu3 %v79_v6  ;;  %v36_v35 = vld [vmem:[%s1275_s0 + $0xb0] sm:$0xff]  ;;  %v21_v38 = vld [vmem:[%s1275_s0 + $0x38] sm:$0xff]  ;;  %v22_v42 = vld [vmem:[%s1275_s0 + $0x40] sm:$0xff] }
   0xf   :  { %297 = vmatpush.msra.mxu0 %v79_v6  ;;  %706 = vmatpush.msra.mxu1 %v79_v6  ;;  %v37_v39 = vld [vmem:[%s1275_s0 + $0xb8] sm:$0xff]  ;;  %v38_v43 = vld [vmem:[%s1275_s0 + $0xc0] sm:$0xff]  ;;  %v55_v44 = vld [vmem:[%s1275_s0 + $0x148] sm:$0xff] }
  0x10   :  { %710 = vmatpush.msra.mxu2 %v78_v7  ;;  %711 = vmatpush.msra.mxu3 %v78_v7  ;;  %v71_v45 = vld [vmem:[%s1275_s0 + $0x1c8] sm:$0xff]  ;;  %v56_v48 = vld [vmem:[%s1275_s0 + $0x150] sm:$0xff]  ;;  %v57_v52 = vld [vmem:[%s1275_s0 + $0x158] sm:$0xff] }
  0x11   :  { %656 = vmatmul.msk.f32.vlgmr.msra.gmra.mxu2 %vm90_vm0, %v46_v8  ;;  %672 = vmatmul.msk.f32.vlgmr.msra.gmra.mxu3 %vm90_vm0, %v62_v9  ;;  %v23_v46 = vld [vmem:[%s1275_s0 + $0x48] sm:$0xff]  ;;  %v72_v49 = vld [vmem:[%s1275_s0 + $0x1d0] sm:$0xff]  ;;  %v73_v53 = vld [vmem:[%s1275_s0 + $0x1d8] sm:$0xff] }
  0x12   :  { %298 = vmatpush.msra.mxu0 %v78_v7  ;;  %709 = vmatpush.msra.mxu1 %v78_v7  ;;  %v39_v47 = vld [vmem:[%s1275_s0 + $0xc8] sm:$0xff]  ;;  %v24_v50 = vld [vmem:[%s1275_s0 + $0x50] sm:$0xff]  ;;  %v25_v54 = vld [vmem:[%s1275_s0 + $0x58] sm:$0xff] }
  0x13   :  { %624 = vmatmul.msk.f32.vlgmr.msra.gmra.mxu0 %vm90_vm0, %v14_v10  ;;  %640 = vmatmul.msk.f32.vlgmr.msra.gmra.mxu1 %vm90_vm0, %v30_v11  ;;  %v40_v51 = vld [vmem:[%s1275_s0 + $0xd0] sm:$0xff]  ;;  %v41_v55 = vld [vmem:[%s1275_s0 + $0xd8] sm:$0xff]  ;;  %v58_v56 = vld [vmem:[%s1275_s0 + $0x160] sm:$0xff] }
  0x14   :  { %v74_v57 = vld [vmem:[%s1275_s0 + $0x1e0] sm:$0xff]  ;;  %v59_v60 = vld [vmem:[%s1275_s0 + $0x168] sm:$0xff]  ;;  %v60_v0 = vld [vmem:[%s1275_s0 + $0x170] sm:$0xff] }
  0x15   :  { %v26_v58 = vld [vmem:[%s1275_s0 + $0x60] sm:$0xff]  ;;  %v75_v61 = vld [vmem:[%s1275_s0 + $0x1e8] sm:$0xff]  ;;  %v76_v1 = vld [vmem:[%s1275_s0 + $0x1f0] sm:$0xff] }
  0x16   :  { %v42_v59 = vld [vmem:[%s1275_s0 + $0xe0] sm:$0xff]  ;;  %v27_v62 = vld [vmem:[%s1275_s0 + $0x68] sm:$0xff]  ;;  %v28_v2 = vld [vmem:[%s1275_s0 + $0x70] sm:$0xff] }
  0x17   :  { %v43_v63 = vld [vmem:[%s1275_s0 + $0xe8] sm:$0xff]  ;;  %v44_v3 = vld [vmem:[%s1275_s0 + $0xf0] sm:$0xff]  ;;  %v61_v4 = vld [vmem:[%s1275_s0 + $0x178] sm:$0xff] }
  0x18   :  { %v77_v5 = vld [vmem:[%s1275_s0 + $0x1f8] sm:$0xff]  ;;  %v1016_v8 = vld [vmem:[%s1276_s2] ss:$0 sm:$0xff] }
  0x19   :  { %657 = vmatmul.msk.f32.gmra.mxu2 %vm90_vm0, %v47_v12  ;;  %673 = vmatmul.msk.f32.gmra.mxu3 %vm90_vm0, %v63_v13  ;;  %v29_v6 = vld [vmem:[%s1275_s0 + $0x78] sm:$0xff] }
  0x1a   :  { %v45_v7 = vld [vmem:[%s1275_s0 + $0xf8] sm:$0xff] }
  0x1b   :  { %625 = vmatmul.msk.f32.gmra.mxu0 %vm90_vm0, %v15_v14  ;;  %641 = vmatmul.msk.f32.gmra.mxu1 %vm90_vm0, %v31_v15 }
  0x21   :  { %658 = vmatmul.msk.f32.gmra.mxu2 %vm90_vm0, %v48_v16  ;;  %674 = vmatmul.msk.f32.gmra.mxu3 %vm90_vm0, %v64_v17 }
  0x23   :  { %626 = vmatmul.msk.f32.gmra.mxu0 %vm90_vm0, %v16_v18  ;;  %642 = vmatmul.msk.f32.gmra.mxu1 %vm90_vm0, %v32_v19 }
  0x29   :  { %659 = vmatmul.msk.f32.gmra.mxu2 %vm90_vm0, %v49_v20  ;;  %675 = vmatmul.msk.f32.gmra.mxu3 %vm90_vm0, %v65_v21 }
  0x2b   :  { %627 = vmatmul.msk.f32.gmra.mxu0 %vm90_vm0, %v17_v22  ;;  %643 = vmatmul.msk.f32.gmra.mxu1 %vm90_vm0, %v33_v23 }
  0x31   :  { %660 = vmatmul.msk.f32.gmra.mxu2 %vm90_vm0, %v50_v24  ;;  %676 = vmatmul.msk.f32.gmra.mxu3 %vm90_vm0, %v66_v25 }
  0x33   :  { %628 = vmatmul.msk.f32.gmra.mxu0 %vm90_vm0, %v18_v26  ;;  %644 = vmatmul.msk.f32.gmra.mxu1 %vm90_vm0, %v34_v27 }
  0x39   :  { %661 = vmatmul.msk.f32.gmra.mxu2 %vm90_vm0, %v51_v28  ;;  %677 = vmatmul.msk.f32.gmra.mxu3 %vm90_vm0, %v67_v29 }
  0x3b   :  { %629 = vmatmul.msk.f32.gmra.mxu0 %vm90_vm0, %v19_v30  ;;  %645 = vmatmul.msk.f32.gmra.mxu1 %vm90_vm0, %v35_v31 }
  0x41   :  { %662 = vmatmul.msk.f32.gmra.mxu2 %vm90_vm0, %v52_v32  ;;  %678 = vmatmul.msk.f32.gmra.mxu3 %vm90_vm0, %v68_v33 }
  0x43   :  { %630 = vmatmul.msk.f32.gmra.mxu0 %vm90_vm0, %v20_v34  ;;  %646 = vmatmul.msk.f32.gmra.mxu1 %vm90_vm0, %v36_v35 }
  0x49   :  { %663 = vmatmul.msk.f32.gmra.mxu2 %vm90_vm0, %v53_v36  ;;  %679 = vmatmul.msk.f32.gmra.mxu3 %vm90_vm0, %v69_v37 }
  0x4b   :  { %631 = vmatmul.msk.f32.gmra.mxu0 %vm90_vm0, %v21_v38  ;;  %647 = vmatmul.msk.f32.gmra.mxu1 %vm90_vm0, %v37_v39 }
  0x51   :  { %664 = vmatmul.msk.f32.gmra.mxu2 %vm90_vm0, %v54_v40  ;;  %680 = vmatmul.msk.f32.gmra.mxu3 %vm90_vm0, %v70_v41 }
  0x53   :  { %632 = vmatmul.msk.f32.gmra.mxu0 %vm90_vm0, %v22_v42  ;;  %648 = vmatmul.msk.f32.gmra.mxu1 %vm90_vm0, %v38_v43 }
  0x59   :  { %665 = vmatmul.msk.f32.gmra.mxu2 %vm90_vm0, %v55_v44  ;;  %681 = vmatmul.msk.f32.gmra.mxu3 %vm90_vm0, %v71_v45 }
  0x5b   :  { %633 = vmatmul.msk.f32.gmra.mxu0 %vm90_vm0, %v23_v46  ;;  %649 = vmatmul.msk.f32.gmra.mxu1 %vm90_vm0, %v39_v47 }
  0x61   :  { %666 = vmatmul.msk.f32.gmra.mxu2 %vm90_vm0, %v56_v48  ;;  %682 = vmatmul.msk.f32.gmra.mxu3 %vm90_vm0, %v72_v49 }
  0x63   :  { %634 = vmatmul.msk.f32.gmra.mxu0 %vm90_vm0, %v24_v50  ;;  %650 = vmatmul.msk.f32.gmra.mxu1 %vm90_vm0, %v40_v51 }
  0x69   :  { %667 = vmatmul.msk.f32.gmra.mxu2 %vm90_vm0, %v57_v52  ;;  %683 = vmatmul.msk.f32.gmra.mxu3 %vm90_vm0, %v73_v53 }
  0x6b   :  { %635 = vmatmul.msk.f32.gmra.mxu0 %vm90_vm0, %v25_v54  ;;  %651 = vmatmul.msk.f32.gmra.mxu1 %vm90_vm0, %v41_v55 }
  0x71   :  { %668 = vmatmul.msk.f32.gmra.mxu2 %vm90_vm0, %v58_v56  ;;  %684 = vmatmul.msk.f32.gmra.mxu3 %vm90_vm0, %v74_v57 }
  0x73   :  { %636 = vmatmul.msk.f32.gmra.mxu0 %vm90_vm0, %v26_v58  ;;  %652 = vmatmul.msk.f32.gmra.mxu1 %vm90_vm0, %v42_v59 }
  0x79   :  { %669 = vmatmul.msk.f32.gmra.mxu2 %vm90_vm0, %v59_v60  ;;  %685 = vmatmul.msk.f32.gmra.mxu3 %vm90_vm0, %v75_v61 }
  0x7b   :  { %637 = vmatmul.msk.f32.gmra.mxu0 %vm90_vm0, %v27_v62  ;;  %653 = vmatmul.msk.f32.gmra.mxu1 %vm90_vm0, %v43_v63 }
  0x81   :  { %670 = vmatmul.msk.f32.gmra.mxu2 %vm90_vm0, %v60_v0  ;;  %686 = vmatmul.msk.f32.gmra.mxu3 %vm90_vm0, %v76_v1 }
  0x83   :  { %638 = vmatmul.msk.f32.gmra.mxu0 %vm90_vm0, %v28_v2  ;;  %654 = vmatmul.msk.f32.gmra.mxu1 %vm90_vm0, %v44_v3 }
  0x89   :  { %671 = vmatmul.msk.f32.gmra.mxu2 %vm90_vm0, %v61_v4  ;;  %687 = vmatmul.msk.f32.gmra.mxu3 %vm90_vm0, %v77_v5 }
  0x8b   :  { %639 = vmatmul.msk.f32.gmra.mxu0 %vm90_vm0, %v29_v6  ;;  %655 = vmatmul.msk.f32.gmra.mxu1 %vm90_vm0, %v45_v7 }
  0x90   :  { %v300_v9 = vpop.f32.mrf.mxu0  ;;  %v348_v10 = vpop.f32.mrf.mxu1 }
  0x91   :  { %v301_v11 = vadd.f32 %v1016_v8, %v300_v9  ;;  %v349_v12 = vadd.f32 %v1016_v8, %v348_v10 }
  0x93   :  { %v492_v13 = vmax.f32 %v301_v11, 0.0  ;;  %v508_v14 = vmax.f32 %v349_v12, 0.0 }
  0x94   :  { %v396_v15 = vpop.f32.mrf.mxu2  ;;  %v444_v16 = vpop.f32.mrf.mxu3 }
  0x95   :  { %556 = vst [vmem:[%s1277_s3] sm:$0xff] %v492_v13  ;;  %v397_v17 = vadd.f32 %v1016_v8, %v396_v15  ;;  %v445_v18 = vadd.f32 %v1016_v8, %v444_v16 }
  0x96   :  { %572 = vst [vmem:[%s1277_s3 + $0x80] sm:$0xff] %v508_v14 }
  0x97   :  { %v524_v19 = vmax.f32 %v397_v17, 0.0  ;;  %v540_v20 = vmax.f32 %v445_v18, 0.0 }
  0x98   :  { %v303_v21 = vpop.f32.mrf.mxu0  ;;  %v351_v22 = vpop.f32.mrf.mxu1 }
  0x99   :  { %588 = vst [vmem:[%s1277_s3 + $0x100] sm:$0xff] %v524_v19  ;;  %v304_v23 = vadd.f32 %v1016_v8, %v303_v21  ;;  %v352_v24 = vadd.f32 %v1016_v8, %v351_v22 }
  0x9a   :  { %604 = vst [vmem:[%s1277_s3 + $0x180] sm:$0xff] %v540_v20 }
  0x9b   :  { %v493_v25 = vmax.f32 %v304_v23, 0.0  ;;  %v509_v26 = vmax.f32 %v352_v24, 0.0 }
  0x9c   :  { %v399_v27 = vpop.f32.mrf.mxu2  ;;  %v447_v28 = vpop.f32.mrf.mxu3 }
  0x9d   :  { %557 = vst [vmem:[%s1277_s3 + $0x8] sm:$0xff] %v493_v25  ;;  %v400_v29 = vadd.f32 %v1016_v8, %v399_v27  ;;  %v448_v30 = vadd.f32 %v1016_v8, %v447_v28 }
  0x9e   :  { %573 = vst [vmem:[%s1277_s3 + $0x88] sm:$0xff] %v509_v26 }
  0x9f   :  { %v525_v31 = vmax.f32 %v400_v29, 0.0  ;;  %v541_v32 = vmax.f32 %v448_v30, 0.0 }
  0xa0   :  { %v306_v33 = vpop.f32.mrf.mxu0  ;;  %v354_v34 = vpop.f32.mrf.mxu1 }
  0xa1   :  { %589 = vst [vmem:[%s1277_s3 + $0x108] sm:$0xff] %v525_v31  ;;  %v307_v35 = vadd.f32 %v1016_v8, %v306_v33  ;;  %v355_v36 = vadd.f32 %v1016_v8, %v354_v34 }
  0xa2   :  { %605 = vst [vmem:[%s1277_s3 + $0x188] sm:$0xff] %v541_v32 }
  0xa3   :  { %v494_v37 = vmax.f32 %v307_v35, 0.0  ;;  %v510_v38 = vmax.f32 %v355_v36, 0.0 }
  0xa4   :  { %v402_v39 = vpop.f32.mrf.mxu2  ;;  %v450_v40 = vpop.f32.mrf.mxu3 }
  0xa5   :  { %558 = vst [vmem:[%s1277_s3 + $0x10] sm:$0xff] %v494_v37  ;;  %v403_v41 = vadd.f32 %v1016_v8, %v402_v39  ;;  %v451_v42 = vadd.f32 %v1016_v8, %v450_v40 }
  0xa6   :  { %574 = vst [vmem:[%s1277_s3 + $0x90] sm:$0xff] %v510_v38 }
  0xa7   :  { %v526_v43 = vmax.f32 %v403_v41, 0.0  ;;  %v542_v44 = vmax.f32 %v451_v42, 0.0 }
  0xa8   :  { %v309_v45 = vpop.f32.mrf.mxu0  ;;  %v357_v46 = vpop.f32.mrf.mxu1 }
  0xa9   :  { %590 = vst [vmem:[%s1277_s3 + $0x110] sm:$0xff] %v526_v43  ;;  %v310_v47 = vadd.f32 %v1016_v8, %v309_v45  ;;  %v358_v48 = vadd.f32 %v1016_v8, %v357_v46 }
  0xaa   :  { %606 = vst [vmem:[%s1277_s3 + $0x190] sm:$0xff] %v542_v44 }
  0xab   :  { %v495_v49 = vmax.f32 %v310_v47, 0.0  ;;  %v511_v50 = vmax.f32 %v358_v48, 0.0 }
  0xac   :  { %v405_v51 = vpop.f32.mrf.mxu2  ;;  %v453_v52 = vpop.f32.mrf.mxu3 }
  0xad   :  { %559 = vst [vmem:[%s1277_s3 + $0x18] sm:$0xff] %v495_v49  ;;  %v406_v53 = vadd.f32 %v1016_v8, %v405_v51  ;;  %v454_v54 = vadd.f32 %v1016_v8, %v453_v52 }
  0xae   :  { %575 = vst [vmem:[%s1277_s3 + $0x98] sm:$0xff] %v511_v50 }
  0xaf   :  { %v527_v55 = vmax.f32 %v406_v53, 0.0  ;;  %v543_v56 = vmax.f32 %v454_v54, 0.0 }
  0xb0   :  { %v312_v57 = vpop.f32.mrf.mxu0  ;;  %v360_v58 = vpop.f32.mrf.mxu1 }
  0xb1   :  { %591 = vst [vmem:[%s1277_s3 + $0x118] sm:$0xff] %v527_v55  ;;  %v313_v59 = vadd.f32 %v1016_v8, %v312_v57  ;;  %v361_v60 = vadd.f32 %v1016_v8, %v360_v58 }
  0xb2   :  { %607 = vst [vmem:[%s1277_s3 + $0x198] sm:$0xff] %v543_v56 }
  0xb3   :  { %v496_v61 = vmax.f32 %v313_v59, 0.0  ;;  %v512_v62 = vmax.f32 %v361_v60, 0.0 }
  0xb4   :  { %v408_v63 = vpop.f32.mrf.mxu2  ;;  %v456_v0 = vpop.f32.mrf.mxu3 }
  0xb5   :  { %560 = vst [vmem:[%s1277_s3 + $0x20] sm:$0xff] %v496_v61  ;;  %v409_v1 = vadd.f32 %v1016_v8, %v408_v63  ;;  %v457_v2 = vadd.f32 %v1016_v8, %v456_v0 }
  0xb6   :  { %576 = vst [vmem:[%s1277_s3 + $0xa0] sm:$0xff] %v512_v62 }
  0xb7   :  { %v528_v3 = vmax.f32 %v409_v1, 0.0  ;;  %v544_v4 = vmax.f32 %v457_v2, 0.0 }
  0xb8   :  { %v315_v5 = vpop.f32.mrf.mxu0  ;;  %v363_v6 = vpop.f32.mrf.mxu1 }
  0xb9   :  { %592 = vst [vmem:[%s1277_s3 + $0x120] sm:$0xff] %v528_v3  ;;  %v316_v7 = vadd.f32 %v1016_v8, %v315_v5  ;;  %v364_v9 = vadd.f32 %v1016_v8, %v363_v6 }
  0xba   :  { %608 = vst [vmem:[%s1277_s3 + $0x1a0] sm:$0xff] %v544_v4 }
  0xbb   :  { %v497_v10 = vmax.f32 %v316_v7, 0.0  ;;  %v513_v11 = vmax.f32 %v364_v9, 0.0 }
  0xbc   :  { %v411_v12 = vpop.f32.mrf.mxu2  ;;  %v459_v13 = vpop.f32.mrf.mxu3 }
  0xbd   :  { %561 = vst [vmem:[%s1277_s3 + $0x28] sm:$0xff] %v497_v10  ;;  %v412_v14 = vadd.f32 %v1016_v8, %v411_v12  ;;  %v460_v15 = vadd.f32 %v1016_v8, %v459_v13 }
  0xbe   :  { %577 = vst [vmem:[%s1277_s3 + $0xa8] sm:$0xff] %v513_v11 }
  0xbf   :  { %v529_v16 = vmax.f32 %v412_v14, 0.0  ;;  %v545_v17 = vmax.f32 %v460_v15, 0.0 }
  0xc0   :  { %v318_v18 = vpop.f32.mrf.mxu0  ;;  %v366_v19 = vpop.f32.mrf.mxu1 }
  0xc1   :  { %593 = vst [vmem:[%s1277_s3 + $0x128] sm:$0xff] %v529_v16  ;;  %v319_v20 = vadd.f32 %v1016_v8, %v318_v18  ;;  %v367_v21 = vadd.f32 %v1016_v8, %v366_v19 }
  0xc2   :  { %609 = vst [vmem:[%s1277_s3 + $0x1a8] sm:$0xff] %v545_v17 }
  0xc3   :  { %v498_v22 = vmax.f32 %v319_v20, 0.0  ;;  %v514_v23 = vmax.f32 %v367_v21, 0.0 }
  0xc4   :  { %v414_v24 = vpop.f32.mrf.mxu2  ;;  %v462_v25 = vpop.f32.mrf.mxu3 }
  0xc5   :  { %562 = vst [vmem:[%s1277_s3 + $0x30] sm:$0xff] %v498_v22  ;;  %v415_v26 = vadd.f32 %v1016_v8, %v414_v24  ;;  %v463_v27 = vadd.f32 %v1016_v8, %v462_v25 }
  0xc6   :  { %578 = vst [vmem:[%s1277_s3 + $0xb0] sm:$0xff] %v514_v23 }
  0xc7   :  { %v530_v28 = vmax.f32 %v415_v26, 0.0  ;;  %v546_v29 = vmax.f32 %v463_v27, 0.0 }
  0xc8   :  { %v321_v30 = vpop.f32.mrf.mxu0  ;;  %v369_v31 = vpop.f32.mrf.mxu1 }
  0xc9   :  { %594 = vst [vmem:[%s1277_s3 + $0x130] sm:$0xff] %v530_v28  ;;  %v322_v32 = vadd.f32 %v1016_v8, %v321_v30  ;;  %v370_v33 = vadd.f32 %v1016_v8, %v369_v31 }
  0xca   :  { %610 = vst [vmem:[%s1277_s3 + $0x1b0] sm:$0xff] %v546_v29 }
  0xcb   :  { %v499_v34 = vmax.f32 %v322_v32, 0.0  ;;  %v515_v35 = vmax.f32 %v370_v33, 0.0 }
  0xcc   :  { %v417_v36 = vpop.f32.mrf.mxu2  ;;  %v465_v37 = vpop.f32.mrf.mxu3 }
  0xcd   :  { %563 = vst [vmem:[%s1277_s3 + $0x38] sm:$0xff] %v499_v34  ;;  %v418_v38 = vadd.f32 %v1016_v8, %v417_v36  ;;  %v466_v39 = vadd.f32 %v1016_v8, %v465_v37 }
  0xce   :  { %579 = vst [vmem:[%s1277_s3 + $0xb8] sm:$0xff] %v515_v35 }
  0xcf   :  { %v531_v40 = vmax.f32 %v418_v38, 0.0  ;;  %v547_v41 = vmax.f32 %v466_v39, 0.0 }
  0xd0   :  { %v324_v42 = vpop.f32.mrf.mxu0  ;;  %v372_v43 = vpop.f32.mrf.mxu1 }
  0xd1   :  { %595 = vst [vmem:[%s1277_s3 + $0x138] sm:$0xff] %v531_v40  ;;  %v325_v44 = vadd.f32 %v1016_v8, %v324_v42  ;;  %v373_v45 = vadd.f32 %v1016_v8, %v372_v43 }
  0xd2   :  { %611 = vst [vmem:[%s1277_s3 + $0x1b8] sm:$0xff] %v547_v41 }
  0xd3   :  { %v500_v46 = vmax.f32 %v325_v44, 0.0  ;;  %v516_v47 = vmax.f32 %v373_v45, 0.0 }
  0xd4   :  { %v420_v48 = vpop.f32.mrf.mxu2  ;;  %v468_v49 = vpop.f32.mrf.mxu3 }
  0xd5   :  { %564 = vst [vmem:[%s1277_s3 + $0x40] sm:$0xff] %v500_v46  ;;  %v421_v50 = vadd.f32 %v1016_v8, %v420_v48  ;;  %v469_v51 = vadd.f32 %v1016_v8, %v468_v49 }
  0xd6   :  { %580 = vst [vmem:[%s1277_s3 + $0xc0] sm:$0xff] %v516_v47 }
  0xd7   :  { %v532_v52 = vmax.f32 %v421_v50, 0.0  ;;  %v548_v53 = vmax.f32 %v469_v51, 0.0 }
  0xd8   :  { %v327_v54 = vpop.f32.mrf.mxu0  ;;  %v375_v55 = vpop.f32.mrf.mxu1 }
  0xd9   :  { %596 = vst [vmem:[%s1277_s3 + $0x140] sm:$0xff] %v532_v52  ;;  %v328_v56 = vadd.f32 %v1016_v8, %v327_v54  ;;  %v376_v57 = vadd.f32 %v1016_v8, %v375_v55 }
  0xda   :  { %612 = vst [vmem:[%s1277_s3 + $0x1c0] sm:$0xff] %v548_v53 }
  0xdb   :  { %v501_v58 = vmax.f32 %v328_v56, 0.0  ;;  %v517_v59 = vmax.f32 %v376_v57, 0.0 }
  0xdc   :  { %v423_v60 = vpop.f32.mrf.mxu2  ;;  %v471_v61 = vpop.f32.mrf.mxu3 }
  0xdd   :  { %565 = vst [vmem:[%s1277_s3 + $0x48] sm:$0xff] %v501_v58  ;;  %v424_v62 = vadd.f32 %v1016_v8, %v423_v60  ;;  %v472_v63 = vadd.f32 %v1016_v8, %v471_v61 }
  0xde   :  { %581 = vst [vmem:[%s1277_s3 + $0xc8] sm:$0xff] %v517_v59 }
  0xdf   :  { %v533_v0 = vmax.f32 %v424_v62, 0.0  ;;  %v549_v1 = vmax.f32 %v472_v63, 0.0 }
  0xe0   :  { %v330_v2 = vpop.f32.mrf.mxu0  ;;  %v378_v3 = vpop.f32.mrf.mxu1 }
  0xe1   :  { %597 = vst [vmem:[%s1277_s3 + $0x148] sm:$0xff] %v533_v0  ;;  %v331_v4 = vadd.f32 %v1016_v8, %v330_v2  ;;  %v379_v5 = vadd.f32 %v1016_v8, %v378_v3 }
  0xe2   :  { %613 = vst [vmem:[%s1277_s3 + $0x1c8] sm:$0xff] %v549_v1 }
  0xe3   :  { %v502_v6 = vmax.f32 %v331_v4, 0.0  ;;  %v518_v7 = vmax.f32 %v379_v5, 0.0 }
  0xe4   :  { %v426_v9 = vpop.f32.mrf.mxu2  ;;  %v474_v10 = vpop.f32.mrf.mxu3 }
  0xe5   :  { %566 = vst [vmem:[%s1277_s3 + $0x50] sm:$0xff] %v502_v6  ;;  %v427_v11 = vadd.f32 %v1016_v8, %v426_v9  ;;  %v475_v12 = vadd.f32 %v1016_v8, %v474_v10 }
  0xe6   :  { %582 = vst [vmem:[%s1277_s3 + $0xd0] sm:$0xff] %v518_v7 }
  0xe7   :  { %v534_v13 = vmax.f32 %v427_v11, 0.0  ;;  %v550_v14 = vmax.f32 %v475_v12, 0.0 }
  0xe8   :  { %v333_v15 = vpop.f32.mrf.mxu0  ;;  %v381_v16 = vpop.f32.mrf.mxu1 }
  0xe9   :  { %598 = vst [vmem:[%s1277_s3 + $0x150] sm:$0xff] %v534_v13  ;;  %v334_v17 = vadd.f32 %v1016_v8, %v333_v15  ;;  %v382_v18 = vadd.f32 %v1016_v8, %v381_v16 }
  0xea   :  { %614 = vst [vmem:[%s1277_s3 + $0x1d0] sm:$0xff] %v550_v14 }
  0xeb   :  { %v503_v19 = vmax.f32 %v334_v17, 0.0  ;;  %v519_v20 = vmax.f32 %v382_v18, 0.0 }
  0xec   :  { %v429_v21 = vpop.f32.mrf.mxu2  ;;  %v477_v22 = vpop.f32.mrf.mxu3 }
  0xed   :  { %567 = vst [vmem:[%s1277_s3 + $0x58] sm:$0xff] %v503_v19  ;;  %v430_v23 = vadd.f32 %v1016_v8, %v429_v21  ;;  %v478_v24 = vadd.f32 %v1016_v8, %v477_v22 }
  0xee   :  { %583 = vst [vmem:[%s1277_s3 + $0xd8] sm:$0xff] %v519_v20 }
  0xef   :  { %v535_v25 = vmax.f32 %v430_v23, 0.0  ;;  %v551_v26 = vmax.f32 %v478_v24, 0.0 }
  0xf0   :  { %v336_v27 = vpop.f32.mrf.mxu0  ;;  %v384_v28 = vpop.f32.mrf.mxu1 }
  0xf1   :  { %599 = vst [vmem:[%s1277_s3 + $0x158] sm:$0xff] %v535_v25  ;;  %v337_v29 = vadd.f32 %v1016_v8, %v336_v27  ;;  %v385_v30 = vadd.f32 %v1016_v8, %v384_v28 }
  0xf2   :  { %615 = vst [vmem:[%s1277_s3 + $0x1d8] sm:$0xff] %v551_v26 }
  0xf3   :  { %v504_v31 = vmax.f32 %v337_v29, 0.0  ;;  %v520_v32 = vmax.f32 %v385_v30, 0.0 }
  0xf4   :  { %v432_v33 = vpop.f32.mrf.mxu2  ;;  %v480_v34 = vpop.f32.mrf.mxu3 }
  0xf5   :  { %568 = vst [vmem:[%s1277_s3 + $0x60] sm:$0xff] %v504_v31  ;;  %v433_v35 = vadd.f32 %v1016_v8, %v432_v33  ;;  %v481_v36 = vadd.f32 %v1016_v8, %v480_v34 }
  0xf6   :  { %584 = vst [vmem:[%s1277_s3 + $0xe0] sm:$0xff] %v520_v32 }
  0xf7   :  { %v536_v37 = vmax.f32 %v433_v35, 0.0  ;;  %v552_v38 = vmax.f32 %v481_v36, 0.0 }
  0xf8   :  { %v339_v39 = vpop.f32.mrf.mxu0  ;;  %v387_v40 = vpop.f32.mrf.mxu1 }
  0xf9   :  { %600 = vst [vmem:[%s1277_s3 + $0x160] sm:$0xff] %v536_v37  ;;  %v340_v41 = vadd.f32 %v1016_v8, %v339_v39  ;;  %v388_v42 = vadd.f32 %v1016_v8, %v387_v40 }
  0xfa   :  { %616 = vst [vmem:[%s1277_s3 + $0x1e0] sm:$0xff] %v552_v38 }
  0xfb   :  { %v505_v43 = vmax.f32 %v340_v41, 0.0  ;;  %v521_v44 = vmax.f32 %v388_v42, 0.0 }
  0xfc   :  { %v435_v45 = vpop.f32.mrf.mxu2  ;;  %v483_v46 = vpop.f32.mrf.mxu3 }
  0xfd   :  { %569 = vst [vmem:[%s1277_s3 + $0x68] sm:$0xff] %v505_v43  ;;  %v436_v47 = vadd.f32 %v1016_v8, %v435_v45  ;;  %v484_v48 = vadd.f32 %v1016_v8, %v483_v46 }
  0xfe   :  { %585 = vst [vmem:[%s1277_s3 + $0xe8] sm:$0xff] %v521_v44 }
  0xff   :  { %v537_v49 = vmax.f32 %v436_v47, 0.0  ;;  %v553_v50 = vmax.f32 %v484_v48, 0.0 }
 0x100   :  { %v342_v51 = vpop.f32.mrf.mxu0  ;;  %v390_v52 = vpop.f32.mrf.mxu1 }
 0x101   :  { %601 = vst [vmem:[%s1277_s3 + $0x168] sm:$0xff] %v537_v49  ;;  %v343_v53 = vadd.f32 %v1016_v8, %v342_v51  ;;  %v391_v54 = vadd.f32 %v1016_v8, %v390_v52 }
 0x102   :  { %617 = vst [vmem:[%s1277_s3 + $0x1e8] sm:$0xff] %v553_v50 }
 0x103   :  { %v506_v55 = vmax.f32 %v343_v53, 0.0  ;;  %v522_v56 = vmax.f32 %v391_v54, 0.0 }
 0x104   :  { %v438_v57 = vpop.f32.mrf.mxu2  ;;  %v486_v58 = vpop.f32.mrf.mxu3 }
 0x105   :  { %570 = vst [vmem:[%s1277_s3 + $0x70] sm:$0xff] %v506_v55  ;;  %v439_v59 = vadd.f32 %v1016_v8, %v438_v57  ;;  %v487_v60 = vadd.f32 %v1016_v8, %v486_v58 }
 0x106   :  { %586 = vst [vmem:[%s1277_s3 + $0xf0] sm:$0xff] %v522_v56 }
 0x107   :  { %v538_v61 = vmax.f32 %v439_v59, 0.0  ;;  %v554_v62 = vmax.f32 %v487_v60, 0.0 }
 0x108   :  { %v345_v63 = vpop.f32.mrf.mxu0  ;;  %v393_v0 = vpop.f32.mrf.mxu1 }
 0x109   :  { %602 = vst [vmem:[%s1277_s3 + $0x170] sm:$0xff] %v538_v61  ;;  %v346_v1 = vadd.f32 %v1016_v8, %v345_v63  ;;  %v394_v2 = vadd.f32 %v1016_v8, %v393_v0 }
 0x10a   :  { %618 = vst [vmem:[%s1277_s3 + $0x1f0] sm:$0xff] %v554_v62 }
 0x10b   :  { %v507_v3 = vmax.f32 %v346_v1, 0.0  ;;  %v523_v4 = vmax.f32 %v394_v2, 0.0 }
 0x10c   :  { %v441_v5 = vpop.f32.mrf.mxu2  ;;  %v489_v6 = vpop.f32.mrf.mxu3 }
 0x10d   :  { %571 = vst [vmem:[%s1277_s3 + $0x78] sm:$0xff] %v507_v3  ;;  %v442_v7 = vadd.f32 %v1016_v8, %v441_v5  ;;  %v490_v9 = vadd.f32 %v1016_v8, %v489_v6 }
 0x10e   :  { %587 = vst [vmem:[%s1277_s3 + $0xf8] sm:$0xff] %v523_v4 }
 0x10f   :  { %v539_v10 = vmax.f32 %v442_v7, 0.0  ;;  %v555_v11 = vmax.f32 %v490_v9, 0.0 }
 0x111   :  { %603 = vst [vmem:[%s1277_s3 + $0x178] sm:$0xff] %v539_v10 }
 0x112   :  { %619 = vst [vmem:[%s1277_s3 + $0x1f8] sm:$0xff] %v555_v11 }

// kernel: min5_forward.4
= control target key start
LH: loop header
LB: loop body
LE: loop exit
PB: predicated region body
PF: predicated region fallthrough
CT: control target
= control target key end

     0   :  { %s940_s13 = smov 0   ;;  %s1379_s0 = inlined_call_operand.vmem [shape: f32[8,8,8,96], index: 0, kind: input, shape index: {}]   ;;  %s1380_s1 = inlined_call_operand.vmem [shape: f32[8,8,256], index: 1, kind: input, shape index: {}]   ;;  %s1381_s2 = inlined_call_operand.vmem [shape: f32[8,1,128], index: 2, kind: input, shape index: {}]   ;;  %s1382_s3 = inlined_call_operand.vmem [shape: f32[96,128], index: 3, kind: input, shape index: {}]   ;;  %s1383_s4 = inlined_call_operand.vmem [shape: f32[96,128], index: 4, kind: input, shape index: {}]   ;;  %s1384_s5 = inlined_call_operand.vmem [shape: f32[96,128], index: 5, kind: input, shape index: {}]   ;;  %s1385_s6 = inlined_call_operand.vmem [shape: f32[96,128], index: 6, kind: input, shape index: {}]   ;;  %s1386_s7 = inlined_call_operand.vmem [shape: f32[96,32], index: 7, kind: input, shape index: {}]   ;;  %s1387_s8 = inlined_call_operand.vmem [shape: f32[32,128], index: 8, kind: input, shape index: {}]   ;;  %s1388_s9 = inlined_call_operand.vmem [shape: f32[256,128], index: 9, kind: input, shape index: {}]   ;;  %s1389_s10 = inlined_call_operand.vmem [shape: f32[8,8,128], index: 10, kind: output, shape index: {}]  }
   0x1 LB: > { %s846_s14 = sadd.s32 4294967295, %s883_s13   ;;  %p850_p0 = scmp.ge.s32.totalorder %s883_s13, 1  ;;  %s883_s13 = sphi %s940_s13, %s20_s13  }
   0x2   : > { %p330_p1 = scmp.lt.s32.totalorder %s883_s13, 9 }
   0x4   : > { %p331_p2 = pnand %p850_p0, %p330_p1 }
   0x5   : > { %p375_p3 = scmp.lt.s32.totalorder (!%p331_p2), %s846_s14, 7 }
   0x6   : > { %334 = sbr.rel (%p331_p2) target bundleno = 294 (0x126), region = 60 }
   0xb   : > { %v497_v0 = vld [vmem:[%s1386_s7 + $0x58] sm:$0xff]  ;;  %v496_v1 = vld [vmem:[%s1386_s7 + $0x50] sm:$0xff]  ;;  %v495_v2 = vld [vmem:[%s1386_s7 + $0x48] sm:$0xff]  ;;  %s1391_s14 = smov (!%p375_p3, %s846_s14), 7  ;;  %vm400_vm0 = vcmask 785408   ;;  %vm670_vm3 = vcmask 261120  }
   0xc   : > { %505 = vmatpush.msra.mxu0 %v497_v0  ;;  %v494_v3 = vld [vmem:[%s1386_s7 + $0x40] sm:$0xff]  ;;  %s864_s23 = sshll.u32 %s1391_s14, 6  ;;  %v569_v4 = vld [vmem:[%s1383_s4 + $0x58] sm:$0xff]  ;;  %v568_v6 = vld [vmem:[%s1383_s4 + $0x50] sm:$0xff]  ;;  %s387_s24 = scalar_lea.vmem %s1381_s2, %s1391_s14 }
   0xd   : > { %v605_v5 = vld [vmem:[%s1384_s5 + $0x58] sm:$0xff]  ;;  %s978_s16 = scalar_lea.vmem %s1379_s0, %s864_s23  ;;  %577 = vmatpush.msra.mxu2 %v569_v4  ;;  %v604_v8 = vld [vmem:[%s1384_s5 + $0x50] sm:$0xff]  ;;  %v567_v9 = vld [vmem:[%s1383_s4 + $0x48] sm:$0xff]  ;;  %s865_s26 = sshll.u32 %s1391_s14, 4 }
   0xe   : > { %506 = vmatpush.msra.mxu0 %v496_v1  ;;  %v493_v7 = vld [vmem:[%s1386_s7 + $0x38] sm:$0xff]  ;;  %v987_v10 = vld [vmem:[%s978_s16] sm:$0xff]  ;;  %v990_v11 = vld [vmem:[%s978_s16 + $0x8] sm:$0xff]  ;;  %613 = vmatpush.msra.mxu3 %v605_v5  ;;  %s384_s19 = scalar_lea.vmem %s1380_s1, %s865_s26  ;;  %s855_s27 = sshll.u32 %s1391_s14, 3 }
   0xf   : > { %v993_v12 = vld [vmem:[%s978_s16 + $0x10] sm:$0xff]  ;;  %v996_v13 = vld [vmem:[%s978_s16 + $0x18] sm:$0xff]  ;;  %v401_v14 = vsel %vm400_vm0, %v987_v10, 0.0  ;;  %v402_v15 = vsel %vm400_vm0, %v990_v11, 0.0  ;;  %v417_v17 = vmul.f32 %v987_v10, %v987_v10  ;;  %578 = vmatpush.msra.mxu2 %v568_v6  ;;  %v603_v18 = vld [vmem:[%s1384_s5 + $0x48] sm:$0xff]  ;;  %v418_v24 = vmul.f32 %v990_v11, %v990_v11  ;;  %s391_s29 = scalar_lea.vmem %s1389_s10, %s855_s27 }
  0x10   : > { %507 = vmatpush.msra.mxu0 %v495_v2  ;;  %v404_v16 = vsel %vm400_vm0, %v993_v12, 0.0  ;;  %v492_v19 = vld [vmem:[%s1386_s7 + $0x30] sm:$0xff]  ;;  %v1013_v20 = vld [vmem:[%s978_s16 + $0x20] sm:$0xff]  ;;  %v403_v21 = vadd.f32 %v402_v15, %v401_v14  ;;  %614 = vmatpush.msra.mxu3 %v604_v8  ;;  %v406_v23 = vsel %vm400_vm0, %v996_v13, 0.0  ;;  %v419_v25 = vmul.f32 %v993_v12, %v993_v12  ;;  %v491_v27 = vld [vmem:[%s1386_s7 + $0x28] sm:$0xff] }
  0x11   : > { %v566_v22 = vld [vmem:[%s1383_s4 + $0x40] sm:$0xff]  ;;  %579 = vmatpush.msra.mxu2 %v567_v9  ;;  %v1031_v28 = vld [vmem:[%s978_s16 + $0x28] sm:$0xff]  ;;  %v420_v30 = vmul.f32 %v996_v13, %v996_v13  ;;  %v565_v31 = vld [vmem:[%s1383_s4 + $0x38] sm:$0xff]  ;;  %v408_v32 = vsel %vm400_vm0, %v1013_v20, 0.0  ;;  %v421_v33 = vmul.f32 %v1013_v20, %v1013_v20  ;;  %v425_v34 = vsel %vm400_vm0, %v417_v17, 0.0 }
  0x12   : > { %508 = vmatpush.msra.mxu0 %v494_v3  ;;  %v602_v26 = vld [vmem:[%s1384_s5 + $0x40] sm:$0xff]  ;;  %v405_v29 = vadd.f32 %v404_v16, %v403_v21  ;;  %615 = vmatpush.msra.mxu3 %v603_v18  ;;  %v426_v35 = vsel %vm400_vm0, %v418_v24, 0.0  ;;  %v601_v36 = vld [vmem:[%s1384_s5 + $0x38] sm:$0xff]  ;;  %v1051_v38 = vld [vmem:[%s978_s16 + $0x30] sm:$0xff]  ;;  %v428_v41 = vsel %vm400_vm0, %v419_v25, 0.0  ;;  %v410_v43 = vsel %vm400_vm0, %v1031_v28, 0.0 }
  0x13   : > { %580 = vmatpush.msra.mxu2 %v566_v22  ;;  %v490_v37 = vld [vmem:[%s1386_s7 + $0x20] sm:$0xff]  ;;  %v427_v40 = vadd.f32 %v426_v35, %v425_v34  ;;  %v564_v42 = vld [vmem:[%s1383_s4 + $0x30] sm:$0xff]  ;;  %v422_v44 = vmul.f32 %v1031_v28, %v1031_v28  ;;  %v430_v45 = vsel %vm400_vm0, %v420_v30, 0.0  ;;  %v489_v47 = vld [vmem:[%s1386_s7 + $0x18] sm:$0xff]  ;;  %v412_v52 = vsel %vm400_vm0, %v1051_v38, 0.0 }
  0x14   : > { %509 = vmatpush.msra.mxu0 %v493_v7  ;;  %v407_v39 = vadd.f32 %v406_v23, %v405_v29  ;;  %616 = vmatpush.msra.mxu3 %v602_v26  ;;  %v600_v46 = vld [vmem:[%s1384_s5 + $0x30] sm:$0xff]  ;;  %v1069_v48 = vld [vmem:[%s978_s16 + $0x38] sm:$0xff]  ;;  %v563_v51 = vld [vmem:[%s1383_s4 + $0x28] sm:$0xff]  ;;  %v423_v53 = vmul.f32 %v1051_v38, %v1051_v38  ;;  %v432_v54 = vsel %vm400_vm0, %v421_v33, 0.0  ;;  %v457_v35 = vsel %vm400_vm0, %v990_v11, -inf }
  0x15   : > { %581 = vmatpush.msra.mxu2 %v565_v31  ;;  %v429_v50 = vadd.f32 %v428_v41, %v427_v40  ;;  %v599_v55 = vld [vmem:[%s1384_s5 + $0x28] sm:$0xff]  ;;  %v533_v56 = vld [vmem:[%s1382_s3 + $0x58] sm:$0xff]  ;;  %v488_v57 = vld [vmem:[%s1386_s7 + $0x10] sm:$0xff]  ;;  %v414_v62 = vsel %vm400_vm0, %v1069_v48, 0.0  ;;  %v424_v63 = vmul.f32 %v1069_v48, %v1069_v48  ;;  %v434_v0 = vsel %vm400_vm0, %v422_v44, 0.0 }
  0x16   : > { %510 = vmatpush.msra.mxu0 %v492_v19  ;;  %v409_v49 = vadd.f32 %v408_v32, %v407_v39  ;;  %617 = vmatpush.msra.mxu3 %v601_v36  ;;  %v562_v60 = vld [vmem:[%s1383_s4 + $0x20] sm:$0xff]  ;;  %v532_v61 = vld [vmem:[%s1382_s3 + $0x50] sm:$0xff]  ;;  %v531_v2 = vld [vmem:[%s1382_s3 + $0x48] sm:$0xff]  ;;  %v436_v7 = vsel %vm400_vm0, %v423_v53, 0.0  ;;  %v456_v32 = vsel %vm400_vm0, %v987_v10, -inf  ;;  %v458_v36 = vsel %vm400_vm0, %v993_v12, -inf }
  0x17   : > { %582 = vmatpush.msra.mxu2 %v564_v42  ;;  %v431_v59 = vadd.f32 %v430_v45, %v429_v50  ;;  %538 = vmatpush.msra.mxu1 %v533_v56  ;;  %v598_v1 = vld [vmem:[%s1384_s5 + $0x20] sm:$0xff]  ;;  %v487_v3 = vld [vmem:[%s1386_s7 + $0x8] sm:$0xff]  ;;  %v561_v6 = vld [vmem:[%s1383_s4 + $0x18] sm:$0xff]  ;;  %v438_v18 = vsel %vm400_vm0, %v424_v63, 0.0  ;;  %v460_v39 = vsel %vm400_vm0, %v1013_v20, -inf  ;;  %v464_v44 = vsel %vm400_vm0, %v1051_v38, -inf }
  0x18   : > { %511 = vmatpush.msra.mxu0 %v491_v27  ;;  %v411_v58 = vadd.f32 %v410_v43, %v409_v49  ;;  %618 = vmatpush.msra.mxu3 %v600_v46  ;;  %v597_v8 = vld [vmem:[%s1384_s5 + $0x18] sm:$0xff]  ;;  %v530_v9 = vld [vmem:[%s1382_s3 + $0x40] sm:$0xff]  ;;  %v560_v17 = vld [vmem:[%s1383_s4 + $0x10] sm:$0xff]  ;;  %v462_v43 = vsel %vm400_vm0, %v1031_v28, -inf  ;;  %v466_v45 = vsel %vm400_vm0, %v1069_v48, -inf  ;;  %v465_v56 = vmax.f32 %v458_v36, %v464_v44 }
  0x19   : > { %583 = vmatpush.msra.mxu2 %v563_v51  ;;  %v433_v5 = vadd.f32 %v432_v54, %v431_v59  ;;  %539 = vmatpush.msra.mxu1 %v532_v61  ;;  %v486_v14 = vld [vmem:[%s1386_s7] sm:$0xff]  ;;  %v596_v19 = vld [vmem:[%s1384_s5 + $0x10] sm:$0xff]  ;;  %v559_v23 = vld [vmem:[%s1383_s4 + $0x8] sm:$0xff] }
  0x1a   : > { %512 = vmatpush.msra.mxu0 %v490_v37  ;;  %v413_v4 = vadd.f32 %v412_v52, %v411_v58  ;;  %619 = vmatpush.msra.mxu3 %v599_v55  ;;  %v641_v24 = vld [vmem:[%s1385_s6 + $0x58] sm:$0xff]  ;;  %v595_v25 = vld [vmem:[%s1384_s5 + $0x8] sm:$0xff]  ;;  %v558_v30 = vld [vmem:[%s1383_s4] sm:$0xff]  ;;  %v459_v37 = vsel %vm400_vm0, %v996_v13, -inf  ;;  %v461_v52 = vmax.f32 %v456_v32, %v460_v39  ;;  %v463_v55 = vmax.f32 %v457_v35, %v462_v43 }
  0x1b   : > { %584 = vmatpush.msra.mxu2 %v562_v60  ;;  %v435_v16 = vadd.f32 %v434_v0, %v433_v5  ;;  %540 = vmatpush.msra.mxu1 %v531_v2  ;;  %v529_v26 = vld [vmem:[%s1382_s3 + $0x38] sm:$0xff]  ;;  %v640_v31 = vld [vmem:[%s1385_s6 + $0x50] sm:$0xff]  ;;  %v594_v33 = vld [vmem:[%s1384_s5] sm:$0xff] }
  0x1c   : > { %513 = vmatpush.msra.mxu0 %v489_v47  ;;  %v415_v15 = vadd.f32 %v414_v62, %v413_v4  ;;  %620 = vmatpush.msra.mxu3 %v598_v1  ;;  %v712_v34 = vld [vmem:[%s1388_s9 + $0x78] sm:$0xff]  ;;  %v528_v42 = vld [vmem:[%s1382_s3 + $0x30] sm:$0xff]  ;;  %v639_v47 = vld [vmem:[%s1385_s6 + $0x48] sm:$0xff]  ;;  %v468_v5 = vmax.f32 %v461_v52, %v463_v55 }
  0x1d   : > { %585 = vmatpush.msra.mxu2 %v561_v6  ;;  %v437_v22 = vadd.f32 %v436_v7, %v435_v16  ;;  %541 = vmatpush.msra.mxu1 %v530_v9  ;;  %v728_v41 = vld [vmem:[%s1388_s9 + $0xf8] sm:$0xff]  ;;  %v711_v46 = vld [vmem:[%s1388_s9 + $0x70] sm:$0xff]  ;;  %v527_v51 = vld [vmem:[%s1382_s3 + $0x28] sm:$0xff]  ;;  %v471_v9 = vsel %vm400_vm0, %v987_v10, inf  ;;  %v475_v16 = vsel %vm400_vm0, %v1013_v20, inf  ;;  %v477_v10 = vsel %vm400_vm0, %v1031_v28, inf }
  0x1e   : > { %514 = vmatpush.msra.mxu0 %v488_v57  ;;  %v1128_v21 = vmul.f32 0.125, %v415_v15  ;;  %621 = vmatpush.msra.mxu3 %v597_v8  ;;  %v727_v50 = vld [vmem:[%s1388_s9 + $0xf0] sm:$0xff]  ;;  %v710_v53 = vld [vmem:[%s1388_s9 + $0x68] sm:$0xff]  ;;  %v638_v54 = vld [vmem:[%s1385_s6 + $0x40] sm:$0xff]  ;;  %v467_v57 = vmax.f32 %v459_v37, %v466_v45 }
  0x1f   : > { %586 = vmatpush.msra.mxu2 %v560_v17  ;;  %v439_v27 = vadd.f32 %v438_v18, %v437_v22  ;;  %542 = vmatpush.msra.mxu1 %v529_v26  ;;  %v726_v59 = vld [vmem:[%s1388_s9 + $0xe8] sm:$0xff]  ;;  %v526_v60 = vld [vmem:[%s1382_s3 + $0x20] sm:$0xff]  ;;  %v637_v62 = vld [vmem:[%s1385_s6 + $0x38] sm:$0xff]  ;;  %v474_v17 = vsel %vm400_vm0, %v996_v13, inf }
  0x20   : > { %515 = vmatpush.msra.mxu0 %v487_v3  ;;  %v440_v29 = vmul.f32 %v1128_v21, %v415_v15  ;;  %622 = vmatpush.msra.mxu3 %v596_v19  ;;  %v709_v61 = vld [vmem:[%s1388_s9 + $0x60] sm:$0xff]  ;;  %v708_v0 = vld [vmem:[%s1388_s9 + $0x58] sm:$0xff]  ;;  %v707_v3 = vld [vmem:[%s1388_s9 + $0x50] sm:$0xff]  ;;  %v469_v6 = vmax.f32 %v465_v56, %v467_v57  ;;  %v473_v15 = vsel %vm400_vm0, %v993_v12, inf  ;;  %v481_v12 = vsel %vm400_vm0, %v1069_v48, inf }
  0x21   : > { %587 = vmatpush.msra.mxu2 %v559_v23  ;;  %543 = vmatpush.msra.mxu1 %v528_v42  ;;  %v725_v63 = vld [vmem:[%s1388_s9 + $0xe0] sm:$0xff]  ;;  %v525_v1 = vld [vmem:[%s1382_s3 + $0x18] sm:$0xff]  ;;  %v636_v4 = vld [vmem:[%s1385_s6 + $0x30] sm:$0xff]  ;;  %v476_v48 = vmin.f32 %v471_v9, %v475_v16  ;;  %v482_v26 = vmin.f32 %v474_v17, %v481_v12 }
  0x22   : > { %516 = vmatpush.msra.mxu0 %v486_v14  ;;  %v441_v40 = vsub.f32 %v439_v27, %v440_v29  ;;  %623 = vmatpush.msra.mxu3 %v595_v25  ;;  %v724_v2 = vld [vmem:[%s1388_s9 + $0xd8] sm:$0xff]  ;;  %v524_v7 = vld [vmem:[%s1382_s3 + $0x10] sm:$0xff]  ;;  %v635_v8 = vld [vmem:[%s1385_s6 + $0x28] sm:$0xff]  ;;  %v472_v14 = vsel %vm400_vm0, %v990_v11, inf  ;;  %v479_v11 = vsel %vm400_vm0, %v1051_v38, inf  ;;  %v470_v38 = vmax.f32 %v468_v5, %v469_v6 }
  0x23   : > { %856 = vmatmul.msk.f32.vlgmr.msra.gmra.mxu0 %vm400_vm0, %v1128_v21  ;;  %588 = vmatpush.msra.mxu2 %v558_v30  ;;  %v723_v20 = vld [vmem:[%s1388_s9 + $0xd0] sm:$0xff]  ;;  %v523_v18 = vld [vmem:[%s1382_s3 + $0x8] sm:$0xff]  ;;  %v634_v28 = vld [vmem:[%s1385_s6 + $0x20] sm:$0xff]  ;;  %v480_v25 = vmin.f32 %v473_v15, %v479_v11 }
  0x24   : > { %649 = vmatpush.msrb.mxu0 %v641_v24  ;;  %v442_v49 = vmul.f32 0.14285715, %v441_v40  ;;  %624 = vmatpush.msra.mxu3 %v594_v33  ;;  %v706_v13 = vld [vmem:[%s1388_s9 + $0x48] sm:$0xff]  ;;  %v522_v23 = vld [vmem:[%s1382_s3] sm:$0xff]  ;;  %v478_v24 = vmin.f32 %v472_v14, %v477_v10  ;;  %v704_v32 = vld [vmem:[%s1388_s9 + $0x38] sm:$0xff] }
  0x25   : > { %729 = vmatpush.msrb.mxu2 %v712_v34  ;;  %544 = vmatpush.msra.mxu1 %v527_v51  ;;  %v722_v22 = vld [vmem:[%s1388_s9 + $0xc8] sm:$0xff]  ;;  %v705_v27 = vld [vmem:[%s1388_s9 + $0x40] sm:$0xff]  ;;  %v720_v34 = vld [vmem:[%s1388_s9 + $0xb8] sm:$0xff]  ;;  %v484_v37 = vmin.f32 %v480_v25, %v482_v26 }
  0x26   : > { %650 = vmatpush.msrb.mxu0 %v640_v31  ;;  %749 = vmatpush.msrb.mxu3 %v728_v41  ;;  %v1197_v58 = vmax.f32 %v442_v49, 0.0  ;;  %v721_v30 = vld [vmem:[%s1388_s9 + $0xc0] sm:$0xff]  ;;  %v633_v31 = vld [vmem:[%s1385_s6 + $0x18] sm:$0xff]  ;;  %v632_v35 = vld [vmem:[%s1385_s6 + $0x10] sm:$0xff]  ;;  %v483_v36 = vmin.f32 %v476_v48, %v478_v24 }
  0x27   : > { %730 = vmatpush.msrb.mxu2 %v711_v46  ;;  %545 = vmatpush.msra.mxu1 %v526_v60  ;;  %v703_v39 = vld [vmem:[%s1388_s9 + $0x30] sm:$0xff]  ;;  %v669_v41 = vld [vmem:[%s1387_s8 + $0x18] sm:$0xff]  ;;  %v631_v43 = vld [vmem:[%s1385_s6 + $0x8] sm:$0xff] }
  0x28   : > { %651 = vmatpush.msrb.mxu0 %v639_v47  ;;  %750 = vmatpush.msrb.mxu3 %v727_v50  ;;  %875 = vrsqrt.f32 %v1197_v58  ;;  %v719_v42 = vld [vmem:[%s1388_s9 + $0xb0] sm:$0xff]  ;;  %v702_v44 = vld [vmem:[%s1388_s9 + $0x28] sm:$0xff]  ;;  %v630_v47 = vld [vmem:[%s1385_s6] sm:$0xff]  ;;  %v485_v49 = vmin.f32 %v483_v36, %v484_v37  ;;  %vm451_vm1 = vcmp.eq.f32.partialorder %v1197_v58, inf  ;;  %v454_v52 = vand.u32 2147483648, %v1197_v58 }
  0x29   : > { %731 = vmatpush.msrb.mxu2 %v710_v53  ;;  %546 = vmatpush.msra.mxu1 %v525_v1  ;;  %v668_v46 = vld [vmem:[%s1387_s8 + $0x10] sm:$0xff]  ;;  %v701_v51 = vld [vmem:[%s1388_s9 + $0x20] sm:$0xff]  ;;  %vm453_vm2 = vcmp.eq.f32.partialorder %v1197_v58, 0.0  ;;  %v700_v56 = vld [vmem:[%s1388_s9 + $0x18] sm:$0xff] }
  0x2a   : > { %652 = vmatpush.msrb.mxu0 %v638_v54  ;;  %751 = vmatpush.msrb.mxu3 %v726_v59  ;;  %v717_v53 = vld [vmem:[%s1388_s9 + $0xa0] sm:$0xff]  ;;  %v667_v54 = vld [vmem:[%s1387_s8 + $0x8] sm:$0xff]  ;;  %v716_v57 = vld [vmem:[%s1388_s9 + $0x98] sm:$0xff] }
  0x2b   : > { %732 = vmatpush.msrb.mxu2 %v709_v61  ;;  %547 = vmatpush.msra.mxu1 %v524_v7  ;;  %v699_v60 = vld [vmem:[%s1388_s9 + $0x10] sm:$0xff]  ;;  %v666_v61 = vld [vmem:[%s1387_s8] sm:$0xff] }
  0x2c   : > { %653 = vmatpush.msrb.mxu0 %v637_v62  ;;  %752 = vmatpush.msrb.mxu3 %v725_v63  ;;  %v715_v63 = vld [vmem:[%s1388_s9 + $0x90] sm:$0xff]  ;;  %v697_v1 = vld [vmem:[%s1388_s9] sm:$0xff] }
  0x2d   : > { %733 = vmatpush.msrb.mxu2 %v708_v0  ;;  %548 = vmatpush.msra.mxu1 %v523_v18  ;;  %v714_v0 = vld [vmem:[%s1388_s9 + $0x88] sm:$0xff]  ;;  %v874_v6 = vld [vmem:[%s387_s24] ss:$0 sm:$0xff] }
  0x2e   : > { %654 = vmatpush.msrb.mxu0 %v636_v4  ;;  %753 = vmatpush.msrb.mxu3 %v724_v2  ;;  %v876_v19 = vpop.eup %875  ;;  %v713_v2 = vld [vmem:[%s1388_s9 + $0x80] sm:$0xff] }
  0x2f   : > { %734 = vmatpush.msrb.mxu2 %v707_v3  ;;  %v445_v29 = vmul.f32 %v876_v19, %v1197_v58  ;;  %549 = vmatpush.msra.mxu1 %v522_v23  ;;  %v696_v3 = vld [vmem:[%s384_s19 + $0x8] sm:$0xff]  ;;  %v695_v4 = vld [vmem:[%s384_s19] sm:$0xff] }
  0x30   : > { %655 = vmatpush.msrb.mxu0 %v635_v8  ;;  %754 = vmatpush.msrb.mxu3 %v723_v20 }
  0x31   : > { %735 = vmatpush.msrb.mxu2 %v706_v13  ;;  %v446_v33 = vmul.f32 %v876_v19, %v445_v29  ;;  %859 = vmatmul.msk.f32.vlgmr.msra.gmra.mxu3 %vm400_vm0, %v470_v38 }
  0x32   : > { %656 = vmatpush.msrb.mxu0 %v634_v28  ;;  %755 = vmatpush.msrb.mxu3 %v722_v22 }
  0x33   : > { %736 = vmatpush.msrb.mxu2 %v705_v27  ;;  %v447_v40 = vmul.f32 0.5, %v446_v33  ;;  %857 = vmatmul.msk.f32.vlgmr.msra.gmra.mxu1 %vm400_vm0, %v1128_v21  ;;  %v718_v21 = vld [vmem:[%s1388_s9 + $0xa8] sm:$0xff] }
  0x34   : > { %756 = vmatpush.msrb.mxu3 %v721_v30  ;;  %657 = vmatpush.msrb.mxu0 %v633_v31 }
  0x35   : > { %737 = vmatpush.msrb.mxu2 %v704_v32  ;;  %v448_v45 = vsub.f32 1.5, %v447_v40  ;;  %686 = vmatpush.msrb.mxu1 %v669_v41 }
  0x36   : > { %757 = vmatpush.msrb.mxu3 %v720_v34  ;;  %658 = vmatpush.msrb.mxu0 %v632_v35 }
  0x37   : > { %738 = vmatpush.msrb.mxu2 %v703_v39  ;;  %v449_v50 = vmul.f32 %v876_v19, %v448_v45  ;;  %687 = vmatpush.msrb.mxu1 %v668_v46 }
  0x38   : > { %758 = vmatpush.msrb.mxu3 %v719_v42  ;;  %659 = vmatpush.msrb.mxu0 %v631_v43 }
  0x39   : > { %739 = vmatpush.msrb.mxu2 %v702_v44  ;;  %v450_v55 = vmul.f32 %v449_v50, %v1197_v58  ;;  %688 = vmatpush.msrb.mxu1 %v667_v54 }
  0x3a   : > { %759 = vmatpush.msrb.mxu3 %v718_v21  ;;  %660 = vmatpush.msrb.mxu0 %v630_v47 }
  0x3b   : > { %740 = vmatpush.msrb.mxu2 %v701_v51  ;;  %860 = vmatmul.msk.f32.vlgmr.msrb.gmra.mxu0 %vm400_vm0, %v485_v49  ;;  %v452_v59 = vsel %vm451_vm1, %v1197_v58, %v450_v55  ;;  %v698_v58 = vld [vmem:[%s1388_s9 + $0x8] sm:$0xff] }
  0x3c   : > { %760 = vmatpush.msrb.mxu3 %v717_v53  ;;  %v455_v62 = vsel %vm453_vm2, %v454_v52, %v452_v59  ;;  %689 = vmatpush.msrb.mxu1 %v666_v61 }
  0x3d   : > { %741 = vmatpush.msrb.mxu2 %v700_v56 }
  0x3e   : > { %858 = vmatmul.msk.f32.vlgmr.msra.gmra.mxu2 %vm400_vm0, %v455_v62  ;;  %761 = vmatpush.msrb.mxu3 %v716_v57 }
  0x3f   : > { %742 = vmatpush.msrb.mxu2 %v699_v60 }
  0x40   : > { %762 = vmatpush.msrb.mxu3 %v715_v63 }
  0x41   : > { %743 = vmatpush.msrb.mxu2 %v698_v58 }
  0x42   : > { %763 = vmatpush.msrb.mxu3 %v714_v0 }
  0x43   : > { %744 = vmatpush.msrb.mxu2 %v697_v1 }
  0x44   : > { %764 = vmatpush.msrb.mxu3 %v713_v2 }
  0x45   : > { %765 = vmatmul.f32.vlgmr.msrb.gmra.mxu3 %v696_v3 }
  0x46   : > { %745 = vmatmul.f32.vlgmr.msrb.gmra.mxu2 %v695_v4 }
  0xa0   : > { %v518_v5 = vpop.f32.mrf.mxu0 }
  0xa1   : > { %861 = vmatmul.msk.f32.vlgmr.msrb.gmra.mxu1 %vm670_vm3, %v518_v5 }
  0xb0   : > { %v551_v7 = vpop.f32.mrf.mxu1 }
  0xb1   : > { %v557_v9 = vadd.f32 %v874_v6, %v551_v7 }
  0xb4   : > { %v626_v8 = vpop.f32.mrf.mxu3 }
  0xb8   : > { %v662_v17 = vpop.f32.mrf.mxu0 }
  0xc1   : > { %v590_v14 = vpop.f32.mrf.mxu2 }
  0xc2   : > { %v593_v15 = vadd.f32 %v590_v14, %v557_v9 }
  0xc4   : > { %v629_v16 = vadd.f32 %v626_v8, %v593_v15 }
  0xc6   : > { %v665_v12 = vadd.f32 %v662_v17, %v629_v16 }
  0xc8   : > { %v766_v11 = vpop.f32.mrf.mxu3 }
  0xc9   : > { %v746_v10 = vpop.f32.mrf.mxu2 }
  0xca   : > { %v767_v20 = vadd.f32 %v766_v11, %v746_v10 }
 0x11e   : > { %v691_v18 = vpop.f32.mrf.mxu1 }
 0x11f   : > { %v694_v13 = vadd.f32 %v691_v18, %v665_v12 }
 0x121   : > { %v769_v28 = vadd.f32 %v767_v20, %v694_v13 }
 0x123   : > { %v770_v38 = vmax.f32 %v769_v28, 0.0 }
 0x125   : > { %771 = vst [vmem:[%s391_s29] sm:$0xff] %v770_v38 }
 0x126 PF: > { %s20_s13 = sadd.s32 1, %s883_s13  }
 0x127   : > { %p17_p4 = scmp.ge.s32.totalorder %s20_s13, 10  }
 0x129   :  { %19 = sbr.rel (!%p17_p4) target bundleno = 1 (0x1), region = 96 }

// kernel: min5_forward.5
= control target key start
LH: loop header
LB: loop body
LE: loop exit
PB: predicated region body
PF: predicated region fallthrough
CT: control target
= control target key end

     0   :  { %vm99_vm0 = vcmask 785408   ;;  %vm873_vm3 = vcmask 261120   ;;  %s2483_s7 = inlined_call_operand.vmem [shape: f32[96,32], index: 7, kind: input, shape index: {}]   ;;  %s2484_s0 = inlined_call_operand.vmem [shape: f32[1,64,8,96], index: 0, kind: input, shape index: {}]   ;;  %s2485_s2 = inlined_call_operand.vmem [shape: f32[1,1,128], index: 2, kind: input, shape index: {}]   ;;  %s2486_s4 = inlined_call_operand.vmem [shape: f32[96,128], index: 4, kind: input, shape index: {}]   ;;  %s2487_s5 = inlined_call_operand.vmem [shape: f32[96,128], index: 5, kind: input, shape index: {}]   ;;  %s2488_s3 = inlined_call_operand.vmem [shape: f32[96,128], index: 3, kind: input, shape index: {}]   ;;  %s2489_s6 = inlined_call_operand.vmem [shape: f32[96,128], index: 6, kind: input, shape index: {}]   ;;  %s2490_s9 = inlined_call_operand.vmem [shape: f32[256,128], index: 9, kind: input, shape index: {}]   ;;  %s2491_s8 = inlined_call_operand.vmem [shape: f32[32,128], index: 8, kind: input, shape index: {}]   ;;  %s2492_s1 = inlined_call_operand.vmem [shape: f32[1,8,256], index: 1, kind: input, shape index: {}]   ;;  %s2493_s10 = inlined_call_operand.vmem [shape: f32[1,8,128], index: 10, kind: output, shape index: {}]  }
   0x1   :  { %v700_v0 = vld [vmem:[%s2483_s7 + $0x58] sm:$0xff]  ;;  %v699_v1 = vld [vmem:[%s2483_s7 + $0x50] sm:$0xff]  ;;  %v698_v2 = vld [vmem:[%s2483_s7 + $0x48] sm:$0xff] }
   0x2   :  { %708 = vmatpush.msra.mxu0 %v700_v0  ;;  %v697_v3 = vld [vmem:[%s2483_s7 + $0x40] sm:$0xff]  ;;  %v1127_v5 = vld [vmem:[%s2484_s0 + $0x8] sm:$0xff]  ;;  %v1132_v6 = vld [vmem:[%s2484_s0 + $0x10] sm:$0xff] }
   0x3   :  { %v1122_v4 = vld [vmem:[%s2484_s0] sm:$0xff]  ;;  %v1137_v7 = vld [vmem:[%s2484_s0 + $0x18] sm:$0xff]  ;;  %v101_v9 = vsel %vm99_vm0, %v1127_v5, 0.0  ;;  %v103_v10 = vsel %vm99_vm0, %v1132_v6, 0.0  ;;  %v695_v15 = vld [vmem:[%s2483_s7 + $0x30] sm:$0xff] }
   0x4   :  { %709 = vmatpush.msra.mxu0 %v699_v1  ;;  %v100_v8 = vsel %vm99_vm0, %v1122_v4, 0.0  ;;  %v696_v11 = vld [vmem:[%s2483_s7 + $0x38] sm:$0xff]  ;;  %v1151_v12 = vld [vmem:[%s2484_s0 + $0x20] sm:$0xff]  ;;  %v105_v14 = vsel %vm99_vm0, %v1137_v7, 0.0  ;;  %v1161_v16 = vld [vmem:[%s2484_s0 + $0x28] sm:$0xff] }
   0x5   :  { %v102_v13 = vadd.f32 %v101_v9, %v100_v8  ;;  %v107_v18 = vsel %vm99_vm0, %v1151_v12, 0.0  ;;  %v694_v19 = vld [vmem:[%s2483_s7 + $0x28] sm:$0xff]  ;;  %v1171_v20 = vld [vmem:[%s2484_s0 + $0x30] sm:$0xff]  ;;  %v109_v22 = vsel %vm99_vm0, %v1161_v16, 0.0  ;;  %v693_v23 = vld [vmem:[%s2483_s7 + $0x20] sm:$0xff] }
   0x6   :  { %710 = vmatpush.msra.mxu0 %v698_v2  ;;  %v1181_v24 = vld [vmem:[%s2484_s0 + $0x38] sm:$0xff]  ;;  %v111_v26 = vsel %vm99_vm0, %v1171_v20, 0.0  ;;  %v1191_v28 = vld [vmem:[%s2484_s0 + $0x40] sm:$0xff]  ;;  %v691_v31 = vld [vmem:[%s2483_s7 + $0x10] sm:$0xff] }
   0x7   :  { %v104_v17 = vadd.f32 %v103_v10, %v102_v13  ;;  %v692_v27 = vld [vmem:[%s2483_s7 + $0x18] sm:$0xff]  ;;  %v113_v30 = vsel %vm99_vm0, %v1181_v24, 0.0  ;;  %v1201_v32 = vld [vmem:[%s2484_s0 + $0x48] sm:$0xff]  ;;  %v115_v34 = vsel %vm99_vm0, %v1191_v28, 0.0  ;;  %v1211_v36 = vld [vmem:[%s2484_s0 + $0x50] sm:$0xff] }
   0x8   :  { %711 = vmatpush.msra.mxu0 %v697_v3  ;;  %v690_v35 = vld [vmem:[%s2483_s7 + $0x8] sm:$0xff]  ;;  %v117_v38 = vsel %vm99_vm0, %v1201_v32, 0.0  ;;  %v689_v39 = vld [vmem:[%s2483_s7] sm:$0xff]  ;;  %v1221_v40 = vld [vmem:[%s2484_s0 + $0x58] sm:$0xff]  ;;  %v119_v42 = vsel %vm99_vm0, %v1211_v36, 0.0 }
   0x9   :  { %v106_v21 = vadd.f32 %v105_v14, %v104_v17  ;;  %v1228_v43 = vld [vmem:[%s2484_s0 + $0x60] sm:$0xff]  ;;  %v121_v45 = vsel %vm99_vm0, %v1221_v40, 0.0  ;;  %v1235_v46 = vld [vmem:[%s2484_s0 + $0x68] sm:$0xff]  ;;  %v1242_v49 = vld [vmem:[%s2484_s0 + $0x70] sm:$0xff] }
   0xa   :  { %712 = vmatpush.msra.mxu0 %v696_v11  ;;  %2519 = vst [vmem:[#allocation2_spill] sm:$0xff] %v1235_v46  ;;  %v123_v48 = vsel %vm99_vm0, %v1228_v43, 0.0  ;;  %v125_v51 = vsel %vm99_vm0, %v1235_v46, 0.0  ;;  %v1249_v52 = vld [vmem:[%s2484_s0 + $0x78] sm:$0xff]  ;;  %v127_v54 = vsel %vm99_vm0, %v1242_v49, 0.0  ;;  %v1256_v55 = vld [vmem:[%s2484_s0 + $0x80] sm:$0xff] }
   0xb   :  { %v108_v25 = vadd.f32 %v107_v18, %v106_v21  ;;  %2520 = vst [vmem:[#allocation3_spill] sm:$0xff] %v1242_v49  ;;  %v129_v57 = vsel %vm99_vm0, %v1249_v52, 0.0  ;;  %v1263_v58 = vld [vmem:[%s2484_s0 + $0x88] sm:$0xff]  ;;  %v131_v60 = vsel %vm99_vm0, %v1256_v55, 0.0  ;;  %v1270_v61 = vld [vmem:[%s2484_s0 + $0x90] sm:$0xff]  ;;  %v1277_v0 = vld [vmem:[%s2484_s0 + $0x98] sm:$0xff] }
   0xc   :  { %713 = vmatpush.msra.mxu0 %v695_v15  ;;  %2521 = vst [vmem:[#allocation4_spill] sm:$0xff] %v1249_v52  ;;  %v133_v63 = vsel %vm99_vm0, %v1263_v58, 0.0  ;;  %v135_v2 = vsel %vm99_vm0, %v1270_v61, 0.0  ;;  %v1284_v3 = vld [vmem:[%s2484_s0 + $0xa0] sm:$0xff]  ;;  %v137_v9 = vsel %vm99_vm0, %v1277_v0, 0.0  ;;  %v1291_v10 = vld [vmem:[%s2484_s0 + $0xa8] sm:$0xff] }
   0xd   :  { %v110_v29 = vadd.f32 %v109_v22, %v108_v25  ;;  %2522 = vst [vmem:[#allocation5_spill] sm:$0xff] %v1256_v55  ;;  %v139_v13 = vsel %vm99_vm0, %v1284_v3, 0.0  ;;  %v1298_v14 = vld [vmem:[%s2484_s0 + $0xb0] sm:$0xff]  ;;  %v141_v17 = vsel %vm99_vm0, %v1291_v10, 0.0  ;;  %v1305_v18 = vld [vmem:[%s2484_s0 + $0xb8] sm:$0xff]  ;;  %v1312_v22 = vld [vmem:[%s2484_s0 + $0xc0] sm:$0xff] }
   0xe   :  { %714 = vmatpush.msra.mxu0 %v694_v19  ;;  %2523 = vst [vmem:[#allocation6_spill] sm:$0xff] %v1263_v58  ;;  %v143_v21 = vsel %vm99_vm0, %v1298_v14, 0.0  ;;  %v145_v25 = vsel %vm99_vm0, %v1305_v18, 0.0 }
   0xf   :  { %v112_v33 = vadd.f32 %v111_v26, %v110_v29  ;;  %2524 = vst [vmem:[#allocation7_spill] sm:$0xff] %v1270_v61  ;;  %v1319_v26 = vld [vmem:[%s2484_s0 + $0xc8] sm:$0xff]  ;;  %v147_v29 = vsel %vm99_vm0, %v1312_v22, 0.0 }
  0x10   :  { %715 = vmatpush.msra.mxu0 %v693_v23  ;;  %2525 = vst [vmem:[#allocation8_spill] sm:$0xff] %v1277_v0 }
  0x11   :  { %v114_v37 = vadd.f32 %v113_v30, %v112_v33  ;;  %2526 = vst [vmem:[#allocation9_spill] sm:$0xff] %v1284_v3  ;;  %v1326_v30 = vld [vmem:[%s2484_s0 + $0xd0] sm:$0xff]  ;;  %v149_v33 = vsel %vm99_vm0, %v1319_v26, 0.0 }
  0x12   :  { %716 = vmatpush.msra.mxu0 %v692_v27  ;;  %2527 = vst [vmem:[#allocation10_spill] sm:$0xff] %v1291_v10 }
  0x13   :  { %v116_v41 = vadd.f32 %v115_v34, %v114_v37  ;;  %2528 = vst [vmem:[#allocation11_spill] sm:$0xff] %v1298_v14  ;;  %v1333_v34 = vld [vmem:[%s2484_s0 + $0xd8] sm:$0xff]  ;;  %v151_v37 = vsel %vm99_vm0, %v1326_v30, 0.0 }
  0x14   :  { %717 = vmatpush.msra.mxu0 %v691_v31  ;;  %2529 = vst [vmem:[#allocation12_spill] sm:$0xff] %v1305_v18 }
  0x15   :  { %v118_v44 = vadd.f32 %v117_v38, %v116_v41  ;;  %2530 = vst [vmem:[#allocation13_spill] sm:$0xff] %v1312_v22  ;;  %v1340_v38 = vld [vmem:[%s2484_s0 + $0xe0] sm:$0xff]  ;;  %v153_v41 = vsel %vm99_vm0, %v1333_v34, 0.0 }
  0x16   :  { %718 = vmatpush.msra.mxu0 %v690_v35  ;;  %2531 = vst [vmem:[#allocation14_spill] sm:$0xff] %v1319_v26 }
  0x17   :  { %v120_v47 = vadd.f32 %v119_v42, %v118_v44  ;;  %2532 = vst [vmem:[#allocation15_spill] sm:$0xff] %v1326_v30  ;;  %v1347_v42 = vld [vmem:[%s2484_s0 + $0xe8] sm:$0xff] }
  0x18   :  { %719 = vmatpush.msra.mxu0 %v689_v39  ;;  %2533 = vst [vmem:[#allocation16_spill] sm:$0xff] %v1333_v34 }
  0x19   :  { %v122_v50 = vadd.f32 %v121_v45, %v120_v47  ;;  %2534 = vst [vmem:[#allocation17_spill] sm:$0xff] %v1340_v38  ;;  %v228_v45 = vmul.f32 %v1122_v4, %v1122_v4  ;;  %v229_v47 = vmul.f32 %v1127_v5, %v1127_v5 }
  0x1a   :  { %2535 = vst [vmem:[#allocation18_spill] sm:$0xff] %v1347_v42 }
  0x1b   :  { %v124_v53 = vadd.f32 %v123_v48, %v122_v50  ;;  %v155_v48 = vsel %vm99_vm0, %v1340_v38, 0.0  ;;  %v1358_v50 = vld [vmem:[%s2484_s0 + $0xf0] sm:$0xff] }
  0x1c   :  { %2536 = vst [vmem:[#allocation19_spill] sm:$0xff] %v1358_v50 }
  0x1d   :  { %v126_v56 = vadd.f32 %v125_v51, %v124_v53  ;;  %v230_v53 = vmul.f32 %v1132_v6, %v1132_v6 }
  0x1f   :  { %v128_v59 = vadd.f32 %v127_v54, %v126_v56  ;;  %v292_v54 = vsel %vm99_vm0, %v228_v45, 0.0  ;;  %v157_v56 = vsel %vm99_vm0, %v1347_v42, 0.0 }
  0x21   :  { %v130_v62 = vadd.f32 %v129_v57, %v128_v59  ;;  %v293_v57 = vsel %vm99_vm0, %v229_v47, 0.0  ;;  %v1369_v59 = vld [vmem:[%s2484_s0 + $0xf8] sm:$0xff]  ;;  %v235_v47 = vmul.f32 %v1181_v24, %v1181_v24 }
  0x22   :  { %2537 = vst [vmem:[#allocation20_spill] sm:$0xff] %v1369_v59 }
  0x23   :  { %v132_v1 = vadd.f32 %v131_v60, %v130_v62  ;;  %v231_v62 = vmul.f32 %v1137_v7, %v1137_v7 }
  0x25   :  { %v134_v8 = vadd.f32 %v133_v63, %v132_v1  ;;  %v294_v63 = vadd.f32 %v293_v57, %v292_v54  ;;  %v159_v1 = vsel %vm99_vm0, %v1358_v50, 0.0  ;;  %v1419_v54 = vld [vmem:[%s2484_s0 + $0x120] sm:$0xff]  ;;  %v236_v57 = vmul.f32 %v1191_v28, %v1191_v28 }
  0x27   :  { %v136_v11 = vadd.f32 %v135_v2, %v134_v8  ;;  %v295_v2 = vsel %vm99_vm0, %v230_v53, 0.0  ;;  %v1379_v8 = vld [vmem:[%s2484_s0 + $0x100] sm:$0xff] }
  0x29   :  { %v138_v15 = vadd.f32 %v137_v9, %v136_v11  ;;  %v232_v11 = vmul.f32 %v1151_v12, %v1151_v12 }
  0x2b   :  { %v140_v19 = vadd.f32 %v139_v13, %v138_v15  ;;  %v296_v13 = vadd.f32 %v295_v2, %v294_v63  ;;  %v161_v15 = vsel %vm99_vm0, %v1369_v59, 0.0  ;;  %v305_v63 = vsel %vm99_vm0, %v235_v47, 0.0  ;;  %v1459_v47 = vld [vmem:[%s2484_s0 + $0x140] sm:$0xff] }
  0x2d   :  { %v142_v23 = vadd.f32 %v141_v17, %v140_v19  ;;  %v297_v17 = vsel %vm99_vm0, %v231_v62, 0.0  ;;  %v1389_v19 = vld [vmem:[%s2484_s0 + $0x108] sm:$0xff] }
  0x2f   :  { %v144_v27 = vadd.f32 %v143_v21, %v142_v23  ;;  %v233_v23 = vmul.f32 %v1161_v16, %v1161_v16 }
  0x31   :  { %v146_v31 = vadd.f32 %v145_v25, %v144_v27  ;;  %v298_v25 = vadd.f32 %v297_v17, %v296_v13  ;;  %v163_v27 = vsel %vm99_vm0, %v1379_v8, 0.0  ;;  %v171_v13 = vsel %vm99_vm0, %v1419_v54, 0.0  ;;  %v1439_v17 = vld [vmem:[%s2484_s0 + $0x130] sm:$0xff] }
  0x33   :  { %v148_v35 = vadd.f32 %v147_v29, %v146_v31  ;;  %v299_v29 = vsel %vm99_vm0, %v232_v11, 0.0  ;;  %v1399_v31 = vld [vmem:[%s2484_s0 + $0x110] sm:$0xff] }
  0x35   :  { %v150_v39 = vadd.f32 %v149_v33, %v148_v35  ;;  %v234_v35 = vmul.f32 %v1171_v20, %v1171_v20 }
  0x37   :  { %v152_v44 = vadd.f32 %v151_v37, %v150_v39  ;;  %v300_v37 = vadd.f32 %v299_v29, %v298_v25  ;;  %v165_v39 = vsel %vm99_vm0, %v1389_v19, 0.0  ;;  %v303_v53 = vsel %vm99_vm0, %v234_v35, 0.0 }
  0x39   :  { %v154_v51 = vadd.f32 %v153_v41, %v152_v44  ;;  %v301_v41 = vsel %vm99_vm0, %v233_v23, 0.0  ;;  %v1409_v44 = vld [vmem:[%s2484_s0 + $0x118] sm:$0xff]  ;;  %v238_v23 = vmul.f32 %v1211_v36, %v1211_v36 }
  0x3a   :  { %v169_v62 = vsel %vm99_vm0, %v1409_v44, 0.0 }
  0x3b   :  { %v156_v60 = vadd.f32 %v155_v48, %v154_v51  ;;  %v302_v48 = vadd.f32 %v301_v41, %v300_v37  ;;  %v167_v51 = vsel %vm99_vm0, %v1399_v31, 0.0  ;;  %v239_v37 = vmul.f32 %v1221_v40, %v1221_v40 }
  0x3c   :  { %v175_v41 = vsel %vm99_vm0, %v1439_v17, 0.0 }
  0x3d   :  { %v158_v9 = vadd.f32 %v157_v56, %v156_v60  ;;  %v304_v60 = vadd.f32 %v303_v53, %v302_v48 }
  0x3f   :  { %v160_v21 = vadd.f32 %v159_v1, %v158_v9  ;;  %v1429_v1 = vld [vmem:[%s2484_s0 + $0x128] sm:$0xff]  ;;  %v237_v9 = vmul.f32 %v1201_v32, %v1201_v32  ;;  %v306_v11 = vadd.f32 %v305_v63, %v304_v60  ;;  %v241_v63 = vmul.f32 %v1235_v46, %v1235_v46 }
  0x40   :  { %v1469_v60 = vld [vmem:[%s2484_s0 + $0x148] sm:$0xff] }
  0x41   :  { %v162_v33 = vadd.f32 %v161_v15, %v160_v21  ;;  %v307_v15 = vsel %vm99_vm0, %v236_v57, 0.0  ;;  %v309_v29 = vsel %vm99_vm0, %v237_v9, 0.0  ;;  %v313_v57 = vsel %vm99_vm0, %v239_v37, 0.0 }
  0x42   :  { %v308_v25 = vadd.f32 %v307_v15, %v306_v11  ;;  %v179_v9 = vsel %vm99_vm0, %v1459_v47, 0.0  ;;  %v243_v37 = vmul.f32 %v1249_v52, %v1249_v52  ;;  %v260_v52 = vmul.f32 %v1379_v8, %v1379_v8 }
  0x43   :  { %v164_v45 = vadd.f32 %v163_v27, %v162_v33  ;;  %v173_v27 = vsel %vm99_vm0, %v1429_v1, 0.0  ;;  %v1449_v33 = vld [vmem:[%s2484_s0 + $0x138] sm:$0xff] }
  0x45   :  { %v166_v56 = vadd.f32 %v165_v39, %v164_v45  ;;  %v310_v39 = vadd.f32 %v309_v29, %v308_v25  ;;  %v311_v45 = vsel %vm99_vm0, %v238_v23, 0.0  ;;  %v181_v25 = vsel %vm99_vm0, %v1469_v60, 0.0  ;;  %v1489_v29 = vld [vmem:[%s2484_s0 + $0x158] sm:$0xff] }
  0x47   :  { %v168_v2 = vadd.f32 %v167_v51, %v166_v56  ;;  %v240_v51 = vmul.f32 %v1228_v43, %v1228_v43  ;;  %v312_v53 = vadd.f32 %v311_v45, %v310_v39  ;;  %v177_v56 = vsel %vm99_vm0, %v1449_v33, 0.0 }
  0x49   :  { %v170_v21 = vadd.f32 %v169_v62, %v168_v2  ;;  %v314_v2 = vadd.f32 %v313_v57, %v312_v53  ;;  %v315_v11 = vsel %vm99_vm0, %v240_v51, 0.0  ;;  %v244_v53 = vmul.f32 %v1256_v55, %v1256_v55 }
  0x4a   :  { %v185_v57 = vsel %vm99_vm0, %v1489_v29, 0.0 }
  0x4b   :  { %v172_v35 = vadd.f32 %v171_v13, %v170_v21  ;;  %v1479_v13 = vld [vmem:[%s2484_s0 + $0x150] sm:$0xff]  ;;  %v242_v21 = vmul.f32 %v1242_v49, %v1242_v49  ;;  %v316_v23 = vadd.f32 %v315_v11, %v314_v2 }
  0x4d   :  { %v174_v48 = vadd.f32 %v173_v27, %v172_v35  ;;  %v317_v27 = vsel %vm99_vm0, %v241_v63, 0.0  ;;  %v319_v45 = vsel %vm99_vm0, %v242_v21, 0.0  ;;  %v1509_v63 = vld [vmem:[%s2484_s0 + $0x168] sm:$0xff]  ;;  %v323_v21 = vsel %vm99_vm0, %v244_v53, 0.0  ;;  %v1536_v53 = vld [vmem:[%s2484_s0 + $0x180] sm:$0xff] }
  0x4e   :  { %v318_v39 = vadd.f32 %v317_v27, %v316_v23  ;;  %v1519_v23 = vld [vmem:[%s2484_s0 + $0x170] sm:$0xff]  ;;  %v189_v27 = vsel %vm99_vm0, %v1509_v63, 0.0 }
  0x4f   :  { %v176_v62 = vadd.f32 %v175_v41, %v174_v48  ;;  %v183_v41 = vsel %vm99_vm0, %v1479_v13, 0.0  ;;  %v1499_v48 = vld [vmem:[%s2484_s0 + $0x160] sm:$0xff] }
  0x51   :  { %v178_v15 = vadd.f32 %v177_v56, %v176_v62  ;;  %v320_v56 = vadd.f32 %v319_v45, %v318_v39  ;;  %v321_v62 = vsel %vm99_vm0, %v243_v37, 0.0  ;;  %v1526_v37 = vld [vmem:[%s2484_s0 + $0x178] sm:$0xff] }
  0x53   :  { %v180_v35 = vadd.f32 %v179_v9, %v178_v15  ;;  %v245_v9 = vmul.f32 %v1263_v58, %v1263_v58  ;;  %v322_v11 = vadd.f32 %v321_v62, %v320_v56  ;;  %v187_v15 = vsel %vm99_vm0, %v1499_v48, 0.0 }
  0x55   :  { %v182_v51 = vadd.f32 %v181_v25, %v180_v35  ;;  %v324_v35 = vadd.f32 %v323_v21, %v322_v11  ;;  %v325_v45 = vsel %vm99_vm0, %v245_v9, 0.0  ;;  %v247_v9 = vmul.f32 %v1277_v0, %v1277_v0 }
  0x56   :  { %v195_v21 = vsel %vm99_vm0, %v1536_v53, 0.0 }
  0x57   :  { %v184_v2 = vadd.f32 %v183_v41, %v182_v51  ;;  %v246_v41 = vmul.f32 %v1270_v61, %v1270_v61  ;;  %v191_v51 = vsel %vm99_vm0, %v1519_v23, 0.0  ;;  %v326_v62 = vadd.f32 %v325_v45, %v324_v35  ;;  %v1560_v45 = vld [vmem:[%s2484_s0 + $0x198] sm:$0xff] }
  0x59   :  { %v186_v25 = vadd.f32 %v185_v57, %v184_v2  ;;  %v193_v57 = vsel %vm99_vm0, %v1526_v37, 0.0  ;;  %v1543_v2 = vld [vmem:[%s2484_s0 + $0x188] sm:$0xff] }
  0x5a   :  { %v197_v35 = vsel %vm99_vm0, %v1543_v2, 0.0 }
  0x5b   :  { %v188_v39 = vadd.f32 %v187_v15, %v186_v25  ;;  %v327_v15 = vsel %vm99_vm0, %v246_v41, 0.0  ;;  %v1553_v25 = vld [vmem:[%s2484_s0 + $0x190] sm:$0xff]  ;;  %v248_v41 = vmul.f32 %v1284_v3, %v1284_v3 }
  0x5c   :  { %v199_v0 = vsel %vm99_vm0, %v1553_v25, 0.0 }
  0x5d   :  { %v190_v56 = vadd.f32 %v189_v27, %v188_v39  ;;  %v328_v39 = vadd.f32 %v327_v15, %v326_v62  ;;  %v331_v3 = vsel %vm99_vm0, %v248_v41, 0.0  ;;  %v250_v41 = vmul.f32 %v1298_v14, %v1298_v14 }
  0x5e   :  { %v253_v14 = vmul.f32 %v1319_v26, %v1319_v26 }
  0x5f   :  { %v192_v11 = vadd.f32 %v191_v51, %v190_v56  ;;  %v329_v56 = vsel %vm99_vm0, %v247_v9, 0.0  ;;  %v249_v9 = vmul.f32 %v1291_v10, %v1291_v10  ;;  %v251_v10 = vmul.f32 %v1305_v18, %v1305_v18 }
  0x60   :  { %v330_v15 = vadd.f32 %v329_v56, %v328_v39  ;;  %v335_v55 = vsel %vm99_vm0, %v250_v41, 0.0 }
  0x61   :  { %v194_v27 = vadd.f32 %v193_v57, %v192_v11  ;;  %v1570_v57 = vld [vmem:[%s2484_s0 + $0x1a0] sm:$0xff]  ;;  %v201_v11 = vsel %vm99_vm0, %v1560_v45, 0.0  ;;  %v333_v58 = vsel %vm99_vm0, %v249_v9, 0.0  ;;  %v1615_v9 = vld [vmem:[%s2484_s0 + $0x1c8] sm:$0xff] }
  0x62   :  { %v203_v61 = vsel %vm99_vm0, %v1570_v57, 0.0  ;;  %v332_v56 = vadd.f32 %v331_v3, %v330_v15  ;;  %v1606_v3 = vld [vmem:[%s2484_s0 + $0x1c0] sm:$0xff]  ;;  %v213_v41 = vsel %vm99_vm0, %v1615_v9, 0.0 }
  0x63   :  { %v196_v51 = vadd.f32 %v195_v21, %v194_v27  ;;  %v1577_v21 = vld [vmem:[%s2484_s0 + $0x1a8] sm:$0xff] }
  0x65   :  { %v198_v62 = vadd.f32 %v197_v35, %v196_v51  ;;  %v1587_v35 = vld [vmem:[%s2484_s0 + $0x1b0] sm:$0xff]  ;;  %v205_v51 = vsel %vm99_vm0, %v1577_v21, 0.0 }
  0x67   :  { %v200_v27 = vadd.f32 %v199_v0, %v198_v62  ;;  %v1594_v0 = vld [vmem:[%s2484_s0 + $0x1b8] sm:$0xff] }
  0x69   :  { %v202_v39 = vadd.f32 %v201_v11, %v200_v27  ;;  %v207_v11 = vsel %vm99_vm0, %v1587_v35, 0.0  ;;  %v209_v27 = vsel %vm99_vm0, %v1594_v0, 0.0 }
  0x6b   :  { %v204_v62 = vadd.f32 %v203_v61, %v202_v39  ;;  %v252_v61 = vmul.f32 %v1312_v22, %v1312_v22  ;;  %v334_v39 = vadd.f32 %v333_v58, %v332_v56  ;;  %v1626_v58 = vld [vmem:[%s2484_s0 + $0x1d0] sm:$0xff] }
  0x6c   :  { %2538 = vst [vmem:[#allocation21_spill] sm:$0xff] %v1626_v58 }
  0x6d   :  { %v206_v15 = vadd.f32 %v205_v51, %v204_v62  ;;  %v337_v51 = vsel %vm99_vm0, %v251_v10, 0.0  ;;  %v211_v62 = vsel %vm99_vm0, %v1606_v3, 0.0  ;;  %v336_v22 = vadd.f32 %v335_v55, %v334_v39  ;;  %v1636_v10 = vld [vmem:[%s2484_s0 + $0x1d8] sm:$0xff] }
  0x6e   :  { %2539 = vst [vmem:[#allocation22_spill] sm:$0xff] %v1636_v10  ;;  %v255_v39 = vmul.f32 %v1333_v34, %v1333_v34 }
  0x6f   :  { %v208_v18 = vadd.f32 %v207_v11, %v206_v15  ;;  %v254_v11 = vmul.f32 %v1326_v30, %v1326_v30  ;;  %v339_v15 = vsel %vm99_vm0, %v252_v61, 0.0  ;;  %v338_v26 = vadd.f32 %v337_v51, %v336_v22  ;;  %v1646_v61 = vld [vmem:[%s2484_s0 + $0x1e0] sm:$0xff] }
  0x70   :  { %2540 = vst [vmem:[#allocation23_spill] sm:$0xff] %v1646_v61  ;;  %v256_v51 = vmul.f32 %v1340_v38, %v1340_v38 }
  0x71   :  { %v210_v56 = vadd.f32 %v209_v27, %v208_v18  ;;  %v341_v18 = vsel %vm99_vm0, %v253_v14, 0.0  ;;  %v215_v27 = vsel %vm99_vm0, %v1626_v58, 0.0  ;;  %v340_v30 = vadd.f32 %v339_v15, %v338_v26  ;;  %v1656_v14 = vld [vmem:[%s2484_s0 + $0x1e8] sm:$0xff] }
  0x72   :  { %2541 = vst [vmem:[#allocation24_spill] sm:$0xff] %v1656_v14  ;;  %v257_v15 = vmul.f32 %v1347_v42, %v1347_v42 }
  0x73   :  { %v212_v55 = vadd.f32 %v211_v62, %v210_v56  ;;  %v343_v62 = vsel %vm99_vm0, %v254_v11, 0.0  ;;  %v217_v56 = vsel %vm99_vm0, %v1636_v10, 0.0  ;;  %v342_v34 = vadd.f32 %v341_v18, %v340_v30  ;;  %v1666_v11 = vld [vmem:[%s2484_s0 + $0x1f0] sm:$0xff] }
  0x74   :  { %2542 = vst [vmem:[#allocation25_spill] sm:$0xff] %v1666_v11  ;;  %v258_v18 = vmul.f32 %v1358_v50, %v1358_v50 }
  0x75   :  { %v214_v22 = vadd.f32 %v213_v41, %v212_v55  ;;  %v345_v41 = vsel %vm99_vm0, %v255_v39, 0.0  ;;  %v219_v55 = vsel %vm99_vm0, %v1646_v61, 0.0  ;;  %v344_v38 = vadd.f32 %v343_v62, %v342_v34  ;;  %v1676_v39 = vld [vmem:[%s2484_s0 + $0x1f8] sm:$0xff] }
  0x76   :  { %2543 = vst [vmem:[#allocation26_spill] sm:$0xff] %v1676_v39  ;;  %v259_v62 = vmul.f32 %v1369_v59, %v1369_v59 }
  0x77   :  { %v216_v26 = vadd.f32 %v215_v27, %v214_v22  ;;  %v347_v27 = vsel %vm99_vm0, %v256_v51, 0.0  ;;  %v221_v22 = vsel %vm99_vm0, %v1656_v14, 0.0  ;;  %v346_v42 = vadd.f32 %v345_v41, %v344_v38 }
  0x78   :  { %v351_v38 = vsel %vm99_vm0, %v258_v18, 0.0  ;;  %v225_v41 = vsel %vm99_vm0, %v1676_v39, 0.0 }
  0x79   :  { %v218_v30 = vadd.f32 %v217_v56, %v216_v26  ;;  %v349_v56 = vsel %vm99_vm0, %v257_v15, 0.0  ;;  %v223_v26 = vsel %vm99_vm0, %v1666_v11, 0.0  ;;  %v348_v50 = vadd.f32 %v347_v27, %v346_v42 }
  0x7a   :  { %v353_v15 = vsel %vm99_vm0, %v259_v62, 0.0  ;;  %v262_v42 = vmul.f32 %v1399_v31, %v1399_v31  ;;  %v355_v27 = vsel %vm99_vm0, %v260_v52, 0.0  ;;  %v265_v52 = vmul.f32 %v1429_v1, %v1429_v1 }
  0x7b   :  { %v220_v34 = vadd.f32 %v219_v55, %v218_v30  ;;  %v350_v49 = vadd.f32 %v349_v56, %v348_v50  ;;  %v261_v30 = vmul.f32 %v1389_v19, %v1389_v19  ;;  %v263_v50 = vmul.f32 %v1409_v44, %v1409_v44 }
  0x7c   :  { %v359_v62 = vsel %vm99_vm0, %v262_v42, 0.0 }
  0x7d   :  { %v222_v51 = vadd.f32 %v221_v22, %v220_v34  ;;  %v352_v59 = vadd.f32 %v351_v38, %v350_v49  ;;  %v357_v34 = vsel %vm99_vm0, %v261_v30, 0.0  ;;  %v264_v49 = vmul.f32 %v1419_v54, %v1419_v54 }
  0x7e   :  { %v266_v38 = vmul.f32 %v1439_v17, %v1439_v17  ;;  %v267_v30 = vmul.f32 %v1449_v33, %v1449_v33 }
  0x7f   :  { %v224_v55 = vadd.f32 %v223_v26, %v222_v51  ;;  %v354_v22 = vadd.f32 %v353_v15, %v352_v59  ;;  %v361_v59 = vsel %vm99_vm0, %v263_v50, 0.0  ;;  %v365_v15 = vsel %vm99_vm0, %v265_v52, 0.0 }
  0x80   :  { %v269_v50 = vmul.f32 %v1469_v60, %v1469_v60  ;;  %v271_v52 = vmul.f32 %v1489_v29, %v1489_v29 }
  0x81   :  { %v1691_v46 = vadd.f32 %v225_v41, %v224_v55  ;;  %v356_v56 = vadd.f32 %v355_v27, %v354_v22  ;;  %v363_v41 = vsel %vm99_vm0, %v264_v49, 0.0  ;;  %v268_v27 = vmul.f32 %v1459_v47, %v1459_v47 }
  0x82   :  { %v367_v22 = vsel %vm99_vm0, %v266_v38, 0.0  ;;  %v270_v49 = vmul.f32 %v1479_v13, %v1479_v13  ;;  %v272_v38 = vmul.f32 %v1499_v48, %v1499_v48 }
  0x83   :  { %v1697_v18 = vmul.f32 0.015625, %v1691_v46  ;;  %v358_v26 = vadd.f32 %v357_v34, %v356_v56  ;;  %v369_v56 = vsel %vm99_vm0, %v267_v30, 0.0  ;;  %v273_v30 = vmul.f32 %v1509_v63, %v1509_v63 }
  0x85   :  { %979 = vmatmul.msk.f32.vlgmr.msra.gmra.mxu0 %vm99_vm0, %v1697_v18  ;;  %v360_v51 = vadd.f32 %v359_v62, %v358_v26  ;;  %v371_v26 = vsel %vm99_vm0, %v268_v27, 0.0  ;;  %v274_v27 = vmul.f32 %v1519_v23, %v1519_v23 }
  0x87   :  { %v362_v55 = vadd.f32 %v361_v59, %v360_v51  ;;  %v373_v51 = vsel %vm99_vm0, %v269_v50, 0.0  ;;  %v275_v50 = vmul.f32 %v1526_v37, %v1526_v37 }
  0x89   :  { %v364_v42 = vadd.f32 %v363_v41, %v362_v55  ;;  %v375_v55 = vsel %vm99_vm0, %v270_v49, 0.0  ;;  %v276_v49 = vmul.f32 %v1536_v53, %v1536_v53 }
  0x8b   :  { %v366_v34 = vadd.f32 %v365_v15, %v364_v42  ;;  %v377_v42 = vsel %vm99_vm0, %v271_v52, 0.0  ;;  %v277_v52 = vmul.f32 %v1543_v2, %v1543_v2 }
  0x8d   :  { %v368_v62 = vadd.f32 %v367_v22, %v366_v34  ;;  %v379_v34 = vsel %vm99_vm0, %v272_v38, 0.0  ;;  %v278_v38 = vmul.f32 %v1553_v25, %v1553_v25 }
  0x8f   :  { %v370_v59 = vadd.f32 %v369_v56, %v368_v62  ;;  %v381_v62 = vsel %vm99_vm0, %v273_v30, 0.0  ;;  %v279_v30 = vmul.f32 %v1560_v45, %v1560_v45 }
  0x91   :  { %v372_v41 = vadd.f32 %v371_v26, %v370_v59  ;;  %v383_v59 = vsel %vm99_vm0, %v274_v27, 0.0  ;;  %v280_v27 = vmul.f32 %v1570_v57, %v1570_v57 }
  0x93   :  { %v374_v15 = vadd.f32 %v373_v51, %v372_v41  ;;  %v385_v41 = vsel %vm99_vm0, %v275_v50, 0.0  ;;  %v772_v50 = vld [vmem:[%s2486_s4 + $0x58] sm:$0xff] }
  0x94   :  { %780 = vmatpush.msra.mxu2 %v772_v50 }
  0x95   :  { %v376_v22 = vadd.f32 %v375_v55, %v374_v15  ;;  %v387_v15 = vsel %vm99_vm0, %v276_v49, 0.0  ;;  %v281_v49 = vmul.f32 %v1577_v21, %v1577_v21 }
  0x97   :  { %v378_v56 = vadd.f32 %v377_v42, %v376_v22  ;;  %v389_v22 = vsel %vm99_vm0, %v277_v52, 0.0  ;;  %v771_v52 = vld [vmem:[%s2486_s4 + $0x50] sm:$0xff]  ;;  %v397_v50 = vsel %vm99_vm0, %v281_v49, 0.0  ;;  %v804_v49 = vld [vmem:[%s2487_s5 + $0x38] sm:$0xff] }
  0x98   :  { %781 = vmatpush.msra.mxu2 %v771_v52 }
  0x99   :  { %v380_v26 = vadd.f32 %v379_v34, %v378_v56  ;;  %v391_v56 = vsel %vm99_vm0, %v278_v38, 0.0  ;;  %v282_v38 = vmul.f32 %v1587_v35, %v1587_v35 }
  0x9b   :  { %v382_v51 = vadd.f32 %v381_v62, %v380_v26  ;;  %v808_v26 = vld [vmem:[%s2487_s5 + $0x58] sm:$0xff] }
  0x9c   :  { %816 = vmatpush.msra.mxu3 %v808_v26  ;;  %v286_v26 = vmul.f32 %v1626_v58, %v1626_v58  ;;  %v803_v58 = vld [vmem:[%s2487_s5 + $0x30] sm:$0xff] }
  0x9d   :  { %v384_v55 = vadd.f32 %v383_v59, %v382_v51  ;;  %v393_v59 = vsel %vm99_vm0, %v279_v30, 0.0 }
  0x9f   :  { %v386_v42 = vadd.f32 %v385_v41, %v384_v55  ;;  %v807_v41 = vld [vmem:[%s2487_s5 + $0x50] sm:$0xff]  ;;  %v770_v55 = vld [vmem:[%s2486_s4 + $0x48] sm:$0xff] }
  0xa0   :  { %817 = vmatpush.msra.mxu3 %v807_v41  ;;  %782 = vmatpush.msra.mxu2 %v770_v55  ;;  %v768_v41 = vld [vmem:[%s2486_s4 + $0x38] sm:$0xff]  ;;  %v289_v55 = vmul.f32 %v1656_v14, %v1656_v14 }
  0xa1   :  { %v388_v34 = vadd.f32 %v387_v15, %v386_v42  ;;  %v395_v15 = vsel %vm99_vm0, %v280_v27, 0.0  ;;  %v806_v42 = vld [vmem:[%s2487_s5 + $0x48] sm:$0xff]  ;;  %v284_v27 = vmul.f32 %v1606_v3, %v1606_v3 }
  0xa2   :  { %818 = vmatpush.msra.mxu3 %v806_v42  ;;  %v290_v42 = vmul.f32 %v1666_v11, %v1666_v11 }
  0xa3   :  { %v390_v62 = vadd.f32 %v389_v22, %v388_v34  ;;  %v769_v22 = vld [vmem:[%s2486_s4 + $0x40] sm:$0xff]  ;;  %v403_v11 = vsel %vm99_vm0, %v284_v27, 0.0  ;;  %v736_v27 = vld [vmem:[%s2488_s3 + $0x58] sm:$0xff] }
  0xa4   :  { %v805_v34 = vld [vmem:[%s2487_s5 + $0x40] sm:$0xff]  ;;  %783 = vmatpush.msra.mxu2 %v769_v22  ;;  %v407_v22 = vsel %vm99_vm0, %v286_v26, 0.0  ;;  %v1840_v26 = vsel %vm99_vm0, %v290_v42, 0.0  ;;  %741 = vmatpush.msra.mxu1 %v736_v27  ;;  %v445_v27 = vsel %vm99_vm0, %v1181_v24, -inf  ;;  %v842_v24 = vld [vmem:[%s2489_s6 + $0x48] sm:$0xff] }
  0xa5   :  { %v392_v51 = vadd.f32 %v391_v56, %v390_v62  ;;  %v283_v56 = vmul.f32 %v1594_v0, %v1594_v0  ;;  %v285_v62 = vmul.f32 %v1615_v9, %v1615_v9  ;;  %819 = vmatpush.msra.mxu3 %v805_v34 }
  0xa6   :  { %784 = vmatpush.msra.mxu2 %v768_v41 }
  0xa7   :  { %v394_v30 = vadd.f32 %v393_v59, %v392_v51  ;;  %v287_v59 = vmul.f32 %v1636_v10, %v1636_v10  ;;  %v288_v51 = vmul.f32 %v1646_v61, %v1646_v61  ;;  %v291_v10 = vmul.f32 %v1676_v39, %v1676_v39  ;;  %820 = vmatpush.msra.mxu3 %v804_v49  ;;  %v801_v49 = vld [vmem:[%s2487_s5 + $0x20] sm:$0xff] }
  0xa8   :  { %v399_v61 = vsel %vm99_vm0, %v282_v38, 0.0  ;;  %v401_v14 = vsel %vm99_vm0, %v283_v56, 0.0  ;;  %v405_v38 = vsel %vm99_vm0, %v285_v62, 0.0  ;;  %v802_v56 = vld [vmem:[%s2487_s5 + $0x28] sm:$0xff]  ;;  %v1837_v62 = vsel %vm99_vm0, %v289_v55, 0.0 }
  0xa9   :  { %v396_v52 = vadd.f32 %v395_v15, %v394_v30  ;;  %v767_v30 = vld [vmem:[%s2486_s4 + $0x30] sm:$0xff]  ;;  %v1822_v34 = vsel %vm99_vm0, %v287_v59, 0.0  ;;  %v1843_v59 = vsel %vm99_vm0, %v291_v10, 0.0  ;;  %821 = vmatpush.msra.mxu3 %v803_v58  ;;  %v435_v10 = vsel %vm99_vm0, %v1122_v4, -inf  ;;  %v844_v4 = vld [vmem:[%s2489_s6 + $0x58] sm:$0xff] }
  0xaa   :  { %785 = vmatpush.msra.mxu2 %v767_v30  ;;  %v436_v58 = vsel %vm99_vm0, %v1127_v5, -inf  ;;  %v437_v55 = vsel %vm99_vm0, %v1132_v6, -inf  ;;  %v438_v5 = vsel %vm99_vm0, %v1137_v7, -inf  ;;  %v439_v6 = vsel %vm99_vm0, %v1151_v12, -inf  ;;  %v800_v30 = vld [vmem:[%s2487_s5 + $0x18] sm:$0xff]  ;;  %852 = vmatpush.msrb.mxu0 %v844_v4  ;;  %v843_v7 = vld [vmem:[%s2489_s6 + $0x50] sm:$0xff] }
  0xab   :  { %v398_v15 = vadd.f32 %v397_v50, %v396_v52  ;;  %v766_v50 = vld [vmem:[%s2486_s4 + $0x28] sm:$0xff]  ;;  %v735_v52 = vld [vmem:[%s2488_s3 + $0x50] sm:$0xff]  ;;  %822 = vmatpush.msra.mxu3 %v802_v56  ;;  %v453_v4 = vsel %vm99_vm0, %v1221_v40, -inf }
  0xac   :  { %786 = vmatpush.msra.mxu2 %v766_v50  ;;  %742 = vmatpush.msra.mxu1 %v735_v52  ;;  %v440_v50 = vmax.f32 %v435_v10, %v439_v6  ;;  %v447_v52 = vsel %vm99_vm0, %v1191_v28, -inf  ;;  %v731_v40 = vld [vmem:[%s2488_s3 + $0x30] sm:$0xff] }
  0xad   :  { %v400_v39 = vadd.f32 %v399_v61, %v398_v15  ;;  %v1834_v61 = vsel %vm99_vm0, %v288_v51, 0.0  ;;  %v765_v51 = vld [vmem:[%s2486_s4 + $0x20] sm:$0xff]  ;;  %v764_v15 = vld [vmem:[%s2486_s4 + $0x18] sm:$0xff]  ;;  %823 = vmatpush.msra.mxu3 %v801_v49  ;;  %853 = vmatpush.msrb.mxu0 %v843_v7  ;;  %v446_v49 = vmax.f32 %v438_v5, %v445_v27  ;;  %v455_v5 = vsel %vm99_vm0, %v1228_v43, -inf }
  0xae   :  { %787 = vmatpush.msra.mxu2 %v765_v51  ;;  %v799_v51 = vld [vmem:[%s2487_s5 + $0x10] sm:$0xff]  ;;  %v448_v28 = vmax.f32 %v440_v50, %v447_v52  ;;  %v840_v43 = vld [vmem:[%s2489_s6 + $0x38] sm:$0xff]  ;;  %v2545_v50 = vld [vmem:[#allocation3_spill] sm:$0xff] }
  0xaf   :  { %v402_v41 = vadd.f32 %v401_v14, %v400_v39  ;;  %v1862_v14 = vmul.f32 %v1697_v18, %v1691_v46  ;;  %v734_v39 = vld [vmem:[%s2488_s3 + $0x48] sm:$0xff]  ;;  %v441_v46 = vsel %vm99_vm0, %v1161_v16, -inf  ;;  %v443_v16 = vsel %vm99_vm0, %v1171_v20, -inf  ;;  %v763_v20 = vld [vmem:[%s2486_s4 + $0x10] sm:$0xff]  ;;  %824 = vmatpush.msra.mxu3 %v800_v30  ;;  %854 = vmatpush.msrb.mxu0 %v842_v24  ;;  %v2544_v30 = vld [vmem:[#allocation2_spill] sm:$0xff] }
  0xb0   :  { %v442_v12 = vmax.f32 %v436_v58, %v441_v46  ;;  %v444_v56 = vmax.f32 %v437_v55, %v443_v16  ;;  %743 = vmatpush.msra.mxu1 %v734_v39  ;;  %788 = vmatpush.msra.mxu2 %v764_v15  ;;  %v841_v58 = vld [vmem:[%s2489_s6 + $0x40] sm:$0xff]  ;;  %v798_v46 = vld [vmem:[%s2487_s5 + $0x8] sm:$0xff]  ;;  %v456_v15 = vmax.f32 %v448_v28, %v455_v5  ;;  %v457_v7 = vsel %vm99_vm0, %v2544_v30, -inf  ;;  %v2546_v16 = vld [vmem:[#allocation4_spill] sm:$0xff] }
  0xb1   :  { %v404_v42 = vadd.f32 %v403_v11, %v402_v41  ;;  %v733_v11 = vld [vmem:[%s2488_s3 + $0x40] sm:$0xff]  ;;  %v449_v41 = vsel %vm99_vm0, %v1201_v32, -inf  ;;  %v451_v32 = vsel %vm99_vm0, %v1211_v36, -inf  ;;  %v762_v36 = vld [vmem:[%s2486_s4 + $0x8] sm:$0xff]  ;;  %825 = vmatpush.msra.mxu3 %v799_v51  ;;  %855 = vmatpush.msrb.mxu0 %v841_v58  ;;  %v931_v28 = vld [vmem:[%s2490_s9 + $0xf8] sm:$0xff] }
  0xb2   :  { %v450_v55 = vmax.f32 %v442_v12, %v449_v41  ;;  %v452_v39 = vmax.f32 %v444_v56, %v451_v32  ;;  %744 = vmatpush.msra.mxu1 %v733_v11  ;;  %789 = vmatpush.msra.mxu2 %v763_v20  ;;  %v459_v12 = vsel %vm99_vm0, %v2545_v50, -inf  ;;  %v461_v11 = vsel %vm99_vm0, %v2546_v16, -inf  ;;  %v2547_v56 = vld [vmem:[#allocation5_spill] sm:$0xff]  ;;  %v761_v41 = vld [vmem:[%s2486_s4] sm:$0xff]  ;;  %v2550_v58 = vld [vmem:[#allocation8_spill] sm:$0xff] }
  0xb3   :  { %v406_v10 = vadd.f32 %v405_v38, %v404_v42  ;;  %v732_v38 = vld [vmem:[%s2488_s3 + $0x38] sm:$0xff]  ;;  %v454_v42 = vmax.f32 %v446_v49, %v453_v4  ;;  %v463_v27 = vsel %vm99_vm0, %v2547_v56, -inf  ;;  %v2548_v24 = vld [vmem:[#allocation6_spill] sm:$0xff]  ;;  %826 = vmatpush.msra.mxu3 %v798_v46  ;;  %v2549_v4 = vld [vmem:[#allocation7_spill] sm:$0xff]  ;;  %856 = vmatpush.msrb.mxu0 %v840_v43 }
  0xb4   :  { %745 = vmatpush.msra.mxu1 %v732_v38  ;;  %v460_v20 = vmax.f32 %v452_v39, %v459_v12  ;;  %v465_v49 = vsel %vm99_vm0, %v2548_v24, -inf  ;;  %790 = vmatpush.msra.mxu2 %v762_v36  ;;  %v464_v32 = vmax.f32 %v456_v15, %v463_v27  ;;  %v467_v38 = vsel %vm99_vm0, %v2549_v4, -inf  ;;  %v839_v36 = vld [vmem:[%s2489_s6 + $0x30] sm:$0xff]  ;;  %v2551_v15 = vld [vmem:[#allocation9_spill] sm:$0xff]  ;;  %v2552_v43 = vld [vmem:[#allocation10_spill] sm:$0xff] }
  0xb5   :  { %v408_v6 = vadd.f32 %v407_v22, %v406_v10  ;;  %v458_v22 = vmax.f32 %v450_v55, %v457_v7  ;;  %v797_v10 = vld [vmem:[%s2487_s5] sm:$0xff]  ;;  %v462_v51 = vmax.f32 %v454_v42, %v461_v11  ;;  %v469_v39 = vsel %vm99_vm0, %v2550_v58, -inf  ;;  %v930_v7 = vld [vmem:[%s2490_s9 + $0xf0] sm:$0xff]  ;;  %v2553_v50 = vld [vmem:[#allocation11_spill] sm:$0xff]  ;;  %857 = vmatpush.msrb.mxu0 %v839_v36 }
  0xb6   :  { %746 = vmatpush.msra.mxu1 %v731_v40  ;;  %v468_v46 = vmax.f32 %v460_v20, %v467_v38  ;;  %v471_v30 = vsel %vm99_vm0, %v2551_v15, -inf  ;;  %791 = vmatpush.msra.mxu2 %v761_v41  ;;  %v475_v12 = vsel %vm99_vm0, %v2553_v50, -inf  ;;  %v2554_v16 = vld [vmem:[#allocation12_spill] sm:$0xff]  ;;  %v729_v27 = vld [vmem:[%s2488_s3 + $0x20] sm:$0xff]  ;;  %v2555_v20 = vld [vmem:[#allocation13_spill] sm:$0xff] }
  0xb7   :  { %v410_v52 = vadd.f32 %v1822_v34, %v408_v6  ;;  %v915_v34 = vld [vmem:[%s2490_s9 + $0x78] sm:$0xff]  ;;  %v466_v55 = vmax.f32 %v458_v22, %v465_v49  ;;  %v730_v6 = vld [vmem:[%s2488_s3 + $0x28] sm:$0xff]  ;;  %v470_v42 = vmax.f32 %v462_v51, %v469_v39  ;;  %827 = vmatpush.msra.mxu3 %v797_v10  ;;  %v472_v40 = vmax.f32 %v464_v32, %v471_v30  ;;  %v837_v39 = vld [vmem:[%s2489_s6 + $0x20] sm:$0xff] }
  0xb8   :  { %v473_v22 = vsel %vm99_vm0, %v2552_v43, -inf  ;;  %v477_v11 = vsel %vm99_vm0, %v2554_v16, -inf  ;;  %932 = vmatpush.msrb.mxu2 %v915_v34  ;;  %v476_v10 = vmax.f32 %v468_v46, %v475_v12  ;;  %v479_v51 = vsel %vm99_vm0, %v2555_v20, -inf  ;;  %v913_v24 = vld [vmem:[%s2490_s9 + $0x68] sm:$0xff]  ;;  %747 = vmatpush.msra.mxu1 %v730_v6  ;;  %v728_v58 = vld [vmem:[%s2488_s3 + $0x18] sm:$0xff]  ;;  %v2558_v36 = vld [vmem:[#allocation16_spill] sm:$0xff] }
  0xb9   :  { %v412_v5 = vadd.f32 %v1834_v61, %v410_v52  ;;  %v914_v61 = vld [vmem:[%s2490_s9 + $0x70] sm:$0xff]  ;;  %952 = vmatpush.msrb.mxu3 %v931_v28  ;;  %v838_v52 = vld [vmem:[%s2489_s6 + $0x28] sm:$0xff]  ;;  %v474_v41 = vmax.f32 %v466_v55, %v473_v22  ;;  %v478_v49 = vmax.f32 %v470_v42, %v477_v11  ;;  %v480_v34 = vmax.f32 %v472_v40, %v479_v51  ;;  %v2556_v28 = vld [vmem:[#allocation14_spill] sm:$0xff] }
  0xba   :  { %v481_v32 = vsel %vm99_vm0, %v2556_v28, -inf  ;;  %v2557_v55 = vld [vmem:[#allocation15_spill] sm:$0xff]  ;;  %933 = vmatpush.msrb.mxu2 %v914_v61  ;;  %v485_v46 = vsel %vm99_vm0, %v2558_v36, -inf  ;;  %v912_v42 = vld [vmem:[%s2490_s9 + $0x60] sm:$0xff]  ;;  %748 = vmatpush.msra.mxu1 %v729_v27  ;;  %v2559_v30 = vld [vmem:[#allocation17_spill] sm:$0xff]  ;;  %v495_v51 = vsel %vm99_vm0, %v1379_v8, -inf }
  0xbb   :  { %v414_v56 = vadd.f32 %v1837_v62, %v412_v5  ;;  %v929_v62 = vld [vmem:[%s2490_s9 + $0xe8] sm:$0xff]  ;;  %v483_v4 = vsel %vm99_vm0, %v2557_v55, -inf  ;;  %953 = vmatpush.msrb.mxu3 %v930_v7  ;;  %v482_v5 = vmax.f32 %v474_v41, %v481_v32  ;;  %858 = vmatpush.msrb.mxu0 %v838_v52  ;;  %v486_v15 = vmax.f32 %v478_v49, %v485_v46  ;;  %v2560_v7 = vld [vmem:[#allocation18_spill] sm:$0xff]  ;;  %v727_v12 = vld [vmem:[%s2488_s3 + $0x10] sm:$0xff] }
  0xbc   :  { %v484_v6 = vmax.f32 %v476_v10, %v483_v4  ;;  %v487_v61 = vsel %vm99_vm0, %v2559_v30, -inf  ;;  %v489_v40 = vsel %vm99_vm0, %v2560_v7, -inf  ;;  %v2561_v43 = vld [vmem:[#allocation19_spill] sm:$0xff]  ;;  %934 = vmatpush.msrb.mxu2 %v913_v24  ;;  %v836_v52 = vld [vmem:[%s2489_s6 + $0x18] sm:$0xff]  ;;  %749 = vmatpush.msra.mxu1 %v728_v58  ;;  %v497_v24 = vsel %vm99_vm0, %v1389_v19, -inf  ;;  %v835_v8 = vld [vmem:[%s2489_s6 + $0x10] sm:$0xff] }
  0xbd   :  { %v416_v38 = vadd.f32 %v1840_v26, %v414_v56  ;;  %v928_v26 = vld [vmem:[%s2490_s9 + $0xe0] sm:$0xff]  ;;  %v491_v22 = vsel %vm99_vm0, %v2561_v43, -inf  ;;  %954 = vmatpush.msrb.mxu3 %v929_v62  ;;  %v488_v16 = vmax.f32 %v480_v34, %v487_v61  ;;  %v490_v11 = vmax.f32 %v482_v5, %v489_v40  ;;  %v2562_v56 = vld [vmem:[#allocation20_spill] sm:$0xff]  ;;  %v911_v41 = vld [vmem:[%s2490_s9 + $0x58] sm:$0xff]  ;;  %859 = vmatpush.msrb.mxu0 %v837_v39 }
  0xbe   :  { %v493_v27 = vsel %vm99_vm0, %v2562_v56, -inf  ;;  %v492_v10 = vmax.f32 %v484_v6, %v491_v22  ;;  %935 = vmatpush.msrb.mxu2 %v912_v42  ;;  %v726_v49 = vld [vmem:[%s2488_s3 + $0x8] sm:$0xff]  ;;  %v499_v32 = vsel %vm99_vm0, %v1399_v31, -inf  ;;  %v910_v19 = vld [vmem:[%s2490_s9 + $0x50] sm:$0xff]  ;;  %750 = vmatpush.msra.mxu1 %v727_v12  ;;  %v501_v4 = vsel %vm99_vm0, %v1409_v44, -inf  ;;  %v725_v36 = vld [vmem:[%s2488_s3] sm:$0xff] }
  0xbf   :  { %v418_v50 = vadd.f32 %v1843_v59, %v416_v38  ;;  %v927_v59 = vld [vmem:[%s2490_s9 + $0xd8] sm:$0xff]  ;;  %v494_v20 = vmax.f32 %v486_v15, %v493_v27  ;;  %955 = vmatpush.msrb.mxu3 %v928_v26  ;;  %v496_v34 = vmax.f32 %v488_v16, %v495_v51  ;;  %v498_v28 = vmax.f32 %v490_v11, %v497_v24  ;;  %v834_v44 = vld [vmem:[%s2489_s6 + $0x8] sm:$0xff] }
  0xc0   :  { %v500_v55 = vmax.f32 %v492_v10, %v499_v32  ;;  %v503_v31 = vsel %vm99_vm0, %v1419_v54, -inf  ;;  %v505_v38 = vsel %vm99_vm0, %v1429_v1, -inf  ;;  %860 = vmatpush.msrb.mxu0 %v836_v52  ;;  %936 = vmatpush.msrb.mxu2 %v911_v41  ;;  %v909_v54 = vld [vmem:[%s2490_s9 + $0x48] sm:$0xff]  ;;  %v507_v46 = vsel %vm99_vm0, %v1439_v17, -inf  ;;  %v833_v17 = vld [vmem:[%s2489_s6] sm:$0xff]  ;;  %v872_v16 = vld [vmem:[%s2491_s8 + $0x18] sm:$0xff] }
  0xc1   :  { %v420_v62 = vsub.f32 %v418_v50, %v1862_v14  ;;  %v926_v14 = vld [vmem:[%s2490_s9 + $0xd0] sm:$0xff]  ;;  %956 = vmatpush.msrb.mxu3 %v927_v59  ;;  %v502_v39 = vmax.f32 %v494_v20, %v501_v4  ;;  %v504_v5 = vmax.f32 %v496_v34, %v503_v31  ;;  %v506_v6 = vmax.f32 %v498_v28, %v505_v38  ;;  %v925_v1 = vld [vmem:[%s2490_s9 + $0xc8] sm:$0xff]  ;;  %v920_v31 = vld [vmem:[%s2490_s9 + $0xa0] sm:$0xff] }
  0xc2   :  { %751 = vmatpush.msra.mxu1 %v726_v49  ;;  %v509_v42 = vsel %vm99_vm0, %v1449_v33, -inf  ;;  %v511_v26 = vsel %vm99_vm0, %v1459_v47, -inf  ;;  %v513_v15 = vsel %vm99_vm0, %v1469_v60, -inf  ;;  %861 = vmatpush.msrb.mxu0 %v835_v8  ;;  %v508_v61 = vmax.f32 %v500_v55, %v507_v46  ;;  %v908_v33 = vld [vmem:[%s2490_s9 + $0x40] sm:$0xff]  ;;  %v905_v34 = vld [vmem:[%s2490_s9 + $0x28] sm:$0xff] }
  0xc3   :  { %v421_v58 = vmul.f32 0.015873017, %v420_v62  ;;  %937 = vmatpush.msrb.mxu2 %v910_v19  ;;  %957 = vmatpush.msrb.mxu3 %v926_v14  ;;  %v510_v7 = vmax.f32 %v502_v39, %v509_v42  ;;  %v512_v40 = vmax.f32 %v504_v5, %v511_v26  ;;  %v924_v47 = vld [vmem:[%s2490_s9 + $0xc0] sm:$0xff]  ;;  %v514_v60 = vmax.f32 %v506_v6, %v513_v15  ;;  %v919_v26 = vld [vmem:[%s2490_s9 + $0x98] sm:$0xff] }
  0xc4   :  { %v515_v43 = vsel %vm99_vm0, %v1479_v13, -inf  ;;  %v517_v22 = vsel %vm99_vm0, %v1489_v29, -inf  ;;  %v519_v50 = vsel %vm99_vm0, %v1499_v48, -inf  ;;  %752 = vmatpush.msra.mxu1 %v725_v36  ;;  %862 = vmatpush.msrb.mxu0 %v834_v44  ;;  %v907_v13 = vld [vmem:[%s2490_s9 + $0x38] sm:$0xff]  ;;  %v521_v27 = vsel %vm99_vm0, %v1509_v63, -inf  ;;  %v906_v63 = vld [vmem:[%s2490_s9 + $0x30] sm:$0xff] }
  0xc5   :  { %v2077_v30 = vmax.f32 %v421_v58, 0.0  ;;  %938 = vmatpush.msrb.mxu2 %v909_v54  ;;  %958 = vmatpush.msrb.mxu3 %v925_v1  ;;  %v923_v29 = vld [vmem:[%s2490_s9 + $0xb8] sm:$0xff]  ;;  %v516_v48 = vmax.f32 %v508_v61, %v515_v43  ;;  %v518_v11 = vmax.f32 %v510_v7, %v517_v22  ;;  %v520_v56 = vmax.f32 %v512_v40, %v519_v50  ;;  %v2564_v5 = vld [vmem:[#allocation22_spill] sm:$0xff]  ;;  %v2565_v36 = vld [vmem:[#allocation23_spill] sm:$0xff] }
  0xc6   :  { %980 = vmatmul.msk.f32.vlgmr.msra.gmra.mxu1 %vm99_vm0, %v1697_v18  ;;  %863 = vmatpush.msrb.mxu0 %v833_v17  ;;  %v522_v52 = vmax.f32 %v514_v60, %v521_v27  ;;  %v523_v41 = vsel %vm99_vm0, %v1519_v23, -inf  ;;  %v525_v59 = vsel %vm99_vm0, %v1526_v37, -inf  ;;  %v527_v10 = vsel %vm99_vm0, %v1536_v53, -inf  ;;  %v922_v18 = vld [vmem:[%s2490_s9 + $0xb0] sm:$0xff]  ;;  %v2567_v40 = vld [vmem:[#allocation25_spill] sm:$0xff] }
  0xc7   :  { %986 = vrsqrt.f32 %v2077_v30  ;;  %v433_v12 = vand.u32 2147483648, %v2077_v30  ;;  %939 = vmatpush.msrb.mxu2 %v908_v33  ;;  %959 = vmatpush.msrb.mxu3 %v924_v47  ;;  %v524_v20 = vmax.f32 %v516_v48, %v523_v41  ;;  %v526_v51 = vmax.f32 %v518_v11, %v525_v59  ;;  %v2566_v61 = vld [vmem:[#allocation24_spill] sm:$0xff]  ;;  %v2568_v33 = vld [vmem:[#allocation26_spill] sm:$0xff]  ;;  %v989_v11 = vld [vmem:[%s2484_s0 + $0x8] sm:$0xff] }
  0xc8   :  { %v528_v24 = vmax.f32 %v520_v56, %v527_v10  ;;  %v529_v23 = vsel %vm99_vm0, %v1543_v2, -inf  ;;  %889 = vmatpush.msrb.mxu1 %v872_v16  ;;  %v531_v53 = vsel %vm99_vm0, %v1553_v25, -inf  ;;  %v533_v62 = vsel %vm99_vm0, %v1560_v45, -inf  ;;  %v921_v2 = vld [vmem:[%s2490_s9 + $0xa8] sm:$0xff]  ;;  %v902_v16 = vld [vmem:[%s2490_s9 + $0x10] sm:$0xff]  ;;  %v991_v41 = vld [vmem:[%s2484_s0 + $0x18] sm:$0xff] }
  0xc9   :  { %940 = vmatpush.msrb.mxu2 %v907_v13  ;;  %960 = vmatpush.msrb.mxu3 %v923_v29  ;;  %v530_v37 = vmax.f32 %v522_v52, %v529_v23  ;;  %v535_v49 = vsel %vm99_vm0, %v1570_v57, -inf  ;;  %v532_v28 = vmax.f32 %v524_v20, %v531_v53  ;;  %v534_v32 = vmax.f32 %v526_v51, %v533_v62  ;;  %v918_v13 = vld [vmem:[%s2490_s9 + $0x90] sm:$0xff]  ;;  %v988_v29 = vld [vmem:[%s2484_s0] sm:$0xff]  ;;  %v901_v20 = vld [vmem:[%s2490_s9 + $0x8] sm:$0xff] }
  0xca   :  { %v536_v8 = vmax.f32 %v528_v24, %v535_v49  ;;  %v537_v25 = vsel %vm99_vm0, %v1577_v21, -inf  ;;  %v539_v57 = vsel %vm99_vm0, %v1587_v35, -inf  ;;  %v541_v14 = vsel %vm99_vm0, %v1594_v0, -inf  ;;  %v904_v21 = vld [vmem:[%s2490_s9 + $0x20] sm:$0xff]  ;;  %v990_v27 = vld [vmem:[%s2484_s0 + $0x10] sm:$0xff]  ;;  %v917_v51 = vld [vmem:[%s2490_s9 + $0x88] sm:$0xff] }
  0xcb   :  { %941 = vmatpush.msrb.mxu2 %v906_v63  ;;  %961 = vmatpush.msrb.mxu3 %v922_v18  ;;  %v538_v45 = vmax.f32 %v530_v37, %v537_v25  ;;  %v543_v55 = vsel %vm99_vm0, %v1606_v3, -inf  ;;  %v540_v38 = vmax.f32 %v532_v28, %v539_v57  ;;  %v542_v58 = vmax.f32 %v534_v32, %v541_v14  ;;  %v2563_v3 = vld [vmem:[#allocation21_spill] sm:$0xff]  ;;  %v992_v24 = vld [vmem:[%s2484_s0 + $0x20] sm:$0xff]  ;;  %v993_v53 = vld [vmem:[%s2484_s0 + $0x28] sm:$0xff] }
  0xcc   :  { %v544_v35 = vmax.f32 %v536_v8, %v543_v55  ;;  %vm430_vm1 = vcmp.eq.f32.partialorder %v2077_v30, inf  ;;  %v545_v0 = vsel %vm99_vm0, %v1615_v9, -inf  ;;  %v547_v39 = vsel %vm99_vm0, %v2563_v3, -inf  ;;  %v903_v9 = vld [vmem:[%s2490_s9 + $0x18] sm:$0xff]  ;;  %v994_v49 = vld [vmem:[%s2484_s0 + $0x30] sm:$0xff]  ;;  %v900_v25 = vld [vmem:[%s2490_s9] sm:$0xff] }
  0xcd   :  { %v2137_v19 = vpop.eup %986  ;;  %942 = vmatpush.msrb.mxu2 %v905_v34  ;;  %962 = vmatpush.msrb.mxu3 %v921_v2  ;;  %v549_v6 = vsel %vm99_vm0, %v2564_v5, -inf  ;;  %v551_v44 = vsel %vm99_vm0, %v2565_v36, -inf  ;;  %vm432_vm2 = vcmp.eq.f32.partialorder %v2077_v30, 0.0  ;;  %v546_v1 = vmax.f32 %v538_v45, %v545_v0  ;;  %v995_v2 = vld [vmem:[%s2484_s0 + $0x38] sm:$0xff]  ;;  %v916_v45 = vld [vmem:[%s2490_s9 + $0x80] sm:$0xff] }
  0xce   :  { %v424_v4 = vmul.f32 %v2137_v19, %v2077_v30  ;;  %v548_v46 = vmax.f32 %v540_v38, %v547_v39  ;;  %v550_v42 = vmax.f32 %v542_v58, %v549_v6  ;;  %v552_v15 = vmax.f32 %v544_v35, %v551_v44  ;;  %v998_v38 = vld [vmem:[%s2484_s0 + $0x50] sm:$0xff]  ;;  %v999_v5 = vld [vmem:[%s2484_s0 + $0x58] sm:$0xff]  ;;  %v1000_v36 = vld [vmem:[%s2484_s0 + $0x60] sm:$0xff] }
  0xcf   :  { %943 = vmatpush.msrb.mxu2 %v904_v21  ;;  %963 = vmatpush.msrb.mxu3 %v920_v31  ;;  %v553_v7 = vsel %vm99_vm0, %v2566_v61, -inf  ;;  %v555_v17 = vsel %vm99_vm0, %v2567_v40, -inf  ;;  %v557_v47 = vsel %vm99_vm0, %v2568_v33, -inf  ;;  %v562_v48 = vsel %vm99_vm0, %v988_v29, inf  ;;  %v997_v21 = vld [vmem:[%s2484_s0 + $0x48] sm:$0xff] }
  0xd0   :  { %v425_v54 = vmul.f32 %v2137_v19, %v424_v4  ;;  %v554_v43 = vmax.f32 %v546_v1, %v553_v7  ;;  %v556_v22 = vmax.f32 %v548_v46, %v555_v17  ;;  %v558_v50 = vmax.f32 %v550_v42, %v557_v47  ;;  %v996_v4 = vld [vmem:[%s2484_s0 + $0x40] sm:$0xff]  ;;  %v1002_v46 = vld [vmem:[%s2484_s0 + $0x70] sm:$0xff]  ;;  %v870_v40 = vld [vmem:[%s2491_s8 + $0x8] sm:$0xff] }
  0xd1   :  { %944 = vmatpush.msrb.mxu2 %v903_v9  ;;  %964 = vmatpush.msrb.mxu3 %v919_v26  ;;  %v563_v56 = vsel %vm99_vm0, %v989_v11, inf  ;;  %v564_v52 = vsel %vm99_vm0, %v990_v27, inf  ;;  %v565_v59 = vsel %vm99_vm0, %v991_v41, inf  ;;  %v566_v23 = vsel %vm99_vm0, %v992_v24, inf  ;;  %v871_v7 = vld [vmem:[%s2491_s8 + $0x10] sm:$0xff]  ;;  %v1003_v47 = vld [vmem:[%s2484_s0 + $0x78] sm:$0xff] }
  0xd2   :  { %v426_v60 = vmul.f32 0.5, %v425_v54  ;;  %v559_v63 = vmax.f32 %v552_v15, %v554_v43  ;;  %v560_v18 = vmax.f32 %v556_v22, %v558_v50  ;;  %v567_v37 = vmin.f32 %v562_v48, %v566_v23  ;;  %v1001_v54 = vld [vmem:[%s2484_s0 + $0x68] sm:$0xff]  ;;  %v1004_v43 = vld [vmem:[%s2484_s0 + $0x80] sm:$0xff]  ;;  %890 = vmatpush.msrb.mxu1 %v871_v7  ;;  %v1007_v27 = vld [vmem:[%s2484_s0 + $0x98] sm:$0xff] }
  0xd3   :  { %945 = vmatpush.msrb.mxu2 %v902_v16  ;;  %965 = vmatpush.msrb.mxu3 %v918_v13  ;;  %v568_v62 = vsel %vm99_vm0, %v993_v53, inf  ;;  %v570_v34 = vsel %vm99_vm0, %v994_v49, inf  ;;  %v572_v28 = vsel %vm99_vm0, %v995_v2, inf  ;;  %v576_v31 = vsel %vm99_vm0, %v997_v21, inf  ;;  %v1006_v13 = vld [vmem:[%s2484_s0 + $0x90] sm:$0xff]  ;;  %v869_v48 = vld [vmem:[%s2491_s8] sm:$0xff] }
  0xd4   :  { %v427_v10 = vsub.f32 1.5, %v426_v60  ;;  %v561_v8 = vmax.f32 %v559_v63, %v560_v18  ;;  %v569_v57 = vmin.f32 %v563_v56, %v568_v62  ;;  %v571_v14 = vmin.f32 %v564_v52, %v570_v34  ;;  %v1008_v41 = vld [vmem:[%s2484_s0 + $0xa0] sm:$0xff]  ;;  %891 = vmatpush.msrb.mxu1 %v870_v40  ;;  %v1010_v24 = vld [vmem:[%s2484_s0 + $0xb0] sm:$0xff]  ;;  %v1011_v62 = vld [vmem:[%s2484_s0 + $0xb8] sm:$0xff] }
  0xd5   :  { %946 = vmatpush.msrb.mxu2 %v901_v20  ;;  %966 = vmatpush.msrb.mxu3 %v917_v51  ;;  %v573_v55 = vmin.f32 %v565_v59, %v572_v28  ;;  %v578_v58 = vsel %vm99_vm0, %v998_v38, inf  ;;  %v580_v6 = vsel %vm99_vm0, %v999_v5, inf  ;;  %v582_v44 = vsel %vm99_vm0, %v1000_v36, inf  ;;  %v1009_v20 = vld [vmem:[%s2484_s0 + $0xa8] sm:$0xff]  ;;  %v1012_v34 = vld [vmem:[%s2484_s0 + $0xc0] sm:$0xff] }
  0xd6   :  { %v428_v32 = vmul.f32 %v2137_v19, %v427_v10  ;;  %v574_v19 = vsel %vm99_vm0, %v996_v4, inf  ;;  %982 = vmatmul.msk.f32.vlgmr.msra.gmra.mxu3 %vm99_vm0, %v561_v8  ;;  %v577_v3 = vmin.f32 %v569_v57, %v576_v31  ;;  %v579_v39 = vmin.f32 %v571_v14, %v578_v58  ;;  %v899_v10 = vld [vmem:[%s2492_s1 + $0x8] sm:$0xff]  ;;  %892 = vmatpush.msrb.mxu1 %v869_v48  ;;  %v1015_v4 = vld [vmem:[%s2484_s0 + $0xd8] sm:$0xff]  ;;  %v1016_v21 = vld [vmem:[%s2484_s0 + $0xe0] sm:$0xff] }
  0xd7   :  { %v575_v0 = vmin.f32 %v567_v37, %v574_v19  ;;  %947 = vmatpush.msrb.mxu2 %v900_v25  ;;  %967 = vmatpush.msrb.mxu3 %v916_v45  ;;  %v584_v1 = vsel %vm99_vm0, %v1001_v54, inf  ;;  %v586_v42 = vsel %vm99_vm0, %v1002_v46, inf  ;;  %v581_v26 = vmin.f32 %v573_v55, %v580_v6  ;;  %v1013_v8 = vld [vmem:[%s2484_s0 + $0xc8] sm:$0xff]  ;;  %v1014_v45 = vld [vmem:[%s2484_s0 + $0xd0] sm:$0xff]  ;;  %v898_v38 = vld [vmem:[%s2492_s1] sm:$0xff] }
  0xd8   :  { %v429_v35 = vmul.f32 %v428_v32, %v2077_v30  ;;  %v585_v61 = vmin.f32 %v577_v3, %v584_v1  ;;  %v587_v33 = vmin.f32 %v579_v39, %v586_v42  ;;  %v588_v60 = vsel %vm99_vm0, %v1003_v47, inf  ;;  %v1018_v39 = vld [vmem:[%s2484_s0 + $0xf0] sm:$0xff]  ;;  %v1020_v1 = vld [vmem:[%s2484_s0 + $0x100] sm:$0xff] }
  0xd9   :  { %v583_v15 = vmin.f32 %v575_v0, %v582_v44  ;;  %v590_v22 = vsel %vm99_vm0, %v1004_v43, inf  ;;  %v589_v50 = vmin.f32 %v581_v26, %v588_v60  ;;  %v594_v29 = vsel %vm99_vm0, %v1006_v13, inf  ;;  %v1017_v0 = vld [vmem:[%s2484_s0 + $0xe8] sm:$0xff]  ;;  %v1019_v44 = vld [vmem:[%s2484_s0 + $0xf8] sm:$0xff]  ;;  %v1024_v60 = vld [vmem:[%s2484_s0 + $0x120] sm:$0xff] }
  0xda   :  { %v431_v9 = vsel %vm430_vm1, %v2077_v30, %v429_v35  ;;  %v1005_v30 = vld [vmem:[%s2484_s0 + $0x88] sm:$0xff]  ;;  %v595_v56 = vmin.f32 %v587_v33, %v594_v29  ;;  %v596_v52 = vsel %vm99_vm0, %v1007_v27, inf  ;;  %v598_v59 = vsel %vm99_vm0, %v1008_v41, inf  ;;  %v1023_v33 = vld [vmem:[%s2484_s0 + $0x118] sm:$0xff]  ;;  %v1028_v27 = vld [vmem:[%s2484_s0 + $0x140] sm:$0xff] }
  0xdb   :  { %v434_v17 = vsel %vm432_vm2, %v433_v12, %v431_v9  ;;  %v591_v16 = vmin.f32 %v583_v15, %v590_v22  ;;  %v592_v12 = vsel %vm99_vm0, %v1005_v30, inf  ;;  %v597_v63 = vmin.f32 %v589_v50, %v596_v52  ;;  %v1021_v26 = vld [vmem:[%s2484_s0 + $0x108] sm:$0xff] }
  0xdc   :  { %981 = vmatmul.msk.f32.vlgmr.msra.gmra.mxu2 %vm99_vm0, %v434_v17  ;;  %v593_v11 = vmin.f32 %v585_v61, %v592_v12  ;;  %v600_v51 = vsel %vm99_vm0, %v1009_v20, inf  ;;  %v602_v23 = vsel %vm99_vm0, %v1010_v24, inf  ;;  %v604_v49 = vsel %vm99_vm0, %v1011_v62, inf  ;;  %v1022_v61 = vld [vmem:[%s2484_s0 + $0x110] sm:$0xff] }
  0xdd   :  { %v599_v18 = vmin.f32 %v591_v16, %v598_v59  ;;  %v603_v53 = vmin.f32 %v595_v56, %v602_v23  ;;  %v606_v2 = vsel %vm99_vm0, %v1012_v34, inf  ;;  %v605_v28 = vmin.f32 %v597_v63, %v604_v49  ;;  %v1025_v16 = vld [vmem:[%s2484_s0 + $0x128] sm:$0xff]  ;;  %v1026_v12 = vld [vmem:[%s2484_s0 + $0x130] sm:$0xff]  ;;  %v1031_v23 = vld [vmem:[%s2484_s0 + $0x158] sm:$0xff] }
  0xde   :  { %v601_v37 = vmin.f32 %v593_v11, %v600_v51  ;;  %v608_v25 = vsel %vm99_vm0, %v1013_v8, inf  ;;  %v610_v57 = vsel %vm99_vm0, %v1014_v45, inf  ;;  %968 = vmatmul.f32.vlgmr.msrb.gmra.mxu3 %v899_v10  ;;  %v612_v19 = vsel %vm99_vm0, %v1015_v4, inf  ;;  %v1027_v11 = vld [vmem:[%s2484_s0 + $0x138] sm:$0xff]  ;;  %v1029_v10 = vld [vmem:[%s2484_s0 + $0x148] sm:$0xff] }
  0xdf   :  { %v607_v32 = vmin.f32 %v599_v18, %v606_v2  ;;  %v611_v55 = vmin.f32 %v603_v53, %v610_v57  ;;  %v614_v31 = vsel %vm99_vm0, %v1016_v21, inf  ;;  %v613_v58 = vmin.f32 %v605_v28, %v612_v19  ;;  %v1030_v18 = vld [vmem:[%s2484_s0 + $0x150] sm:$0xff]  ;;  %v1032_v53 = vld [vmem:[%s2484_s0 + $0x160] sm:$0xff]  ;;  %v1033_v2 = vld [vmem:[%s2484_s0 + $0x168] sm:$0xff] }
  0xe0   :  { %v609_v14 = vmin.f32 %v601_v37, %v608_v25  ;;  %v616_v3 = vsel %vm99_vm0, %v1017_v0, inf  ;;  %v618_v5 = vsel %vm99_vm0, %v1018_v39, inf  ;;  %v620_v54 = vsel %vm99_vm0, %v1019_v44, inf  ;;  %v1035_v57 = vld [vmem:[%s2484_s0 + $0x178] sm:$0xff] }
  0xe1   :  { %v615_v35 = vmin.f32 %v607_v32, %v614_v31  ;;  %v619_v36 = vmin.f32 %v611_v55, %v618_v5  ;;  %v622_v46 = vsel %vm99_vm0, %v1020_v1, inf  ;;  %v621_v42 = vmin.f32 %v613_v58, %v620_v54  ;;  %v1034_v32 = vld [vmem:[%s2484_s0 + $0x170] sm:$0xff]  ;;  %v1036_v55 = vld [vmem:[%s2484_s0 + $0x180] sm:$0xff]  ;;  %v1037_v31 = vld [vmem:[%s2484_s0 + $0x188] sm:$0xff] }
  0xe2   :  { %v617_v6 = vmin.f32 %v609_v14, %v616_v3  ;;  %v624_v15 = vsel %vm99_vm0, %v1021_v26, inf  ;;  %v626_v7 = vsel %vm99_vm0, %v1022_v61, inf  ;;  %v628_v47 = vsel %vm99_vm0, %v1023_v33, inf  ;;  %v1038_v58 = vld [vmem:[%s2484_s0 + $0x190] sm:$0xff]  ;;  %v1039_v39 = vld [vmem:[%s2484_s0 + $0x198] sm:$0xff]  ;;  %v1041_v1 = vld [vmem:[%s2484_s0 + $0x1a8] sm:$0xff] }
  0xe3   :  { %v623_v9 = vmin.f32 %v615_v35, %v622_v46  ;;  %v627_v17 = vmin.f32 %v619_v36, %v626_v7  ;;  %v630_v43 = vsel %vm99_vm0, %v1024_v60, inf  ;;  %v629_v22 = vmin.f32 %v621_v42, %v628_v47  ;;  %v1042_v42 = vld [vmem:[%s2484_s0 + $0x1b0] sm:$0xff]  ;;  %v1043_v61 = vld [vmem:[%s2484_s0 + $0x1b8] sm:$0xff]  ;;  %v1045_v60 = vld [vmem:[%s2484_s0 + $0x1c8] sm:$0xff] }
  0xe4   :  { %948 = vmatmul.f32.vlgmr.msrb.gmra.mxu2 %v898_v38  ;;  %v625_v40 = vmin.f32 %v617_v6, %v624_v15  ;;  %v632_v30 = vsel %vm99_vm0, %v1025_v16, inf  ;;  %v634_v13 = vsel %vm99_vm0, %v1026_v12, inf  ;;  %v636_v56 = vsel %vm99_vm0, %v1027_v11, inf  ;;  %v1040_v6 = vld [vmem:[%s2484_s0 + $0x1a0] sm:$0xff]  ;;  %v1047_v12 = vld [vmem:[%s2484_s0 + $0x1d8] sm:$0xff] }
  0xe5   :  { %v631_v50 = vmin.f32 %v623_v9, %v630_v43  ;;  %v635_v48 = vmin.f32 %v627_v17, %v634_v13  ;;  %v638_v52 = vsel %vm99_vm0, %v1028_v27, inf  ;;  %v637_v41 = vmin.f32 %v629_v22, %v636_v56  ;;  %v1046_v22 = vld [vmem:[%s2484_s0 + $0x1d0] sm:$0xff]  ;;  %v1049_v27 = vld [vmem:[%s2484_s0 + $0x1e8] sm:$0xff] }
  0xe6   :  { %v633_v29 = vmin.f32 %v625_v40, %v632_v30  ;;  %v640_v63 = vsel %vm99_vm0, %v1029_v10, inf  ;;  %v642_v20 = vsel %vm99_vm0, %v1030_v18, inf  ;;  %v644_v37 = vsel %vm99_vm0, %v1031_v23, inf  ;;  %v1044_v40 = vld [vmem:[%s2484_s0 + $0x1c0] sm:$0xff]  ;;  %v1051_v18 = vld [vmem:[%s2484_s0 + $0x1f8] sm:$0xff] }
  0xe7   :  { %v639_v59 = vmin.f32 %v631_v50, %v638_v52  ;;  %v643_v24 = vmin.f32 %v635_v48, %v642_v20  ;;  %v646_v62 = vsel %vm99_vm0, %v1032_v53, inf  ;;  %v645_v49 = vmin.f32 %v637_v41, %v644_v37  ;;  %v1050_v41 = vld [vmem:[%s2484_s0 + $0x1f0] sm:$0xff] }
  0xe8   :  { %v641_v51 = vmin.f32 %v633_v29, %v640_v63  ;;  %v648_v28 = vsel %vm99_vm0, %v1033_v2, inf  ;;  %v650_v8 = vsel %vm99_vm0, %v1034_v32, inf  ;;  %v652_v14 = vsel %vm99_vm0, %v1035_v57, inf  ;;  %v1048_v29 = vld [vmem:[%s2484_s0 + $0x1e0] sm:$0xff] }
  0xe9   :  { %v647_v34 = vmin.f32 %v639_v59, %v646_v62  ;;  %v651_v45 = vmin.f32 %v643_v24, %v650_v8  ;;  %v654_v4 = vsel %vm99_vm0, %v1036_v55, inf  ;;  %v653_v19 = vmin.f32 %v645_v49, %v652_v14  ;;  %v985_v62 = vld [vmem:[%s2485_s2] ss:$0 sm:$0xff] }
  0xea   :  { %v649_v25 = vmin.f32 %v641_v51, %v648_v28  ;;  %v656_v38 = vsel %vm99_vm0, %v1037_v31, inf  ;;  %v658_v35 = vsel %vm99_vm0, %v1038_v58, inf  ;;  %v660_v5 = vsel %vm99_vm0, %v1039_v39, inf }
  0xeb   :  { %v655_v21 = vmin.f32 %v647_v34, %v654_v4  ;;  %v659_v3 = vmin.f32 %v651_v45, %v658_v35  ;;  %v662_v36 = vsel %vm99_vm0, %v1040_v6, inf  ;;  %v661_v44 = vmin.f32 %v653_v19, %v660_v5 }
  0xec   :  { %v657_v0 = vmin.f32 %v649_v25, %v656_v38  ;;  %v664_v46 = vsel %vm99_vm0, %v1041_v1, inf  ;;  %v666_v9 = vsel %vm99_vm0, %v1042_v42, inf  ;;  %v668_v7 = vsel %vm99_vm0, %v1043_v61, inf }
  0xed   :  { %v663_v54 = vmin.f32 %v655_v21, %v662_v36  ;;  %v667_v15 = vmin.f32 %v659_v3, %v666_v9  ;;  %v670_v17 = vsel %vm99_vm0, %v1044_v40, inf  ;;  %v669_v33 = vmin.f32 %v661_v44, %v668_v7 }
  0xee   :  { %v665_v26 = vmin.f32 %v657_v0, %v664_v46  ;;  %v672_v43 = vsel %vm99_vm0, %v1045_v60, inf  ;;  %v674_v50 = vsel %vm99_vm0, %v1046_v22, inf  ;;  %v676_v13 = vsel %vm99_vm0, %v1047_v12, inf }
  0xef   :  { %v671_v47 = vmin.f32 %v663_v54, %v670_v17  ;;  %v675_v30 = vmin.f32 %v667_v15, %v674_v50  ;;  %v678_v48 = vsel %vm99_vm0, %v1048_v29, inf  ;;  %v677_v11 = vmin.f32 %v669_v33, %v676_v13 }
  0xf0   :  { %v673_v16 = vmin.f32 %v665_v26, %v672_v43  ;;  %v680_v52 = vsel %vm99_vm0, %v1049_v27, inf  ;;  %v682_v59 = vsel %vm99_vm0, %v1050_v41, inf  ;;  %v684_v20 = vsel %vm99_vm0, %v1051_v18, inf }
  0xf1   :  { %v679_v56 = vmin.f32 %v671_v47, %v678_v48  ;;  %v683_v63 = vmin.f32 %v675_v30, %v682_v59  ;;  %v685_v51 = vmin.f32 %v677_v11, %v684_v20 }
  0xf2   :  { %v681_v10 = vmin.f32 %v673_v16, %v680_v52 }
  0xf3   :  { %v687_v23 = vmin.f32 %v683_v63, %v685_v51 }
  0xf4   :  { %v686_v24 = vmin.f32 %v679_v56, %v681_v10 }
  0xf6   :  { %v688_v37 = vmin.f32 %v686_v24, %v687_v23 }
  0xf8   :  { %983 = vmatmul.msk.f32.vlgmr.msrb.gmra.mxu0 %vm99_vm0, %v688_v37 }
 0x102   :  { %v721_v53 = vpop.f32.mrf.mxu0 }
 0x103   :  { %984 = vmatmul.msk.f32.vlgmr.msrb.gmra.mxu1 %vm873_vm3, %v721_v53 }
 0x143   :  { %v754_v49 = vpop.f32.mrf.mxu1 }
 0x144   :  { %v760_v2 = vadd.f32 %v985_v62, %v754_v49 }
 0x159   :  { %v829_v34 = vpop.f32.mrf.mxu3 }
 0x15f   :  { %v793_v28 = vpop.f32.mrf.mxu2 }
 0x160   :  { %v796_v32 = vadd.f32 %v793_v28, %v760_v2 }
 0x161   :  { %v969_v25 = vpop.f32.mrf.mxu3 }
 0x162   :  { %v832_v8 = vadd.f32 %v829_v34, %v796_v32 }
 0x167   :  { %v949_v57 = vpop.f32.mrf.mxu2 }
 0x168   :  { %v970_v55 = vadd.f32 %v969_v25, %v949_v57 }
 0x175   :  { %v865_v45 = vpop.f32.mrf.mxu0 }
 0x176   :  { %v868_v14 = vadd.f32 %v865_v45, %v832_v8 }
 0x180   :  { %v894_v4 = vpop.f32.mrf.mxu1 }
 0x181   :  { %v897_v19 = vadd.f32 %v894_v4, %v868_v14 }
 0x183   :  { %v972_v21 = vadd.f32 %v970_v55, %v897_v19 }
 0x185   :  { %v973_v31 = vmax.f32 %v972_v21, 0.0 }
 0x187   :  { %974 = vst [vmem:[%s2493_s10] sm:$0xff] %v973_v31 }

</bundles_post_ra>
